<compile_context>
chip_gen: v7x
topology: tpu7x:2x2x1
jax: 0.10.0
libtpu: 0.0.40
codegen_flags: <defaults>
</compile_context>

<pallas_src>
import numpy as np

import jax
import jax.numpy as jnp
from jax.experimental import pallas as pl
from jax.experimental.pallas import tpu as pltpu


def _round_up(x, m):
    return (x + m - 1) // m * m


# ---------------------- fully fused SimpleCNN kernel -------------------------

def _simple_cnn_kernel(x_ref, w1_ref, b1_ref, w2_ref, b2_ref,
                       wf1_ref, bf1_ref, wf2_ref, bf2_ref, wf3_ref, bf3_ref,
                       o_ref):
    """Fused SimpleCNN forward for one batch tile of B images.

    x_ref : (4, 8, B, 128) bf16  input rows deinterleaved mod 4:
                                 x_ref[p, r, b, w*3+c] = image[b, 4*r+p, w, c]
                                 (lanes >= 96 are zero padding)
    w1_ref: (5, 128, 256)  bf16  conv1 Toeplitz weights, [even|odd] out cols
    w2_ref: (5, 128, 256)  bf16  conv2 Toeplitz weights, [even|odd] out cols
    b*_ref: (1, 128)       f32   biases tiled over (pooled col, out chan)
    wf*   : bf16 fc weights (fc1 kept as (5,128,128): one slab per pooled row)
    o_ref : (B, 128)       f32   logits live in lanes [0, 10)
    """
    B = o_ref.shape[0]
    f32 = jnp.float32

    # One flat (8B, 128) slab per row phase; slab row = r*B + b.
    xph = [x_ref[p].reshape(8 * B, 128) for p in range(4)]

    def conv_block(read_row, kh, w_ref, b_ref):
        # read_row(s) returns the (n_rows*B, 128) bf16 slab whose M-row
        # (j*B + b) holds the conv input row (stride*j + s) of image b.
        best = None
        for dh in range(2):                      # row offset inside 2x2 pool
            acc = None
            for i in range(kh):                  # conv kernel row
                d = jnp.dot(read_row(dh + i), w_ref[i],
                            preferred_element_type=f32)
                acc = d if acc is None else acc + d
            best = acc if best is None else jnp.maximum(best, acc)
        # column parity of the 2x2 pool lives in the two 128-lane halves.
        m = jnp.maximum(best[:, :128], best[:, 128:])
        return jnp.maximum(m + b_ref[...], 0.0).astype(jnp.bfloat16)

    # ---- conv1(3->6, 5x5) + ReLU + maxpool(2,2), split by pooled-row parity q.
    # Pooled row ph1 = 2*pq + q needs input image rows 4*pq + (2*q + dh + i).
    def conv1_read(q):
        def read(s):                             # s = dh + i
            sq = s + 2 * q                       # total row offset in [0, 8)
            return xph[sq % 4][(sq // 4) * B:(sq // 4 + 7) * B, :]
        return read

    y1 = [conv_block(conv1_read(q), 5, w1_ref, b1_ref) for q in range(2)]
    # y1[q]: (7B, 128) bf16, row = pq*B + b, lane = pw1*6 + c (lanes>=84 zero).

    # ---- conv2(6->16, 5x5) + ReLU + maxpool(2,2).  Pooled row ph2 needs conv1
    # pooled rows 2*ph2 + (dh + i) -> parity (dh+i) % 2, row offset (dh+i)//2.
    def conv2_read(s):                           # s = dh + i in [0, 6)
        return y1[s % 2][(s // 2) * B:(s // 2 + 5) * B, :]

    y2 = conv_block(conv2_read, 5, w2_ref, b2_ref)
    # y2: (5B, 128) bf16, row = ph2*B + b, lane = pw2*16 + oc (lanes>=80 zero).

    # ---- fc1(400->120) + ReLU: contraction folded over the 5 pooled rows.
    h = None
    for r in range(5):
        d = jnp.dot(y2[r * B:(r + 1) * B, :], wf1_ref[r],
                    preferred_element_type=f32)
        h = d if h is None else h + d
    h = jnp.maximum(h + bf1_ref[...], 0.0).astype(jnp.bfloat16)

    # ---- fc2(120->84) + ReLU,  fc3(84->10).
    h = jnp.dot(h, wf2_ref[...], preferred_element_type=f32)
    h = jnp.maximum(h + bf2_ref[...], 0.0).astype(jnp.bfloat16)
    o_ref[...] = (jnp.dot(h, wf3_ref[...], preferred_element_type=f32)
                  + bf3_ref[...])


@jax.jit
def simple_cnn_forward(prepped, x):
    """x: (N, 3, 32, 32) f32 NCHW (like the PyTorch module) -> (N, 10) f32."""
    N = x.shape[0]
    B = min(128, _round_up(N, 16))       # batch tile per grid step
    Np = _round_up(N, B)

    # NCHW -> row-deinterleaved (phase, r, n, w*c) bf16 slab; lanes 96 -> 128.
    xt = jnp.transpose(x, (0, 2, 3, 1)).reshape(N, 8, 4, 96)
    xt = jnp.transpose(xt, (2, 1, 0, 3)).astype(jnp.bfloat16)   # (4, 8, N, 96)
    xt = jnp.pad(xt, ((0, 0), (0, 0), (0, Np - N), (0, 32)))

    out = pl.pallas_call(
        _simple_cnn_kernel,
        out_shape=jax.ShapeDtypeStruct((Np, 128), jnp.float32),
        grid=(Np // B,),
        in_specs=[
            pl.BlockSpec((4, 8, B, 128), lambda m: (0, 0, m, 0)),
            pl.BlockSpec((5, 128, 256), lambda m: (0, 0, 0)),
            pl.BlockSpec((1, 128), lambda m: (0, 0)),
            pl.BlockSpec((5, 128, 256), lambda m: (0, 0, 0)),
            pl.BlockSpec((1, 128), lambda m: (0, 0)),
            pl.BlockSpec((5, 128, 128), lambda m: (0, 0, 0)),
            pl.BlockSpec((1, 128), lambda m: (0, 0)),
            pl.BlockSpec((128, 128), lambda m: (0, 0)),
            pl.BlockSpec((1, 128), lambda m: (0, 0)),
            pl.BlockSpec((128, 128), lambda m: (0, 0)),
            pl.BlockSpec((1, 128), lambda m: (0, 0)),
        ],
        out_specs=pl.BlockSpec((B, 128), lambda m: (m, 0)),
        compiler_params=pltpu.CompilerParams(
            dimension_semantics=("parallel",)),
    )(xt, prepped["c1_w"], prepped["c1_b"], prepped["c2_w"], prepped["c2_b"],
      prepped["fc1_w"], prepped["fc1_b"], prepped["fc2_w"], prepped["fc2_b"],
      prepped["fc3_w"], prepped["fc3_b"])
    return out[:N, :10]


# ---------------- one-time (outside jit) parameter repacking -----------------

def init_params(key):
    """PyTorch-layout parameters (Conv2d: (OC,C,KH,KW); Linear: (out,in))."""
    ks = jax.random.split(key, 10)

    def u(k, shape, fan_in):
        bound = 1.0 / float(np.sqrt(fan_in))
        return jax.random.uniform(k, shape, jnp.float32, -bound, bound)

    return {
        "conv1_w": u(ks[0], (6, 3, 5, 5), 3 * 5 * 5),
        "conv1_b": u(ks[1], (6,), 3 * 5 * 5),
        "conv2_w": u(ks[2], (16, 6, 5, 5), 6 * 5 * 5),
        "conv2_b": u(ks[3], (16,), 6 * 5 * 5),
        "fc1_w": u(ks[4], (120, 400), 400),
        "fc1_b": u(ks[5], (120,), 400),
        "fc2_w": u(ks[6], (84, 120), 120),
        "fc2_b": u(ks[7], (10,) if False else (84,), 120),
        "fc3_w": u(ks[8], (10, 84), 84),
        "fc3_b": u(ks[9], (10,), 84),
    }


def _conv_toeplitz_combined(w, b, W, in_lanes, out_lanes):
    """Expand conv weight (OC,C,KH,KW) into a combined even/odd-output-column
    Toeplitz weight of shape (KH, in_lanes, 2*out_lanes) so that for output
    column parity dw and kernel row i:
        conv[oh, 2*pw+dw, oc] = sum_i (X_row(oh+i) @ wt[i])[dw*out_lanes + pw*OC + oc]
    Zero everywhere outside the real region (pads stay exactly zero, which the
    next stage relies on)."""
    OC, C, KH, KW = w.shape
    OW = W - KW + 1
    PW = OW // 2
    wt = np.zeros((KH, in_lanes, 2 * out_lanes), np.float32)
    for i in range(KH):
        for dw in range(2):
            for j in range(KW):
                blk = w[:, :, i, j].T                       # (C, OC)
                for pw in range(PW):
                    r0 = (2 * pw + dw + j) * C
                    c0 = dw * out_lanes + pw * OC
                    wt[i, r0:r0 + C, c0:c0 + OC] = blk
    bt = np.zeros((1, out_lanes), np.float32)
    bt[0, :PW * OC] = np.tile(b, PW)
    return jnp.asarray(wt, jnp.bfloat16), jnp.asarray(bt, jnp.float32)


def prep_params(params):
    """Hoisted out of jit: bf16 combined Toeplitz conv weights, tiled biases,
    and transposed / column-permuted / 128-lane-padded bf16 fc weights."""
    p = {k: np.asarray(v, np.float32) for k, v in params.items()}
    LANE = 128

    # conv1: input lanes w*3+c (<96, padded to 128); pooled cols 14*6=84 -> 128.
    c1_w, c1_b = _conv_toeplitz_combined(p["conv1_w"], p["conv1_b"],
                                         W=32, in_lanes=LANE, out_lanes=LANE)
    # conv2: input is conv1's 128-lane output (real cols pw1*6+c < 84);
    # pooled cols 5*16=80 -> 128.
    c2_w, c2_b = _conv_toeplitz_combined(p["conv2_w"], p["conv2_b"],
                                         W=14, in_lanes=LANE, out_lanes=LANE)

    # fc1 consumes the conv2 output one pooled row at a time (lane = w*16+c).
    # PyTorch's view(-1, 400) index is c*25 + h*5 + w, so permute columns.
    fc1 = p["fc1_w"]                                         # (120, 400)
    w1_hwc = fc1.reshape(120, 16, 5, 5).transpose(2, 3, 1, 0)   # (h, w, c, out)
    w1_full = np.zeros((5, LANE, LANE), np.float32)
    w1_full[:, :80, :120] = w1_hwc.reshape(5, 80, 120)
    b1_full = np.zeros((1, LANE), np.float32)
    b1_full[0, :120] = p["fc1_b"]

    def pad_fc(w_t, b):
        K, Nn = w_t.shape
        wp = np.zeros((LANE, LANE), np.float32)
        wp[:K, :Nn] = w_t
        bp = np.zeros((1, LANE), np.float32)
        bp[0, :Nn] = b
        return jnp.asarray(wp, jnp.bfloat16), jnp.asarray(bp, jnp.float32)

    w2p, b2p = pad_fc(p["fc2_w"].T, p["fc2_b"])
    w3p, b3p = pad_fc(p["fc3_w"].T, p["fc3_b"])

    return {
        "c1_w": c1_w, "c1_b": c1_b,
        "c2_w": c2_w, "c2_b": c2_b,
        "fc1_w": jnp.asarray(w1_full, jnp.bfloat16),
        "fc1_b": jnp.asarray(b1_full, jnp.float32),
        "fc2_w": w2p, "fc2_b": b2p,
        "fc3_w": w3p, "fc3_b": b3p,
    }


# --------------------------- pure-JAX reference ------------------------------

def reference_forward(params, x):
    def conv(y, w, b):
        y = jax.lax.conv_general_dilated(
            y, w, window_strides=(1, 1), padding="VALID",
            dimension_numbers=("NCHW", "OIHW", "NCHW"))
        return y + b[None, :, None, None]

    def pool(y):
        n, c, hh, ww = y.shape
        return jnp.max(y.reshape(n, c, hh // 2, 2, ww // 2, 2), axis=(3, 5))

    y = pool(jax.nn.relu(conv(x, params["conv1_w"], params["conv1_b"])))
    y = pool(jax.nn.relu(conv(y, params["conv2_w"], params["conv2_b"])))
    y = y.reshape(y.shape[0], -1)
    y = jax.nn.relu(y @ params["fc1_w"].T + params["fc1_b"])
    y = jax.nn.relu(y @ params["fc2_w"].T + params["fc2_b"])
    return y @ params["fc3_w"].T + params["fc3_b"]


if __name__ == "__main__":
    key = jax.random.PRNGKey(0)
    pkey, xkey = jax.random.split(key)
    params = init_params(pkey)
    prepped = prep_params(params)          # one-time repack, outside jit

    x = jax.random.normal(xkey, (2, 3, 32, 32), jnp.float32)

    out = jax.block_until_ready(simple_cnn_forward(prepped, x))
    assert out.shape == (2, 10) and out.dtype == jnp.float32

    ref = reference_forward(params, x)
    err = float(jnp.max(jnp.abs(out - ref)))
    assert err < 1e-1, f"mismatch vs f32 reference: {err}"   # bf16 MXU drift

    print("KERNEL_OK")
</pallas_src>

<mosaic_0001>
module attributes {stable_mosaic.version = 11 : i64} {
  func.func @_simple_cnn_kernel(%arg0: i32, %arg1: memref<4x8x16x128xbf16, #tpu.memory_space<vmem>>, %arg2: memref<5x128x256xbf16, #tpu.memory_space<vmem>>, %arg3: memref<1x128xf32, #tpu.memory_space<vmem>>, %arg4: memref<5x128x256xbf16, #tpu.memory_space<vmem>>, %arg5: memref<1x128xf32, #tpu.memory_space<vmem>>, %arg6: memref<5x128x128xbf16, #tpu.memory_space<vmem>>, %arg7: memref<1x128xf32, #tpu.memory_space<vmem>>, %arg8: memref<128x128xbf16, #tpu.memory_space<vmem>>, %arg9: memref<1x128xf32, #tpu.memory_space<vmem>>, %arg10: memref<128x128xbf16, #tpu.memory_space<vmem>>, %arg11: memref<1x128xf32, #tpu.memory_space<vmem>>, %arg12: memref<16x128xf32, #tpu.memory_space<vmem>>) attributes {dimension_semantics = [#tpu.dimension_semantics<parallel>], iteration_bounds = array<i64: 1>, scalar_prefetch = 0 : i64, scratch_operands = 0 : i64, tpu.core_type = #tpu.core_type<tc>, window_params = [{transform_indices = @transform_0, window_bounds = array<i64: 4, 8, 16, 128>}, {pipeline_mode = #tpu.pipeline_mode<synchronous>, transform_indices = @transform_1, window_bounds = array<i64: 5, 128, 256>}, {pipeline_mode = #tpu.pipeline_mode<synchronous>, transform_indices = @transform_2, window_bounds = array<i64: 1, 128>}, {pipeline_mode = #tpu.pipeline_mode<synchronous>, transform_indices = @transform_3, window_bounds = array<i64: 5, 128, 256>}, {pipeline_mode = #tpu.pipeline_mode<synchronous>, transform_indices = @transform_4, window_bounds = array<i64: 1, 128>}, {pipeline_mode = #tpu.pipeline_mode<synchronous>, transform_indices = @transform_5, window_bounds = array<i64: 5, 128, 128>}, {pipeline_mode = #tpu.pipeline_mode<synchronous>, transform_indices = @transform_6, window_bounds = array<i64: 1, 128>}, {pipeline_mode = #tpu.pipeline_mode<synchronous>, transform_indices = @transform_7, window_bounds = array<i64: 128, 128>}, {pipeline_mode = #tpu.pipeline_mode<synchronous>, transform_indices = @transform_8, window_bounds = array<i64: 1, 128>}, {pipeline_mode = #tpu.pipeline_mode<synchronous>, transform_indices = @transform_9, window_bounds = array<i64: 128, 128>}, {pipeline_mode = #tpu.pipeline_mode<synchronous>, transform_indices = @transform_10, window_bounds = array<i64: 1, 128>}, {transform_indices = @transform_11, window_bounds = array<i64: 16, 128>}]} {
    %c0 = arith.constant 0 : index
    %c0_0 = arith.constant 0 : index
    %c0_1 = arith.constant 0 : index
    %c0_2 = arith.constant 0 : index
    %0 = vector.load %arg1[%c0, %c0_0, %c0_1, %c0_2] : memref<4x8x16x128xbf16, #tpu.memory_space<vmem>>, vector<1x8x16x128xbf16>
    %1 = vector.shape_cast %0 : vector<1x8x16x128xbf16> to vector<8x16x128xbf16>
    %2 = vector.shape_cast %1 : vector<8x16x128xbf16> to vector<128x128xbf16>
    %c1 = arith.constant 1 : index
    %c0_3 = arith.constant 0 : index
    %c0_4 = arith.constant 0 : index
    %c0_5 = arith.constant 0 : index
    %3 = vector.load %arg1[%c1, %c0_3, %c0_4, %c0_5] : memref<4x8x16x128xbf16, #tpu.memory_space<vmem>>, vector<1x8x16x128xbf16>
    %4 = vector.shape_cast %3 : vector<1x8x16x128xbf16> to vector<8x16x128xbf16>
    %5 = vector.shape_cast %4 : vector<8x16x128xbf16> to vector<128x128xbf16>
    %c2 = arith.constant 2 : index
    %c0_6 = arith.constant 0 : index
    %c0_7 = arith.constant 0 : index
    %c0_8 = arith.constant 0 : index
    %6 = vector.load %arg1[%c2, %c0_6, %c0_7, %c0_8] : memref<4x8x16x128xbf16, #tpu.memory_space<vmem>>, vector<1x8x16x128xbf16>
    %7 = vector.shape_cast %6 : vector<1x8x16x128xbf16> to vector<8x16x128xbf16>
    %8 = vector.shape_cast %7 : vector<8x16x128xbf16> to vector<128x128xbf16>
    %c3 = arith.constant 3 : index
    %c0_9 = arith.constant 0 : index
    %c0_10 = arith.constant 0 : index
    %c0_11 = arith.constant 0 : index
    %9 = vector.load %arg1[%c3, %c0_9, %c0_10, %c0_11] : memref<4x8x16x128xbf16, #tpu.memory_space<vmem>>, vector<1x8x16x128xbf16>
    %10 = vector.shape_cast %9 : vector<1x8x16x128xbf16> to vector<8x16x128xbf16>
    %11 = vector.shape_cast %10 : vector<8x16x128xbf16> to vector<128x128xbf16>
    %12 = vector.extract_strided_slice %2 {offsets = [0, 0], sizes = [112, 128], strides = [1, 1]} : vector<128x128xbf16> to vector<112x128xbf16>
    %c0_12 = arith.constant 0 : index
    %c0_13 = arith.constant 0 : index
    %c0_14 = arith.constant 0 : index
    %13 = vector.load %arg2[%c0_12, %c0_13, %c0_14] : memref<5x128x256xbf16, #tpu.memory_space<vmem>>, vector<1x128x256xbf16>
    %14 = vector.shape_cast %13 : vector<1x128x256xbf16> to vector<128x256xbf16>
    %cst = arith.constant dense<0.000000e+00> : vector<112x256xf32>
    %15 = tpu.matmul %12, %14, %cst {dimension_numbers = #tpu.dot_dimension_numbers<[1], [0], [0], [1], [0, 0, 1, 1], [], []>} : vector<112x128xbf16>, vector<128x256xbf16>, vector<112x256xf32> -> vector<112x256xf32>
    %16 = vector.extract_strided_slice %5 {offsets = [0, 0], sizes = [112, 128], strides = [1, 1]} : vector<128x128xbf16> to vector<112x128xbf16>
    %c1_15 = arith.constant 1 : index
    %c0_16 = arith.constant 0 : index
    %c0_17 = arith.constant 0 : index
    %17 = vector.load %arg2[%c1_15, %c0_16, %c0_17] : memref<5x128x256xbf16, #tpu.memory_space<vmem>>, vector<1x128x256xbf16>
    %18 = vector.shape_cast %17 : vector<1x128x256xbf16> to vector<128x256xbf16>
    %cst_18 = arith.constant dense<0.000000e+00> : vector<112x256xf32>
    %19 = tpu.matmul %16, %18, %cst_18 {dimension_numbers = #tpu.dot_dimension_numbers<[1], [0], [0], [1], [0, 0, 1, 1], [], []>} : vector<112x128xbf16>, vector<128x256xbf16>, vector<112x256xf32> -> vector<112x256xf32>
    %20 = arith.addf %15, %19 : vector<112x256xf32>
    %21 = vector.extract_strided_slice %8 {offsets = [0, 0], sizes = [112, 128], strides = [1, 1]} : vector<128x128xbf16> to vector<112x128xbf16>
    %c2_19 = arith.constant 2 : index
    %c0_20 = arith.constant 0 : index
    %c0_21 = arith.constant 0 : index
    %22 = vector.load %arg2[%c2_19, %c0_20, %c0_21] : memref<5x128x256xbf16, #tpu.memory_space<vmem>>, vector<1x128x256xbf16>
    %23 = vector.shape_cast %22 : vector<1x128x256xbf16> to vector<128x256xbf16>
    %cst_22 = arith.constant dense<0.000000e+00> : vector<112x256xf32>
    %24 = tpu.matmul %21, %23, %cst_22 {dimension_numbers = #tpu.dot_dimension_numbers<[1], [0], [0], [1], [0, 0, 1, 1], [], []>} : vector<112x128xbf16>, vector<128x256xbf16>, vector<112x256xf32> -> vector<112x256xf32>
    %25 = arith.addf %20, %24 : vector<112x256xf32>
    %26 = vector.extract_strided_slice %11 {offsets = [0, 0], sizes = [112, 128], strides = [1, 1]} : vector<128x128xbf16> to vector<112x128xbf16>
    %c3_23 = arith.constant 3 : index
    %c0_24 = arith.constant 0 : index
    %c0_25 = arith.constant 0 : index
    %27 = vector.load %arg2[%c3_23, %c0_24, %c0_25] : memref<5x128x256xbf16, #tpu.memory_space<vmem>>, vector<1x128x256xbf16>
    %28 = vector.shape_cast %27 : vector<1x128x256xbf16> to vector<128x256xbf16>
    %cst_26 = arith.constant dense<0.000000e+00> : vector<112x256xf32>
    %29 = tpu.matmul %26, %28, %cst_26 {dimension_numbers = #tpu.dot_dimension_numbers<[1], [0], [0], [1], [0, 0, 1, 1], [], []>} : vector<112x128xbf16>, vector<128x256xbf16>, vector<112x256xf32> -> vector<112x256xf32>
    %30 = arith.addf %25, %29 : vector<112x256xf32>
    %31 = vector.extract_strided_slice %2 {offsets = [16, 0], sizes = [112, 128], strides = [1, 1]} : vector<128x128xbf16> to vector<112x128xbf16>
    %c4 = arith.constant 4 : index
    %c0_27 = arith.constant 0 : index
    %c0_28 = arith.constant 0 : index
    %32 = vector.load %arg2[%c4, %c0_27, %c0_28] : memref<5x128x256xbf16, #tpu.memory_space<vmem>>, vector<1x128x256xbf16>
    %33 = vector.shape_cast %32 : vector<1x128x256xbf16> to vector<128x256xbf16>
    %cst_29 = arith.constant dense<0.000000e+00> : vector<112x256xf32>
    %34 = tpu.matmul %31, %33, %cst_29 {dimension_numbers = #tpu.dot_dimension_numbers<[1], [0], [0], [1], [0, 0, 1, 1], [], []>} : vector<112x128xbf16>, vector<128x256xbf16>, vector<112x256xf32> -> vector<112x256xf32>
    %35 = arith.addf %30, %34 : vector<112x256xf32>
    %36 = vector.extract_strided_slice %5 {offsets = [0, 0], sizes = [112, 128], strides = [1, 1]} : vector<128x128xbf16> to vector<112x128xbf16>
    %c0_30 = arith.constant 0 : index
    %c0_31 = arith.constant 0 : index
    %c0_32 = arith.constant 0 : index
    %37 = vector.load %arg2[%c0_30, %c0_31, %c0_32] : memref<5x128x256xbf16, #tpu.memory_space<vmem>>, vector<1x128x256xbf16>
    %38 = vector.shape_cast %37 : vector<1x128x256xbf16> to vector<128x256xbf16>
    %cst_33 = arith.constant dense<0.000000e+00> : vector<112x256xf32>
    %39 = tpu.matmul %36, %38, %cst_33 {dimension_numbers = #tpu.dot_dimension_numbers<[1], [0], [0], [1], [0, 0, 1, 1], [], []>} : vector<112x128xbf16>, vector<128x256xbf16>, vector<112x256xf32> -> vector<112x256xf32>
    %40 = vector.extract_strided_slice %8 {offsets = [0, 0], sizes = [112, 128], strides = [1, 1]} : vector<128x128xbf16> to vector<112x128xbf16>
    %c1_34 = arith.constant 1 : index
    %c0_35 = arith.constant 0 : index
    %c0_36 = arith.constant 0 : index
    %41 = vector.load %arg2[%c1_34, %c0_35, %c0_36] : memref<5x128x256xbf16, #tpu.memory_space<vmem>>, vector<1x128x256xbf16>
    %42 = vector.shape_cast %41 : vector<1x128x256xbf16> to vector<128x256xbf16>
    %cst_37 = arith.constant dense<0.000000e+00> : vector<112x256xf32>
    %43 = tpu.matmul %40, %42, %cst_37 {dimension_numbers = #tpu.dot_dimension_numbers<[1], [0], [0], [1], [0, 0, 1, 1], [], []>} : vector<112x128xbf16>, vector<128x256xbf16>, vector<112x256xf32> -> vector<112x256xf32>
    %44 = arith.addf %39, %43 : vector<112x256xf32>
    %45 = vector.extract_strided_slice %11 {offsets = [0, 0], sizes = [112, 128], strides = [1, 1]} : vector<128x128xbf16> to vector<112x128xbf16>
    %c2_38 = arith.constant 2 : index
    %c0_39 = arith.constant 0 : index
    %c0_40 = arith.constant 0 : index
    %46 = vector.load %arg2[%c2_38, %c0_39, %c0_40] : memref<5x128x256xbf16, #tpu.memory_space<vmem>>, vector<1x128x256xbf16>
    %47 = vector.shape_cast %46 : vector<1x128x256xbf16> to vector<128x256xbf16>
    %cst_41 = arith.constant dense<0.000000e+00> : vector<112x256xf32>
    %48 = tpu.matmul %45, %47, %cst_41 {dimension_numbers = #tpu.dot_dimension_numbers<[1], [0], [0], [1], [0, 0, 1, 1], [], []>} : vector<112x128xbf16>, vector<128x256xbf16>, vector<112x256xf32> -> vector<112x256xf32>
    %49 = arith.addf %44, %48 : vector<112x256xf32>
    %50 = vector.extract_strided_slice %2 {offsets = [16, 0], sizes = [112, 128], strides = [1, 1]} : vector<128x128xbf16> to vector<112x128xbf16>
    %c3_42 = arith.constant 3 : index
    %c0_43 = arith.constant 0 : index
    %c0_44 = arith.constant 0 : index
    %51 = vector.load %arg2[%c3_42, %c0_43, %c0_44] : memref<5x128x256xbf16, #tpu.memory_space<vmem>>, vector<1x128x256xbf16>
    %52 = vector.shape_cast %51 : vector<1x128x256xbf16> to vector<128x256xbf16>
    %cst_45 = arith.constant dense<0.000000e+00> : vector<112x256xf32>
    %53 = tpu.matmul %50, %52, %cst_45 {dimension_numbers = #tpu.dot_dimension_numbers<[1], [0], [0], [1], [0, 0, 1, 1], [], []>} : vector<112x128xbf16>, vector<128x256xbf16>, vector<112x256xf32> -> vector<112x256xf32>
    %54 = arith.addf %49, %53 : vector<112x256xf32>
    %55 = vector.extract_strided_slice %5 {offsets = [16, 0], sizes = [112, 128], strides = [1, 1]} : vector<128x128xbf16> to vector<112x128xbf16>
    %c4_46 = arith.constant 4 : index
    %c0_47 = arith.constant 0 : index
    %c0_48 = arith.constant 0 : index
    %56 = vector.load %arg2[%c4_46, %c0_47, %c0_48] : memref<5x128x256xbf16, #tpu.memory_space<vmem>>, vector<1x128x256xbf16>
    %57 = vector.shape_cast %56 : vector<1x128x256xbf16> to vector<128x256xbf16>
    %cst_49 = arith.constant dense<0.000000e+00> : vector<112x256xf32>
    %58 = tpu.matmul %55, %57, %cst_49 {dimension_numbers = #tpu.dot_dimension_numbers<[1], [0], [0], [1], [0, 0, 1, 1], [], []>} : vector<112x128xbf16>, vector<128x256xbf16>, vector<112x256xf32> -> vector<112x256xf32>
    %59 = arith.addf %54, %58 : vector<112x256xf32>
    %60 = arith.maximumf %35, %59 : vector<112x256xf32>
    %61 = vector.extract_strided_slice %60 {offsets = [0, 0], sizes = [112, 128], strides = [1, 1]} : vector<112x256xf32> to vector<112x128xf32>
    %62 = vector.extract_strided_slice %60 {offsets = [0, 128], sizes = [112, 128], strides = [1, 1]} : vector<112x256xf32> to vector<112x128xf32>
    %63 = arith.maximumf %61, %62 : vector<112x128xf32>
    %c0_50 = arith.constant 0 : index
    %c0_51 = arith.constant 0 : index
    %64 = vector.load %arg3[%c0_50, %c0_51] : memref<1x128xf32, #tpu.memory_space<vmem>>, vector<1x128xf32>
    %65 = vector.broadcast %64 : vector<1x128xf32> to vector<112x128xf32>
    %66 = arith.addf %63, %65 : vector<112x128xf32>
    %cst_52 = arith.constant 0.000000e+00 : f32
    %67 = vector.broadcast %cst_52 : f32 to vector<112x128xf32>
    %68 = arith.maximumf %66, %67 : vector<112x128xf32>
    %69 = arith.truncf %68 : vector<112x128xf32> to vector<112x128xbf16>
    %70 = vector.extract_strided_slice %8 {offsets = [0, 0], sizes = [112, 128], strides = [1, 1]} : vector<128x128xbf16> to vector<112x128xbf16>
    %c0_53 = arith.constant 0 : index
    %c0_54 = arith.constant 0 : index
    %c0_55 = arith.constant 0 : index
    %71 = vector.load %arg2[%c0_53, %c0_54, %c0_55] : memref<5x128x256xbf16, #tpu.memory_space<vmem>>, vector<1x128x256xbf16>
    %72 = vector.shape_cast %71 : vector<1x128x256xbf16> to vector<128x256xbf16>
    %cst_56 = arith.constant dense<0.000000e+00> : vector<112x256xf32>
    %73 = tpu.matmul %70, %72, %cst_56 {dimension_numbers = #tpu.dot_dimension_numbers<[1], [0], [0], [1], [0, 0, 1, 1], [], []>} : vector<112x128xbf16>, vector<128x256xbf16>, vector<112x256xf32> -> vector<112x256xf32>
    %74 = vector.extract_strided_slice %11 {offsets = [0, 0], sizes = [112, 128], strides = [1, 1]} : vector<128x128xbf16> to vector<112x128xbf16>
    %c1_57 = arith.constant 1 : index
    %c0_58 = arith.constant 0 : index
    %c0_59 = arith.constant 0 : index
    %75 = vector.load %arg2[%c1_57, %c0_58, %c0_59] : memref<5x128x256xbf16, #tpu.memory_space<vmem>>, vector<1x128x256xbf16>
    %76 = vector.shape_cast %75 : vector<1x128x256xbf16> to vector<128x256xbf16>
    %cst_60 = arith.constant dense<0.000000e+00> : vector<112x256xf32>
    %77 = tpu.matmul %74, %76, %cst_60 {dimension_numbers = #tpu.dot_dimension_numbers<[1], [0], [0], [1], [0, 0, 1, 1], [], []>} : vector<112x128xbf16>, vector<128x256xbf16>, vector<112x256xf32> -> vector<112x256xf32>
    %78 = arith.addf %73, %77 : vector<112x256xf32>
    %79 = vector.extract_strided_slice %2 {offsets = [16, 0], sizes = [112, 128], strides = [1, 1]} : vector<128x128xbf16> to vector<112x128xbf16>
    %c2_61 = arith.constant 2 : index
    %c0_62 = arith.constant 0 : index
    %c0_63 = arith.constant 0 : index
    %80 = vector.load %arg2[%c2_61, %c0_62, %c0_63] : memref<5x128x256xbf16, #tpu.memory_space<vmem>>, vector<1x128x256xbf16>
    %81 = vector.shape_cast %80 : vector<1x128x256xbf16> to vector<128x256xbf16>
    %cst_64 = arith.constant dense<0.000000e+00> : vector<112x256xf32>
    %82 = tpu.matmul %79, %81, %cst_64 {dimension_numbers = #tpu.dot_dimension_numbers<[1], [0], [0], [1], [0, 0, 1, 1], [], []>} : vector<112x128xbf16>, vector<128x256xbf16>, vector<112x256xf32> -> vector<112x256xf32>
    %83 = arith.addf %78, %82 : vector<112x256xf32>
    %84 = vector.extract_strided_slice %5 {offsets = [16, 0], sizes = [112, 128], strides = [1, 1]} : vector<128x128xbf16> to vector<112x128xbf16>
    %c3_65 = arith.constant 3 : index
    %c0_66 = arith.constant 0 : index
    %c0_67 = arith.constant 0 : index
    %85 = vector.load %arg2[%c3_65, %c0_66, %c0_67] : memref<5x128x256xbf16, #tpu.memory_space<vmem>>, vector<1x128x256xbf16>
    %86 = vector.shape_cast %85 : vector<1x128x256xbf16> to vector<128x256xbf16>
    %cst_68 = arith.constant dense<0.000000e+00> : vector<112x256xf32>
    %87 = tpu.matmul %84, %86, %cst_68 {dimension_numbers = #tpu.dot_dimension_numbers<[1], [0], [0], [1], [0, 0, 1, 1], [], []>} : vector<112x128xbf16>, vector<128x256xbf16>, vector<112x256xf32> -> vector<112x256xf32>
    %88 = arith.addf %83, %87 : vector<112x256xf32>
    %89 = vector.extract_strided_slice %8 {offsets = [16, 0], sizes = [112, 128], strides = [1, 1]} : vector<128x128xbf16> to vector<112x128xbf16>
    %c4_69 = arith.constant 4 : index
    %c0_70 = arith.constant 0 : index
    %c0_71 = arith.constant 0 : index
    %90 = vector.load %arg2[%c4_69, %c0_70, %c0_71] : memref<5x128x256xbf16, #tpu.memory_space<vmem>>, vector<1x128x256xbf16>
    %91 = vector.shape_cast %90 : vector<1x128x256xbf16> to vector<128x256xbf16>
    %cst_72 = arith.constant dense<0.000000e+00> : vector<112x256xf32>
    %92 = tpu.matmul %89, %91, %cst_72 {dimension_numbers = #tpu.dot_dimension_numbers<[1], [0], [0], [1], [0, 0, 1, 1], [], []>} : vector<112x128xbf16>, vector<128x256xbf16>, vector<112x256xf32> -> vector<112x256xf32>
    %93 = arith.addf %88, %92 : vector<112x256xf32>
    %94 = vector.extract_strided_slice %11 {offsets = [0, 0], sizes = [112, 128], strides = [1, 1]} : vector<128x128xbf16> to vector<112x128xbf16>
    %c0_73 = arith.constant 0 : index
    %c0_74 = arith.constant 0 : index
    %c0_75 = arith.constant 0 : index
    %95 = vector.load %arg2[%c0_73, %c0_74, %c0_75] : memref<5x128x256xbf16, #tpu.memory_space<vmem>>, vector<1x128x256xbf16>
    %96 = vector.shape_cast %95 : vector<1x128x256xbf16> to vector<128x256xbf16>
    %cst_76 = arith.constant dense<0.000000e+00> : vector<112x256xf32>
    %97 = tpu.matmul %94, %96, %cst_76 {dimension_numbers = #tpu.dot_dimension_numbers<[1], [0], [0], [1], [0, 0, 1, 1], [], []>} : vector<112x128xbf16>, vector<128x256xbf16>, vector<112x256xf32> -> vector<112x256xf32>
    %98 = vector.extract_strided_slice %2 {offsets = [16, 0], sizes = [112, 128], strides = [1, 1]} : vector<128x128xbf16> to vector<112x128xbf16>
    %c1_77 = arith.constant 1 : index
    %c0_78 = arith.constant 0 : index
    %c0_79 = arith.constant 0 : index
    %99 = vector.load %arg2[%c1_77, %c0_78, %c0_79] : memref<5x128x256xbf16, #tpu.memory_space<vmem>>, vector<1x128x256xbf16>
    %100 = vector.shape_cast %99 : vector<1x128x256xbf16> to vector<128x256xbf16>
    %cst_80 = arith.constant dense<0.000000e+00> : vector<112x256xf32>
    %101 = tpu.matmul %98, %100, %cst_80 {dimension_numbers = #tpu.dot_dimension_numbers<[1], [0], [0], [1], [0, 0, 1, 1], [], []>} : vector<112x128xbf16>, vector<128x256xbf16>, vector<112x256xf32> -> vector<112x256xf32>
    %102 = arith.addf %97, %101 : vector<112x256xf32>
    %103 = vector.extract_strided_slice %5 {offsets = [16, 0], sizes = [112, 128], strides = [1, 1]} : vector<128x128xbf16> to vector<112x128xbf16>
    %c2_81 = arith.constant 2 : index
    %c0_82 = arith.constant 0 : index
    %c0_83 = arith.constant 0 : index
    %104 = vector.load %arg2[%c2_81, %c0_82, %c0_83] : memref<5x128x256xbf16, #tpu.memory_space<vmem>>, vector<1x128x256xbf16>
    %105 = vector.shape_cast %104 : vector<1x128x256xbf16> to vector<128x256xbf16>
    %cst_84 = arith.constant dense<0.000000e+00> : vector<112x256xf32>
    %106 = tpu.matmul %103, %105, %cst_84 {dimension_numbers = #tpu.dot_dimension_numbers<[1], [0], [0], [1], [0, 0, 1, 1], [], []>} : vector<112x128xbf16>, vector<128x256xbf16>, vector<112x256xf32> -> vector<112x256xf32>
    %107 = arith.addf %102, %106 : vector<112x256xf32>
    %108 = vector.extract_strided_slice %8 {offsets = [16, 0], sizes = [112, 128], strides = [1, 1]} : vector<128x128xbf16> to vector<112x128xbf16>
    %c3_85 = arith.constant 3 : index
    %c0_86 = arith.constant 0 : index
    %c0_87 = arith.constant 0 : index
    %109 = vector.load %arg2[%c3_85, %c0_86, %c0_87] : memref<5x128x256xbf16, #tpu.memory_space<vmem>>, vector<1x128x256xbf16>
    %110 = vector.shape_cast %109 : vector<1x128x256xbf16> to vector<128x256xbf16>
    %cst_88 = arith.constant dense<0.000000e+00> : vector<112x256xf32>
    %111 = tpu.matmul %108, %110, %cst_88 {dimension_numbers = #tpu.dot_dimension_numbers<[1], [0], [0], [1], [0, 0, 1, 1], [], []>} : vector<112x128xbf16>, vector<128x256xbf16>, vector<112x256xf32> -> vector<112x256xf32>
    %112 = arith.addf %107, %111 : vector<112x256xf32>
    %113 = vector.extract_strided_slice %11 {offsets = [16, 0], sizes = [112, 128], strides = [1, 1]} : vector<128x128xbf16> to vector<112x128xbf16>
    %c4_89 = arith.constant 4 : index
    %c0_90 = arith.constant 0 : index
    %c0_91 = arith.constant 0 : index
    %114 = vector.load %arg2[%c4_89, %c0_90, %c0_91] : memref<5x128x256xbf16, #tpu.memory_space<vmem>>, vector<1x128x256xbf16>
    %115 = vector.shape_cast %114 : vector<1x128x256xbf16> to vector<128x256xbf16>
    %cst_92 = arith.constant dense<0.000000e+00> : vector<112x256xf32>
    %116 = tpu.matmul %113, %115, %cst_92 {dimension_numbers = #tpu.dot_dimension_numbers<[1], [0], [0], [1], [0, 0, 1, 1], [], []>} : vector<112x128xbf16>, vector<128x256xbf16>, vector<112x256xf32> -> vector<112x256xf32>
    %117 = arith.addf %112, %116 : vector<112x256xf32>
    %118 = arith.maximumf %93, %117 : vector<112x256xf32>
    %119 = vector.extract_strided_slice %118 {offsets = [0, 0], sizes = [112, 128], strides = [1, 1]} : vector<112x256xf32> to vector<112x128xf32>
    %120 = vector.extract_strided_slice %118 {offsets = [0, 128], sizes = [112, 128], strides = [1, 1]} : vector<112x256xf32> to vector<112x128xf32>
    %121 = arith.maximumf %119, %120 : vector<112x128xf32>
    %c0_93 = arith.constant 0 : index
    %c0_94 = arith.constant 0 : index
    %122 = vector.load %arg3[%c0_93, %c0_94] : memref<1x128xf32, #tpu.memory_space<vmem>>, vector<1x128xf32>
    %123 = vector.broadcast %122 : vector<1x128xf32> to vector<112x128xf32>
    %124 = arith.addf %121, %123 : vector<112x128xf32>
    %cst_95 = arith.constant 0.000000e+00 : f32
    %125 = vector.broadcast %cst_95 : f32 to vector<112x128xf32>
    %126 = arith.maximumf %124, %125 : vector<112x128xf32>
    %127 = arith.truncf %126 : vector<112x128xf32> to vector<112x128xbf16>
    %128 = vector.extract_strided_slice %69 {offsets = [0, 0], sizes = [80, 128], strides = [1, 1]} : vector<112x128xbf16> to vector<80x128xbf16>
    %c0_96 = arith.constant 0 : index
    %c0_97 = arith.constant 0 : index
    %c0_98 = arith.constant 0 : index
    %129 = vector.load %arg4[%c0_96, %c0_97, %c0_98] : memref<5x128x256xbf16, #tpu.memory_space<vmem>>, vector<1x128x256xbf16>
    %130 = vector.shape_cast %129 : vector<1x128x256xbf16> to vector<128x256xbf16>
    %cst_99 = arith.constant dense<0.000000e+00> : vector<80x256xf32>
    %131 = tpu.matmul %128, %130, %cst_99 {dimension_numbers = #tpu.dot_dimension_numbers<[1], [0], [0], [1], [0, 0, 1, 1], [], []>} : vector<80x128xbf16>, vector<128x256xbf16>, vector<80x256xf32> -> vector<80x256xf32>
    %132 = vector.extract_strided_slice %127 {offsets = [0, 0], sizes = [80, 128], strides = [1, 1]} : vector<112x128xbf16> to vector<80x128xbf16>
    %c1_100 = arith.constant 1 : index
    %c0_101 = arith.constant 0 : index
    %c0_102 = arith.constant 0 : index
    %133 = vector.load %arg4[%c1_100, %c0_101, %c0_102] : memref<5x128x256xbf16, #tpu.memory_space<vmem>>, vector<1x128x256xbf16>
    %134 = vector.shape_cast %133 : vector<1x128x256xbf16> to vector<128x256xbf16>
    %cst_103 = arith.constant dense<0.000000e+00> : vector<80x256xf32>
    %135 = tpu.matmul %132, %134, %cst_103 {dimension_numbers = #tpu.dot_dimension_numbers<[1], [0], [0], [1], [0, 0, 1, 1], [], []>} : vector<80x128xbf16>, vector<128x256xbf16>, vector<80x256xf32> -> vector<80x256xf32>
    %136 = arith.addf %131, %135 : vector<80x256xf32>
    %137 = vector.extract_strided_slice %69 {offsets = [16, 0], sizes = [80, 128], strides = [1, 1]} : vector<112x128xbf16> to vector<80x128xbf16>
    %c2_104 = arith.constant 2 : index
    %c0_105 = arith.constant 0 : index
    %c0_106 = arith.constant 0 : index
    %138 = vector.load %arg4[%c2_104, %c0_105, %c0_106] : memref<5x128x256xbf16, #tpu.memory_space<vmem>>, vector<1x128x256xbf16>
    %139 = vector.shape_cast %138 : vector<1x128x256xbf16> to vector<128x256xbf16>
    %cst_107 = arith.constant dense<0.000000e+00> : vector<80x256xf32>
    %140 = tpu.matmul %137, %139, %cst_107 {dimension_numbers = #tpu.dot_dimension_numbers<[1], [0], [0], [1], [0, 0, 1, 1], [], []>} : vector<80x128xbf16>, vector<128x256xbf16>, vector<80x256xf32> -> vector<80x256xf32>
    %141 = arith.addf %136, %140 : vector<80x256xf32>
    %142 = vector.extract_strided_slice %127 {offsets = [16, 0], sizes = [80, 128], strides = [1, 1]} : vector<112x128xbf16> to vector<80x128xbf16>
    %c3_108 = arith.constant 3 : index
    %c0_109 = arith.constant 0 : index
    %c0_110 = arith.constant 0 : index
    %143 = vector.load %arg4[%c3_108, %c0_109, %c0_110] : memref<5x128x256xbf16, #tpu.memory_space<vmem>>, vector<1x128x256xbf16>
    %144 = vector.shape_cast %143 : vector<1x128x256xbf16> to vector<128x256xbf16>
    %cst_111 = arith.constant dense<0.000000e+00> : vector<80x256xf32>
    %145 = tpu.matmul %142, %144, %cst_111 {dimension_numbers = #tpu.dot_dimension_numbers<[1], [0], [0], [1], [0, 0, 1, 1], [], []>} : vector<80x128xbf16>, vector<128x256xbf16>, vector<80x256xf32> -> vector<80x256xf32>
    %146 = arith.addf %141, %145 : vector<80x256xf32>
    %147 = vector.extract_strided_slice %69 {offsets = [32, 0], sizes = [80, 128], strides = [1, 1]} : vector<112x128xbf16> to vector<80x128xbf16>
    %c4_112 = arith.constant 4 : index
    %c0_113 = arith.constant 0 : index
    %c0_114 = arith.constant 0 : index
    %148 = vector.load %arg4[%c4_112, %c0_113, %c0_114] : memref<5x128x256xbf16, #tpu.memory_space<vmem>>, vector<1x128x256xbf16>
    %149 = vector.shape_cast %148 : vector<1x128x256xbf16> to vector<128x256xbf16>
    %cst_115 = arith.constant dense<0.000000e+00> : vector<80x256xf32>
    %150 = tpu.matmul %147, %149, %cst_115 {dimension_numbers = #tpu.dot_dimension_numbers<[1], [0], [0], [1], [0, 0, 1, 1], [], []>} : vector<80x128xbf16>, vector<128x256xbf16>, vector<80x256xf32> -> vector<80x256xf32>
    %151 = arith.addf %146, %150 : vector<80x256xf32>
    %152 = vector.extract_strided_slice %127 {offsets = [0, 0], sizes = [80, 128], strides = [1, 1]} : vector<112x128xbf16> to vector<80x128xbf16>
    %c0_116 = arith.constant 0 : index
    %c0_117 = arith.constant 0 : index
    %c0_118 = arith.constant 0 : index
    %153 = vector.load %arg4[%c0_116, %c0_117, %c0_118] : memref<5x128x256xbf16, #tpu.memory_space<vmem>>, vector<1x128x256xbf16>
    %154 = vector.shape_cast %153 : vector<1x128x256xbf16> to vector<128x256xbf16>
    %cst_119 = arith.constant dense<0.000000e+00> : vector<80x256xf32>
    %155 = tpu.matmul %152, %154, %cst_119 {dimension_numbers = #tpu.dot_dimension_numbers<[1], [0], [0], [1], [0, 0, 1, 1], [], []>} : vector<80x128xbf16>, vector<128x256xbf16>, vector<80x256xf32> -> vector<80x256xf32>
    %156 = vector.extract_strided_slice %69 {offsets = [16, 0], sizes = [80, 128], strides = [1, 1]} : vector<112x128xbf16> to vector<80x128xbf16>
    %c1_120 = arith.constant 1 : index
    %c0_121 = arith.constant 0 : index
    %c0_122 = arith.constant 0 : index
    %157 = vector.load %arg4[%c1_120, %c0_121, %c0_122] : memref<5x128x256xbf16, #tpu.memory_space<vmem>>, vector<1x128x256xbf16>
    %158 = vector.shape_cast %157 : vector<1x128x256xbf16> to vector<128x256xbf16>
    %cst_123 = arith.constant dense<0.000000e+00> : vector<80x256xf32>
    %159 = tpu.matmul %156, %158, %cst_123 {dimension_numbers = #tpu.dot_dimension_numbers<[1], [0], [0], [1], [0, 0, 1, 1], [], []>} : vector<80x128xbf16>, vector<128x256xbf16>, vector<80x256xf32> -> vector<80x256xf32>
    %160 = arith.addf %155, %159 : vector<80x256xf32>
    %161 = vector.extract_strided_slice %127 {offsets = [16, 0], sizes = [80, 128], strides = [1, 1]} : vector<112x128xbf16> to vector<80x128xbf16>
    %c2_124 = arith.constant 2 : index
    %c0_125 = arith.constant 0 : index
    %c0_126 = arith.constant 0 : index
    %162 = vector.load %arg4[%c2_124, %c0_125, %c0_126] : memref<5x128x256xbf16, #tpu.memory_space<vmem>>, vector<1x128x256xbf16>
    %163 = vector.shape_cast %162 : vector<1x128x256xbf16> to vector<128x256xbf16>
    %cst_127 = arith.constant dense<0.000000e+00> : vector<80x256xf32>
    %164 = tpu.matmul %161, %163, %cst_127 {dimension_numbers = #tpu.dot_dimension_numbers<[1], [0], [0], [1], [0, 0, 1, 1], [], []>} : vector<80x128xbf16>, vector<128x256xbf16>, vector<80x256xf32> -> vector<80x256xf32>
    %165 = arith.addf %160, %164 : vector<80x256xf32>
    %166 = vector.extract_strided_slice %69 {offsets = [32, 0], sizes = [80, 128], strides = [1, 1]} : vector<112x128xbf16> to vector<80x128xbf16>
    %c3_128 = arith.constant 3 : index
    %c0_129 = arith.constant 0 : index
    %c0_130 = arith.constant 0 : index
    %167 = vector.load %arg4[%c3_128, %c0_129, %c0_130] : memref<5x128x256xbf16, #tpu.memory_space<vmem>>, vector<1x128x256xbf16>
    %168 = vector.shape_cast %167 : vector<1x128x256xbf16> to vector<128x256xbf16>
    %cst_131 = arith.constant dense<0.000000e+00> : vector<80x256xf32>
    %169 = tpu.matmul %166, %168, %cst_131 {dimension_numbers = #tpu.dot_dimension_numbers<[1], [0], [0], [1], [0, 0, 1, 1], [], []>} : vector<80x128xbf16>, vector<128x256xbf16>, vector<80x256xf32> -> vector<80x256xf32>
    %170 = arith.addf %165, %169 : vector<80x256xf32>
    %171 = vector.extract_strided_slice %127 {offsets = [32, 0], sizes = [80, 128], strides = [1, 1]} : vector<112x128xbf16> to vector<80x128xbf16>
    %c4_132 = arith.constant 4 : index
    %c0_133 = arith.constant 0 : index
    %c0_134 = arith.constant 0 : index
    %172 = vector.load %arg4[%c4_132, %c0_133, %c0_134] : memref<5x128x256xbf16, #tpu.memory_space<vmem>>, vector<1x128x256xbf16>
    %173 = vector.shape_cast %172 : vector<1x128x256xbf16> to vector<128x256xbf16>
    %cst_135 = arith.constant dense<0.000000e+00> : vector<80x256xf32>
    %174 = tpu.matmul %171, %173, %cst_135 {dimension_numbers = #tpu.dot_dimension_numbers<[1], [0], [0], [1], [0, 0, 1, 1], [], []>} : vector<80x128xbf16>, vector<128x256xbf16>, vector<80x256xf32> -> vector<80x256xf32>
    %175 = arith.addf %170, %174 : vector<80x256xf32>
    %176 = arith.maximumf %151, %175 : vector<80x256xf32>
    %177 = vector.extract_strided_slice %176 {offsets = [0, 0], sizes = [80, 128], strides = [1, 1]} : vector<80x256xf32> to vector<80x128xf32>
    %178 = vector.extract_strided_slice %176 {offsets = [0, 128], sizes = [80, 128], strides = [1, 1]} : vector<80x256xf32> to vector<80x128xf32>
    %179 = arith.maximumf %177, %178 : vector<80x128xf32>
    %c0_136 = arith.constant 0 : index
    %c0_137 = arith.constant 0 : index
    %180 = vector.load %arg5[%c0_136, %c0_137] : memref<1x128xf32, #tpu.memory_space<vmem>>, vector<1x128xf32>
    %181 = vector.broadcast %180 : vector<1x128xf32> to vector<80x128xf32>
    %182 = arith.addf %179, %181 : vector<80x128xf32>
    %cst_138 = arith.constant 0.000000e+00 : f32
    %183 = vector.broadcast %cst_138 : f32 to vector<80x128xf32>
    %184 = arith.maximumf %182, %183 : vector<80x128xf32>
    %185 = arith.truncf %184 : vector<80x128xf32> to vector<80x128xbf16>
    %186 = vector.extract_strided_slice %185 {offsets = [0, 0], sizes = [16, 128], strides = [1, 1]} : vector<80x128xbf16> to vector<16x128xbf16>
    %c0_139 = arith.constant 0 : index
    %c0_140 = arith.constant 0 : index
    %c0_141 = arith.constant 0 : index
    %187 = vector.load %arg6[%c0_139, %c0_140, %c0_141] : memref<5x128x128xbf16, #tpu.memory_space<vmem>>, vector<1x128x128xbf16>
    %188 = vector.shape_cast %187 : vector<1x128x128xbf16> to vector<128x128xbf16>
    %cst_142 = arith.constant dense<0.000000e+00> : vector<16x128xf32>
    %189 = tpu.matmul %186, %188, %cst_142 {dimension_numbers = #tpu.dot_dimension_numbers<[1], [0], [0], [1], [0, 0, 1, 1], [], []>} : vector<16x128xbf16>, vector<128x128xbf16>, vector<16x128xf32> -> vector<16x128xf32>
    %190 = vector.extract_strided_slice %185 {offsets = [16, 0], sizes = [16, 128], strides = [1, 1]} : vector<80x128xbf16> to vector<16x128xbf16>
    %c1_143 = arith.constant 1 : index
    %c0_144 = arith.constant 0 : index
    %c0_145 = arith.constant 0 : index
    %191 = vector.load %arg6[%c1_143, %c0_144, %c0_145] : memref<5x128x128xbf16, #tpu.memory_space<vmem>>, vector<1x128x128xbf16>
    %192 = vector.shape_cast %191 : vector<1x128x128xbf16> to vector<128x128xbf16>
    %cst_146 = arith.constant dense<0.000000e+00> : vector<16x128xf32>
    %193 = tpu.matmul %190, %192, %cst_146 {dimension_numbers = #tpu.dot_dimension_numbers<[1], [0], [0], [1], [0, 0, 1, 1], [], []>} : vector<16x128xbf16>, vector<128x128xbf16>, vector<16x128xf32> -> vector<16x128xf32>
    %194 = arith.addf %189, %193 : vector<16x128xf32>
    %195 = vector.extract_strided_slice %185 {offsets = [32, 0], sizes = [16, 128], strides = [1, 1]} : vector<80x128xbf16> to vector<16x128xbf16>
    %c2_147 = arith.constant 2 : index
    %c0_148 = arith.constant 0 : index
    %c0_149 = arith.constant 0 : index
    %196 = vector.load %arg6[%c2_147, %c0_148, %c0_149] : memref<5x128x128xbf16, #tpu.memory_space<vmem>>, vector<1x128x128xbf16>
    %197 = vector.shape_cast %196 : vector<1x128x128xbf16> to vector<128x128xbf16>
    %cst_150 = arith.constant dense<0.000000e+00> : vector<16x128xf32>
    %198 = tpu.matmul %195, %197, %cst_150 {dimension_numbers = #tpu.dot_dimension_numbers<[1], [0], [0], [1], [0, 0, 1, 1], [], []>} : vector<16x128xbf16>, vector<128x128xbf16>, vector<16x128xf32> -> vector<16x128xf32>
    %199 = arith.addf %194, %198 : vector<16x128xf32>
    %200 = vector.extract_strided_slice %185 {offsets = [48, 0], sizes = [16, 128], strides = [1, 1]} : vector<80x128xbf16> to vector<16x128xbf16>
    %c3_151 = arith.constant 3 : index
    %c0_152 = arith.constant 0 : index
    %c0_153 = arith.constant 0 : index
    %201 = vector.load %arg6[%c3_151, %c0_152, %c0_153] : memref<5x128x128xbf16, #tpu.memory_space<vmem>>, vector<1x128x128xbf16>
    %202 = vector.shape_cast %201 : vector<1x128x128xbf16> to vector<128x128xbf16>
    %cst_154 = arith.constant dense<0.000000e+00> : vector<16x128xf32>
    %203 = tpu.matmul %200, %202, %cst_154 {dimension_numbers = #tpu.dot_dimension_numbers<[1], [0], [0], [1], [0, 0, 1, 1], [], []>} : vector<16x128xbf16>, vector<128x128xbf16>, vector<16x128xf32> -> vector<16x128xf32>
    %204 = arith.addf %199, %203 : vector<16x128xf32>
    %205 = vector.extract_strided_slice %185 {offsets = [64, 0], sizes = [16, 128], strides = [1, 1]} : vector<80x128xbf16> to vector<16x128xbf16>
    %c4_155 = arith.constant 4 : index
    %c0_156 = arith.constant 0 : index
    %c0_157 = arith.constant 0 : index
    %206 = vector.load %arg6[%c4_155, %c0_156, %c0_157] : memref<5x128x128xbf16, #tpu.memory_space<vmem>>, vector<1x128x128xbf16>
    %207 = vector.shape_cast %206 : vector<1x128x128xbf16> to vector<128x128xbf16>
    %cst_158 = arith.constant dense<0.000000e+00> : vector<16x128xf32>
    %208 = tpu.matmul %205, %207, %cst_158 {dimension_numbers = #tpu.dot_dimension_numbers<[1], [0], [0], [1], [0, 0, 1, 1], [], []>} : vector<16x128xbf16>, vector<128x128xbf16>, vector<16x128xf32> -> vector<16x128xf32>
    %209 = arith.addf %204, %208 : vector<16x128xf32>
    %c0_159 = arith.constant 0 : index
    %c0_160 = arith.constant 0 : index
    %210 = vector.load %arg7[%c0_159, %c0_160] : memref<1x128xf32, #tpu.memory_space<vmem>>, vector<1x128xf32>
    %211 = vector.broadcast %210 : vector<1x128xf32> to vector<16x128xf32>
    %212 = arith.addf %209, %211 : vector<16x128xf32>
    %cst_161 = arith.constant 0.000000e+00 : f32
    %213 = vector.broadcast %cst_161 : f32 to vector<16x128xf32>
    %214 = arith.maximumf %212, %213 : vector<16x128xf32>
    %215 = arith.truncf %214 : vector<16x128xf32> to vector<16x128xbf16>
    %c0_162 = arith.constant 0 : index
    %c0_163 = arith.constant 0 : index
    %216 = vector.load %arg8[%c0_162, %c0_163] : memref<128x128xbf16, #tpu.memory_space<vmem>>, vector<128x128xbf16>
    %cst_164 = arith.constant dense<0.000000e+00> : vector<16x128xf32>
    %217 = tpu.matmul %215, %216, %cst_164 {dimension_numbers = #tpu.dot_dimension_numbers<[1], [0], [0], [1], [0, 0, 1, 1], [], []>} : vector<16x128xbf16>, vector<128x128xbf16>, vector<16x128xf32> -> vector<16x128xf32>
    %c0_165 = arith.constant 0 : index
    %c0_166 = arith.constant 0 : index
    %218 = vector.load %arg9[%c0_165, %c0_166] : memref<1x128xf32, #tpu.memory_space<vmem>>, vector<1x128xf32>
    %219 = vector.broadcast %218 : vector<1x128xf32> to vector<16x128xf32>
    %220 = arith.addf %217, %219 : vector<16x128xf32>
    %cst_167 = arith.constant 0.000000e+00 : f32
    %221 = vector.broadcast %cst_167 : f32 to vector<16x128xf32>
    %222 = arith.maximumf %220, %221 : vector<16x128xf32>
    %223 = arith.truncf %222 : vector<16x128xf32> to vector<16x128xbf16>
    %c0_168 = arith.constant 0 : index
    %c0_169 = arith.constant 0 : index
    %224 = vector.load %arg10[%c0_168, %c0_169] : memref<128x128xbf16, #tpu.memory_space<vmem>>, vector<128x128xbf16>
    %cst_170 = arith.constant dense<0.000000e+00> : vector<16x128xf32>
    %225 = tpu.matmul %223, %224, %cst_170 {dimension_numbers = #tpu.dot_dimension_numbers<[1], [0], [0], [1], [0, 0, 1, 1], [], []>} : vector<16x128xbf16>, vector<128x128xbf16>, vector<16x128xf32> -> vector<16x128xf32>
    %c0_171 = arith.constant 0 : index
    %c0_172 = arith.constant 0 : index
    %226 = vector.load %arg11[%c0_171, %c0_172] : memref<1x128xf32, #tpu.memory_space<vmem>>, vector<1x128xf32>
    %227 = vector.broadcast %226 : vector<1x128xf32> to vector<16x128xf32>
    %228 = arith.addf %225, %227 : vector<16x128xf32>
    %c0_173 = arith.constant 0 : index
    %c0_174 = arith.constant 0 : index
    %229 = vector.load %arg12[%c0_173, %c0_174] : memref<16x128xf32, #tpu.memory_space<vmem>>, vector<16x128xf32>
    tpu.vector_store %arg12[%c0_173, %c0_174], %228 {strides = array<i32>} : memref<16x128xf32, #tpu.memory_space<vmem>>, vector<16x128xf32>,
    return
  }
  func.func @transform_0(%arg0: i32) -> (i32, i32, i32, i32) {
    %c0_i32 = arith.constant 0 : i32
    %c0_i32_0 = arith.constant 0 : i32
    %c0_i32_1 = arith.constant 0 : i32
    %c0_i32_2 = arith.constant 0 : i32
    return %c0_i32, %c0_i32_0, %arg0, %c0_i32_1 : i32, i32, i32, i32
  }
  func.func @transform_1(%arg0: i32) -> (i32, i32, i32) {
    %c0_i32 = arith.constant 0 : i32
    %c0_i32_0 = arith.constant 0 : i32
    %c0_i32_1 = arith.constant 0 : i32
    %c0_i32_2 = arith.constant 0 : i32
    return %c0_i32, %c0_i32_0, %c0_i32_1 : i32, i32, i32
  }
  func.func @transform_2(%arg0: i32) -> (i32, i32) {
    %c0_i32 = arith.constant 0 : i32
    %c0_i32_0 = arith.constant 0 : i32
    %c0_i32_1 = arith.constant 0 : i32
    return %c0_i32, %c0_i32_0 : i32, i32
  }
  func.func @transform_3(%arg0: i32) -> (i32, i32, i32) {
    %c0_i32 = arith.constant 0 : i32
    %c0_i32_0 = arith.constant 0 : i32
    %c0_i32_1 = arith.constant 0 : i32
    %c0_i32_2 = arith.constant 0 : i32
    return %c0_i32, %c0_i32_0, %c0_i32_1 : i32, i32, i32
  }
  func.func @transform_4(%arg0: i32) -> (i32, i32) {
    %c0_i32 = arith.constant 0 : i32
    %c0_i32_0 = arith.constant 0 : i32
    %c0_i32_1 = arith.constant 0 : i32
    return %c0_i32, %c0_i32_0 : i32, i32
  }
  func.func @transform_5(%arg0: i32) -> (i32, i32, i32) {
    %c0_i32 = arith.constant 0 : i32
    %c0_i32_0 = arith.constant 0 : i32
    %c0_i32_1 = arith.constant 0 : i32
    %c0_i32_2 = arith.constant 0 : i32
    return %c0_i32, %c0_i32_0, %c0_i32_1 : i32, i32, i32
  }
  func.func @transform_6(%arg0: i32) -> (i32, i32) {
    %c0_i32 = arith.constant 0 : i32
    %c0_i32_0 = arith.constant 0 : i32
    %c0_i32_1 = arith.constant 0 : i32
    return %c0_i32, %c0_i32_0 : i32, i32
  }
  func.func @transform_7(%arg0: i32) -> (i32, i32) {
    %c0_i32 = arith.constant 0 : i32
    %c0_i32_0 = arith.constant 0 : i32
    %c0_i32_1 = arith.constant 0 : i32
    return %c0_i32, %c0_i32_0 : i32, i32
  }
  func.func @transform_8(%arg0: i32) -> (i32, i32) {
    %c0_i32 = arith.constant 0 : i32
    %c0_i32_0 = arith.constant 0 : i32
    %c0_i32_1 = arith.constant 0 : i32
    return %c0_i32, %c0_i32_0 : i32, i32
  }
  func.func @transform_9(%arg0: i32) -> (i32, i32) {
    %c0_i32 = arith.constant 0 : i32
    %c0_i32_0 = arith.constant 0 : i32
    %c0_i32_1 = arith.constant 0 : i32
    return %c0_i32, %c0_i32_0 : i32, i32
  }
  func.func @transform_10(%arg0: i32) -> (i32, i32) {
    %c0_i32 = arith.constant 0 : i32
    %c0_i32_0 = arith.constant 0 : i32
    %c0_i32_1 = arith.constant 0 : i32
    return %c0_i32, %c0_i32_0 : i32, i32
  }
  func.func @transform_11(%arg0: i32) -> (i32, i32) {
    %c0_i32 = arith.constant 0 : i32
    %c0_i32_0 = arith.constant 0 : i32
    return %arg0, %c0_i32 : i32, i32
  }
}

</mosaic_0001>

<bundles_post_ra>
// kernel: simple_cnn_forward.1
= control target key start
LH: loop header
LB: loop body
LE: loop exit
PB: predicated region body
PF: predicated region fallthrough
CT: control target
= control target key end

     0   :  { %v9458_v1 = vmov 0   ;;  %vm7280_vm0 = vmmov 0   ;;  %s9444_s1 = inlined_call_operand.vmem [shape: bf16[5,128,256], index: 1, kind: input, shape index: {}]   ;;  %s9445_s0 = inlined_call_operand.vmem [shape: bf16[4,8,16,128], index: 0, kind: input, shape index: {}]   ;;  %s9446_s3 = inlined_call_operand.vmem [shape: bf16[5,128,256], index: 3, kind: input, shape index: {}]   ;;  %s9447_s2 = inlined_call_operand.vmem [shape: f32[1,128], index: 2, kind: input, shape index: {}]   ;;  %s9448_s5 = inlined_call_operand.vmem [shape: bf16[5,128,128], index: 5, kind: input, shape index: {}]   ;;  %s9449_s4 = inlined_call_operand.vmem [shape: f32[1,128], index: 4, kind: input, shape index: {}]   ;;  %s9450_s7 = inlined_call_operand.vmem [shape: bf16[128,128], index: 7, kind: input, shape index: {}]   ;;  %s9451_s9 = inlined_call_operand.vmem [shape: bf16[128,128], index: 9, kind: input, shape index: {}]   ;;  %s9452_s6 = inlined_call_operand.vmem [shape: f32[1,128], index: 6, kind: input, shape index: {}]   ;;  %s9453_s8 = inlined_call_operand.vmem [shape: f32[1,128], index: 8, kind: input, shape index: {}]   ;;  %s9454_s10 = inlined_call_operand.vmem [shape: f32[1,128], index: 10, kind: input, shape index: {}]   ;;  %s9455_s11 = inlined_call_operand.vmem [shape: f32[16,128], index: 11, kind: output, shape index: {}]  }
   0x1   :  { %v6922_v0 = vld [vmem:[%s9444_s1 + $0x84] ss:$8 sps:$4 sm:$0xff]   ;;  %293 = vmatprep.mubr.bf16.mxu0 %v9458_v1  ;;  %1395 = vmatprep.mubr.bf16.mxu1 %v9458_v1  ;;  %v6924_v2 = vld [vmem:[%s9444_s1 + $0x80] ss:$8 sps:$4 sm:$0xff]   ;;  %v6925_v3 = vld [vmem:[%s9444_s1 + $0x94] ss:$8 sps:$4 sm:$0xff]  }
   0x2   :  { %261 = vmatprep.subr.bf16.mxu0 %v6922_v0  ;;  %1363 = vmatprep.subr.bf16.mxu1 %v6922_v0  ;;  %v6927_v4 = vld [vmem:[%s9444_s1 + $0x90] ss:$8 sps:$4 sm:$0xff]   ;;  %v6928_v5 = vld [vmem:[%s9444_s1 + $0xa4] ss:$8 sps:$4 sm:$0xff]   ;;  %v6930_v6 = vld [vmem:[%s9444_s1 + $0xa0] ss:$8 sps:$4 sm:$0xff]  }
   0x3   :  { %262 = vmatpush1.bf16.msra.mxu0 %v6924_v2  ;;  %1364 = vmatpush1.bf16.msra.mxu1 %v6924_v2  ;;  %v6931_v7 = vld [vmem:[%s9444_s1 + $0xb4] ss:$8 sps:$4 sm:$0xff]   ;;  %v7367_v8 = vld [vmem:[%s9444_s1 + $0xb0] ss:$8 sps:$4 sm:$0xff]   ;;  %v7372_v9 = vld [vmem:[%s9444_s1 + $0xc4] ss:$8 sps:$4 sm:$0xff]  }
   0x4   :  { %263 = vmatprep.subr.bf16.mxu0 %v6925_v3  ;;  %1365 = vmatprep.subr.bf16.mxu1 %v6925_v3  ;;  %v7379_v10 = vld [vmem:[%s9444_s1 + $0xc0] ss:$8 sps:$4 sm:$0xff]   ;;  %v7386_v11 = vld [vmem:[%s9444_s1 + $0xd4] ss:$8 sps:$4 sm:$0xff]   ;;  %v7393_v12 = vld [vmem:[%s9444_s1 + $0xd0] ss:$8 sps:$4 sm:$0xff]  }
   0x5   :  { %v7400_v13 = vld [vmem:[%s9444_s1 + $0xe4] ss:$8 sps:$4 sm:$0xff]   ;;  %v7407_v14 = vld [vmem:[%s9444_s1 + $0xe0] ss:$8 sps:$4 sm:$0xff]   ;;  %v7414_v15 = vld [vmem:[%s9444_s1 + $0xf4] ss:$8 sps:$4 sm:$0xff]  }
   0x6   :  { %v7421_v16 = vld [vmem:[%s9444_s1 + $0xf0] ss:$8 sps:$4 sm:$0xff]   ;;  %v7428_v17 = vld [vmem:[%s9444_s1 + $0x4] ss:$8 sps:$4 sm:$0xff]   ;;  %v7445_v20 = vld [vmem:[%s9444_s1] ss:$8 sps:$4 sm:$0xff]  }
   0x7   :  { %264 = vmatpush1.bf16.msra.mxu0 %v6927_v4  ;;  %1366 = vmatpush1.bf16.msra.mxu1 %v6927_v4  ;;  %v7433_v18 = vld [vmem:[%s9445_s0 + $0x40] sm:$0xff]   ;;  %v7452_v21 = vld [vmem:[%s9444_s1 + $0x14] ss:$8 sps:$4 sm:$0xff]   ;;  %v7461_v22 = vld [vmem:[%s9444_s1 + $0x10] ss:$8 sps:$4 sm:$0xff]  }
   0x8   :  { %265 = vmatprep.subr.bf16.mxu0 %v6928_v5  ;;  %1367 = vmatprep.subr.bf16.mxu1 %v6928_v5  ;;  %v7438_v19 = vld [vmem:[%s9445_s0 + $0x80] sm:$0xff]   ;;  %v7475_v24 = vld [vmem:[%s9445_s0 + $0x48] sm:$0xff]   ;;  %v7494_v27 = vld [vmem:[%s9444_s1 + $0x34] ss:$8 sps:$4 sm:$0xff]  }
   0x9   :  { %v7468_v23 = vld [vmem:[%s9444_s1 + $0x24] ss:$8 sps:$4 sm:$0xff]   ;;  %v7487_v26 = vld [vmem:[%s9444_s1 + $0x20] ss:$8 sps:$4 sm:$0xff]   ;;  %v7503_v28 = vld [vmem:[%s9444_s1 + $0x30] ss:$8 sps:$4 sm:$0xff]  }
   0xa   :  { %v7480_v25 = vld [vmem:[%s9445_s0 + $0x88] sm:$0xff]   ;;  %v7515_v30 = vld [vmem:[%s9445_s0 + $0x50] sm:$0xff]   ;;  %v7545_v34 = vld [vmem:[%s9445_s0 + $0x58] sm:$0xff]  }
   0xb   :  { %266 = vmatpush1.bf16.msra.mxu0 %v6930_v6  ;;  %1368 = vmatpush1.bf16.msra.mxu1 %v6930_v6  ;;  %v7510_v29 = vld [vmem:[%s9444_s1 + $0x44] ss:$8 sps:$4 sm:$0xff]   ;;  %v7522_v31 = vld [vmem:[%s9445_s0 + $0x90] sm:$0xff]   ;;  %v7530_v32 = vld [vmem:[%s9444_s1 + $0x40] ss:$8 sps:$4 sm:$0xff]  }
   0xc   :  { %267 = vmatprep.subr.bf16.mxu0 %v6931_v7  ;;  %1369 = vmatprep.subr.bf16.mxu1 %v6931_v7  ;;  %v7536_v33 = vld [vmem:[%s9444_s1 + $0x54] ss:$8 sps:$4 sm:$0xff]   ;;  %v7552_v35 = vld [vmem:[%s9444_s1 + $0x50] ss:$8 sps:$4 sm:$0xff]   ;;  %v7559_v36 = vld [vmem:[%s9444_s1 + $0x64] ss:$8 sps:$4 sm:$0xff]  }
   0xd   :  { %v7564_v37 = vld [vmem:[%s9445_s0 + $0x98] sm:$0xff]   ;;  %v7571_v38 = vld [vmem:[%s9444_s1 + $0x60] ss:$8 sps:$4 sm:$0xff]   ;;  %v7601_v42 = vld [vmem:[%s9444_s1 + $0x104] ss:$8 sps:$4 sm:$0xff]  }
   0xe   :  { %9528 = vst [vmem:[#allocation2_spill] sm:$0xff] %v7564_v37  ;;  %v7578_v39 = vld [vmem:[%s9444_s1 + $0x74] ss:$8 sps:$4 sm:$0xff]   ;;  %v7587_v40 = vld [vmem:[%s9445_s0 + $0x60] sm:$0xff]   ;;  %v7594_v41 = vld [vmem:[%s9444_s1 + $0x70] ss:$8 sps:$4 sm:$0xff]  }
   0xf   :  { %268 = vmatpush1.bf16.msra.mxu0 %v7367_v8  ;;  %1370 = vmatpush1.bf16.msra.mxu1 %v7367_v8  ;;  %v7606_v43 = vld [vmem:[%s9445_s0 + $0xa0] sm:$0xff]   ;;  %v7619_v44 = vld [vmem:[%s9445_s0 + $0x68] sm:$0xff]   ;;  %v7633_v46 = vld [vmem:[%s9445_s0 + $0x70] sm:$0xff]  }
  0x10   :  { %269 = vmatprep.subr.bf16.mxu0 %v7372_v9  ;;  %1371 = vmatprep.subr.bf16.mxu1 %v7372_v9  ;;  %9529 = vst [vmem:[#allocation3_spill] sm:$0xff] %v7606_v43  ;;  %v7624_v45 = vld [vmem:[%s9445_s0 + $0xa8] sm:$0xff]   ;;  %v7638_v47 = vld [vmem:[%s9445_s0 + $0xb0] sm:$0xff]   ;;  %v6984_v48 = vld [vmem:[%s9445_s0] sm:$0xff]  }
  0x11   :  { %9530 = vst [vmem:[#allocation4_spill] sm:$0xff] %v7624_v45  ;;  %9531 = vst [vmem:[#allocation5_spill] sm:$0xff] %v7638_v47  ;;  %v7650_v49 = vld [vmem:[%s9444_s1 + $0x100] ss:$8 sps:$4 sm:$0xff]   ;;  %v7655_v50 = vld [vmem:[%s9444_s1 + $0x114] ss:$8 sps:$4 sm:$0xff]  }
  0x12   :  { %v7663_v51 = vld [vmem:[%s9444_s1 + $0x110] ss:$8 sps:$4 sm:$0xff]   ;;  %v7670_v52 = vld [vmem:[%s9444_s1 + $0x124] ss:$8 sps:$4 sm:$0xff]   ;;  %v7684_v54 = vld [vmem:[%s9444_s1 + $0x120] ss:$8 sps:$4 sm:$0xff]  }
  0x13   :  { %270 = vmatpush1.bf16.msra.mxu0 %v7379_v10  ;;  %1372 = vmatpush1.bf16.msra.mxu1 %v7379_v10  ;;  %v7677_v53 = vld [vmem:[%s9445_s0 + $0x8] sm:$0xff]   ;;  %v7691_v55 = vld [vmem:[%s9444_s1 + $0x134] ss:$8 sps:$4 sm:$0xff]   ;;  %v7700_v56 = vld [vmem:[%s9444_s1 + $0x130] ss:$8 sps:$4 sm:$0xff]  }
  0x14   :  { %271 = vmatprep.subr.bf16.mxu0 %v7386_v11  ;;  %1373 = vmatprep.subr.bf16.mxu1 %v7386_v11  ;;  %v7707_v57 = vld [vmem:[%s9444_s1 + $0x144] ss:$8 sps:$4 sm:$0xff]   ;;  %v7714_v58 = vld [vmem:[%s9445_s0 + $0x10] sm:$0xff]   ;;  %v7722_v59 = vld [vmem:[%s9444_s1 + $0x140] ss:$8 sps:$4 sm:$0xff]  }
  0x15   :  { %v7728_v60 = vld [vmem:[%s9444_s1 + $0x154] ss:$8 sps:$4 sm:$0xff]   ;;  %v7739_v61 = vld [vmem:[%s9444_s1 + $0x150] ss:$8 sps:$4 sm:$0xff]   ;;  %v7746_v62 = vld [vmem:[%s9444_s1 + $0x164] ss:$8 sps:$4 sm:$0xff]  }
  0x16   :  { %v7751_v63 = vld [vmem:[%s9445_s0 + $0x18] sm:$0xff]   ;;  %v7758_v0 = vld [vmem:[%s9444_s1 + $0x160] ss:$8 sps:$4 sm:$0xff]   ;;  %v7783_v4 = vld [vmem:[%s9444_s1 + $0x184] ss:$8 sps:$4 sm:$0xff]  }
  0x17   :  { %272 = vmatpush1.bf16.msra.mxu0 %v7393_v12  ;;  %1374 = vmatpush1.bf16.msra.mxu1 %v7393_v12  ;;  %9532 = vst [vmem:[#allocation6_spill] sm:$0xff] %v7758_v0  ;;  %v7765_v2 = vld [vmem:[%s9444_s1 + $0x174] ss:$8 sps:$4 sm:$0xff]   ;;  %v7776_v3 = vld [vmem:[%s9444_s1 + $0x170] ss:$8 sps:$4 sm:$0xff]   ;;  %9535 = vst [vmem:[#allocation9_spill] sm:$0xff] %v7783_v4 }
  0x18   :  { %273 = vmatprep.subr.bf16.mxu0 %v7400_v13  ;;  %1375 = vmatprep.subr.bf16.mxu1 %v7400_v13  ;;  %9533 = vst [vmem:[#allocation7_spill] sm:$0xff] %v7765_v2  ;;  %9534 = vst [vmem:[#allocation8_spill] sm:$0xff] %v7776_v3  ;;  %v7788_v5 = vld [vmem:[%s9445_s0 + $0x20] sm:$0xff]   ;;  %v7801_v6 = vld [vmem:[%s9445_s0 + $0x28] sm:$0xff]  }
  0x19   :  { %v7810_v7 = vld [vmem:[%s9445_s0 + $0x30] sm:$0xff]  }
  0x1b   :  { %274 = vmatpush1.bf16.msra.mxu0 %v7407_v14  ;;  %1376 = vmatpush1.bf16.msra.mxu1 %v7407_v14 }
  0x1c   :  { %275 = vmatprep.subr.bf16.mxu0 %v7414_v15  ;;  %1377 = vmatprep.subr.bf16.mxu1 %v7414_v15 }
  0x1f   :  { %276 = vmatpush1.bf16.msra.mxu0 %v7421_v16  ;;  %1378 = vmatpush1.bf16.msra.mxu1 %v7421_v16 }
  0x20   :  { %486 = vmatprep.subr.bf16.mxu0 %v7428_v17  ;;  %1466 = vmatprep.subr.bf16.mxu1 %v7428_v17 }
  0x22   :  { %294 = vmatmul.mubr.bf16.vlgmr.msra.gmra.mrb[0].mxu0 %v7433_v18  ;;  %1396 = vmatmul.mubr.bf16.vlgmr.msra.gmra.mrb[0].mxu1 %v7438_v19 }
  0x23   :  { %487 = vmatpush1.bf16.msra.mxu0 %v7445_v20  ;;  %1467 = vmatpush1.bf16.msra.mxu1 %v7445_v20 }
  0x24   :  { %303 = vmatprep.mubr.bf16.mxu0 %v9458_v1  ;;  %488 = vmatprep.subr.bf16.mxu0 %v7452_v21 }
  0x25   :  { %1405 = vmatprep.mubr.bf16.mxu1 %v9458_v1  ;;  %1468 = vmatprep.subr.bf16.mxu1 %v7452_v21 }
  0x27   :  { %489 = vmatpush1.bf16.msra.mxu0 %v7461_v22  ;;  %1469 = vmatpush1.bf16.msra.mxu1 %v7461_v22 }
  0x28   :  { %490 = vmatprep.subr.bf16.mxu0 %v7468_v23  ;;  %1470 = vmatprep.subr.bf16.mxu1 %v7468_v23 }
  0x2a   :  { %304 = vmatmul.mubr.bf16.gmra.mrb[4].mxu0 %v7475_v24  ;;  %1406 = vmatmul.mubr.bf16.gmra.mrb[4].mxu1 %v7480_v25 }
  0x2b   :  { %313 = vmatprep.mubr.bf16.mxu0 %v9458_v1  ;;  %491 = vmatpush1.bf16.msra.mxu0 %v7487_v26 }
  0x2c   :  { %1415 = vmatprep.mubr.bf16.mxu1 %v9458_v1  ;;  %1471 = vmatpush1.bf16.msra.mxu1 %v7487_v26 }
  0x2d   :  { %492 = vmatprep.subr.bf16.mxu0 %v7494_v27  ;;  %1472 = vmatprep.subr.bf16.mxu1 %v7494_v27 }
  0x2f   :  { %493 = vmatpush1.bf16.msra.mxu0 %v7503_v28 }
  0x30   :  { %1473 = vmatpush1.bf16.msra.mxu1 %v7503_v28  ;;  %494 = vmatprep.subr.bf16.mxu0 %v7510_v29 }
  0x31   :  { %1474 = vmatprep.subr.bf16.mxu1 %v7510_v29 }
  0x32   :  { %314 = vmatmul.mubr.bf16.gmra.mrb[8].mxu0 %v7515_v30  ;;  %1416 = vmatmul.mubr.bf16.gmra.mrb[8].mxu1 %v7522_v31 }
  0x33   :  { %323 = vmatprep.mubr.bf16.mxu0 %v9458_v1  ;;  %1425 = vmatprep.mubr.bf16.mxu1 %v9458_v1 }
  0x34   :  { %495 = vmatpush1.bf16.msra.mxu0 %v7530_v32  ;;  %1475 = vmatpush1.bf16.msra.mxu1 %v7530_v32 }
  0x35   :  { %496 = vmatprep.subr.bf16.mxu0 %v7536_v33  ;;  %1476 = vmatprep.subr.bf16.mxu1 %v7536_v33 }
  0x38   :  { %497 = vmatpush1.bf16.msra.mxu0 %v7552_v35  ;;  %1477 = vmatpush1.bf16.msra.mxu1 %v7552_v35 }
  0x39   :  { %498 = vmatprep.subr.bf16.mxu0 %v7559_v36  ;;  %1478 = vmatprep.subr.bf16.mxu1 %v7559_v36 }
  0x3a   :  { %324 = vmatmul.mubr.bf16.gmra.mrb[12].mxu0 %v7545_v34  ;;  %1426 = vmatmul.mubr.bf16.gmra.mrb[12].mxu1 %v7564_v37 }
  0x3b   :  { %333 = vmatprep.mubr.bf16.mxu0 %v9458_v1  ;;  %1435 = vmatprep.mubr.bf16.mxu1 %v9458_v1 }
  0x3c   :  { %499 = vmatpush1.bf16.msra.mxu0 %v7571_v38  ;;  %1479 = vmatpush1.bf16.msra.mxu1 %v7571_v38 }
  0x3d   :  { %500 = vmatprep.subr.bf16.mxu0 %v7578_v39  ;;  %1480 = vmatprep.subr.bf16.mxu1 %v7578_v39 }
  0x40   :  { %501 = vmatpush1.bf16.msra.mxu0 %v7594_v41  ;;  %1481 = vmatpush1.bf16.msra.mxu1 %v7594_v41 }
  0x41   :  { %728 = vmatprep.subr.bf16.mxu0 %v7601_v42  ;;  %1569 = vmatprep.subr.bf16.mxu1 %v7601_v42 }
  0x42   :  { %334 = vmatmul.mubr.bf16.gmra.mrb[16].mxu0 %v7587_v40  ;;  %1436 = vmatmul.mubr.bf16.gmra.mrb[16].mxu1 %v7606_v43 }
  0x43   :  { %343 = vmatprep.mubr.bf16.mxu0 %v9458_v1  ;;  %1445 = vmatprep.mubr.bf16.mxu1 %v9458_v1 }
  0x4a   :  { %344 = vmatmul.mubr.bf16.gmra.mrb[20].mxu0 %v7619_v44  ;;  %1446 = vmatmul.mubr.bf16.gmra.mrb[20].mxu1 %v7624_v45 }
  0x4b   :  { %353 = vmatprep.mubr.bf16.mxu0 %v9458_v1  ;;  %1455 = vmatprep.mubr.bf16.mxu1 %v9458_v1 }
  0x52   :  { %354 = vmatmul.mubr.bf16.gmra.mrb[24].mxu0 %v7633_v46  ;;  %1456 = vmatmul.mubr.bf16.gmra.mrb[24].mxu1 %v7638_v47 }
  0x53   :  { %518 = vmatprep.mubr.bf16.mxu0 %v9458_v1  ;;  %1498 = vmatprep.mubr.bf16.mxu1 %v9458_v1 }
  0x5a   :  { %519 = vmatmul.mubr.bf16.vlgmr.msra.gmra.mrb[0].mxu0 %v6984_v48  ;;  %1499 = vmatmul.mubr.bf16.vlgmr.msra.gmra.mrb[0].mxu1 %v7433_v18  ;;  %v7819_v18 = vld [vmem:[%s9445_s0 + $0xc0] sm:$0xff]  }
  0x5b   :  { %729 = vmatpush1.bf16.msra.mxu0 %v7650_v49  ;;  %1570 = vmatpush1.bf16.msra.mxu1 %v7650_v49  ;;  %v7824_v48 = vld [vmem:[%s9444_s1 + $0x180] ss:$8 sps:$4 sm:$0xff]  }
  0x5c   :  { %528 = vmatprep.mubr.bf16.mxu0 %v9458_v1  ;;  %730 = vmatprep.subr.bf16.mxu0 %v7655_v50  ;;  %9536 = vst [vmem:[#allocation10_spill] sm:$0xff] %v7824_v48 }
  0x5d   :  { %1508 = vmatprep.mubr.bf16.mxu1 %v9458_v1  ;;  %1571 = vmatprep.subr.bf16.mxu1 %v7655_v50 }
  0x5f   :  { %731 = vmatpush1.bf16.msra.mxu0 %v7663_v51  ;;  %1572 = vmatpush1.bf16.msra.mxu1 %v7663_v51 }
  0x60   :  { %732 = vmatprep.subr.bf16.mxu0 %v7670_v52  ;;  %1573 = vmatprep.subr.bf16.mxu1 %v7670_v52 }
  0x62   :  { %529 = vmatmul.mubr.bf16.gmra.mrb[4].mxu0 %v7677_v53  ;;  %1509 = vmatmul.mubr.bf16.gmra.mrb[4].mxu1 %v7475_v24 }
  0x63   :  { %538 = vmatprep.mubr.bf16.mxu0 %v9458_v1  ;;  %733 = vmatpush1.bf16.msra.mxu0 %v7684_v54 }
  0x64   :  { %1518 = vmatprep.mubr.bf16.mxu1 %v9458_v1  ;;  %1574 = vmatpush1.bf16.msra.mxu1 %v7684_v54 }
  0x65   :  { %734 = vmatprep.subr.bf16.mxu0 %v7691_v55  ;;  %1575 = vmatprep.subr.bf16.mxu1 %v7691_v55 }
  0x67   :  { %735 = vmatpush1.bf16.msra.mxu0 %v7700_v56 }
  0x68   :  { %1576 = vmatpush1.bf16.msra.mxu1 %v7700_v56  ;;  %736 = vmatprep.subr.bf16.mxu0 %v7707_v57 }
  0x69   :  { %1577 = vmatprep.subr.bf16.mxu1 %v7707_v57 }
  0x6a   :  { %539 = vmatmul.mubr.bf16.gmra.mrb[8].mxu0 %v7714_v58  ;;  %1519 = vmatmul.mubr.bf16.gmra.mrb[8].mxu1 %v7515_v30 }
  0x6b   :  { %548 = vmatprep.mubr.bf16.mxu0 %v9458_v1  ;;  %1528 = vmatprep.mubr.bf16.mxu1 %v9458_v1 }
  0x6c   :  { %737 = vmatpush1.bf16.msra.mxu0 %v7722_v59  ;;  %1578 = vmatpush1.bf16.msra.mxu1 %v7722_v59 }
  0x6d   :  { %738 = vmatprep.subr.bf16.mxu0 %v7728_v60  ;;  %1579 = vmatprep.subr.bf16.mxu1 %v7728_v60 }
  0x70   :  { %739 = vmatpush1.bf16.msra.mxu0 %v7739_v61  ;;  %1580 = vmatpush1.bf16.msra.mxu1 %v7739_v61 }
  0x71   :  { %740 = vmatprep.subr.bf16.mxu0 %v7746_v62  ;;  %1581 = vmatprep.subr.bf16.mxu1 %v7746_v62 }
  0x72   :  { %549 = vmatmul.mubr.bf16.gmra.mrb[12].mxu0 %v7751_v63  ;;  %1529 = vmatmul.mubr.bf16.gmra.mrb[12].mxu1 %v7545_v34 }
  0x73   :  { %558 = vmatprep.mubr.bf16.mxu0 %v9458_v1  ;;  %1538 = vmatprep.mubr.bf16.mxu1 %v9458_v1 }
  0x74   :  { %741 = vmatpush1.bf16.msra.mxu0 %v7758_v0  ;;  %1582 = vmatpush1.bf16.msra.mxu1 %v7758_v0  ;;  %v7926_v0 = vld [vmem:[%s9445_s0 + $0xd8] sm:$0xff]  }
  0x75   :  { %742 = vmatprep.subr.bf16.mxu0 %v7765_v2  ;;  %1583 = vmatprep.subr.bf16.mxu1 %v7765_v2  ;;  %v7845_v2 = vld [vmem:[%s9444_s1 + $0x1a4] ss:$8 sps:$4 sm:$0xff]  }
  0x76   :  { %9540 = vst [vmem:[#allocation13_spill] sm:$0xff] %v7845_v2 }
  0x78   :  { %743 = vmatpush1.bf16.msra.mxu0 %v7776_v3  ;;  %1584 = vmatpush1.bf16.msra.mxu1 %v7776_v3  ;;  %v9539_v3 = vmov 0  }
  0x79   :  { %998 = vmatprep.subr.bf16.mxu0 %v7783_v4  ;;  %1700 = vmatprep.subr.bf16.mxu1 %v7783_v4  ;;  %v7829_v4 = vld [vmem:[%s9444_s1 + $0x194] ss:$8 sps:$4 sm:$0xff]  }
  0x7a   :  { %559 = vmatmul.mubr.bf16.gmra.mrb[16].mxu0 %v7788_v5  ;;  %1539 = vmatmul.mubr.bf16.gmra.mrb[16].mxu1 %v7587_v40  ;;  %9537 = vst [vmem:[#allocation11_spill] sm:$0xff] %v7829_v4 }
  0x7b   :  { %568 = vmatprep.mubr.bf16.mxu0 %v9458_v1  ;;  %1548 = vmatprep.mubr.bf16.mxu1 %v9458_v1 }
  0x82   :  { %569 = vmatmul.mubr.bf16.gmra.mrb[20].mxu0 %v7801_v6  ;;  %1549 = vmatmul.mubr.bf16.gmra.mrb[20].mxu1 %v7619_v44 }
  0x83   :  { %578 = vmatprep.mubr.bf16.mxu0 %v9458_v1  ;;  %1558 = vmatprep.mubr.bf16.mxu1 %v9458_v1 }
  0x8a   :  { %579 = vmatmul.mubr.bf16.gmra.mrb[24].mxu0 %v7810_v7  ;;  %1559 = vmatmul.mubr.bf16.gmra.mrb[24].mxu1 %v7633_v46 }
  0x8b   :  { %760 = vmatprep.mubr.bf16.mxu0 %v9458_v1  ;;  %1601 = vmatprep.mubr.bf16.mxu1 %v9458_v1  ;;  %v7838_v1 = vld [vmem:[%s9444_s1 + $0x190] ss:$8 sps:$4 sm:$0xff]  }
  0x8c   :  { %9538 = vst [vmem:[#allocation12_spill] sm:$0xff] %v7838_v1 }
  0x92   :  { %761 = vmatmul.mubr.bf16.vlgmr.msra.gmra.mrb[0].mxu0 %v7438_v19  ;;  %1602 = vmatmul.mubr.bf16.vlgmr.msra.gmra.mrb[0].mxu1 %v7819_v18  ;;  %v7852_v19 = vld [vmem:[%s9445_s0 + $0xc8] sm:$0xff]  }
  0x93   :  { %999 = vmatpush1.bf16.msra.mxu0 %v7824_v48  ;;  %1701 = vmatpush1.bf16.msra.mxu1 %v7824_v48  ;;  %v7859_v48 = vld [vmem:[%s9444_s1 + $0x1a0] ss:$8 sps:$4 sm:$0xff]  }
  0x94   :  { %770 = vmatprep.mubr.bf16.mxu0 %v9539_v3  ;;  %1000 = vmatprep.subr.bf16.mxu0 %v7829_v4  ;;  %9541 = vst [vmem:[#allocation14_spill] sm:$0xff] %v7859_v48 }
  0x95   :  { %1611 = vmatprep.mubr.bf16.mxu1 %v9539_v3  ;;  %1702 = vmatprep.subr.bf16.mxu1 %v7829_v4  ;;  %v7866_v4 = vld [vmem:[%s9444_s1 + $0x1b4] ss:$8 sps:$4 sm:$0xff]  }
  0x96   :  { %9542 = vst [vmem:[#allocation15_spill] sm:$0xff] %v7866_v4 }
  0x97   :  { %1001 = vmatpush1.bf16.msra.mxu0 %v7838_v1  ;;  %1703 = vmatpush1.bf16.msra.mxu1 %v7838_v1  ;;  %v7875_v1 = vld [vmem:[%s9444_s1 + $0x1b0] ss:$8 sps:$4 sm:$0xff]  }
  0x98   :  { %1002 = vmatprep.subr.bf16.mxu0 %v7845_v2  ;;  %1704 = vmatprep.subr.bf16.mxu1 %v7845_v2  ;;  %9543 = vst [vmem:[#allocation16_spill] sm:$0xff] %v7875_v1  ;;  %v7882_v2 = vld [vmem:[%s9444_s1 + $0x1c4] ss:$8 sps:$4 sm:$0xff]  }
  0x99   :  { %9544 = vst [vmem:[#allocation17_spill] sm:$0xff] %v7882_v2 }
  0x9a   :  { %771 = vmatmul.mubr.bf16.gmra.mrb[4].mxu0 %v7480_v25  ;;  %1612 = vmatmul.mubr.bf16.gmra.mrb[4].mxu1 %v7852_v19  ;;  %v7889_v25 = vld [vmem:[%s9445_s0 + $0xd0] sm:$0xff]  }
  0x9b   :  { %780 = vmatprep.mubr.bf16.mxu0 %v9539_v3  ;;  %1003 = vmatpush1.bf16.msra.mxu0 %v7859_v48 }
  0x9c   :  { %1621 = vmatprep.mubr.bf16.mxu1 %v9539_v3  ;;  %1705 = vmatpush1.bf16.msra.mxu1 %v7859_v48  ;;  %v7897_v48 = vld [vmem:[%s9444_s1 + $0x1c0] ss:$8 sps:$4 sm:$0xff]  }
  0x9d   :  { %1004 = vmatprep.subr.bf16.mxu0 %v7866_v4  ;;  %1706 = vmatprep.subr.bf16.mxu1 %v7866_v4  ;;  %9545 = vst [vmem:[#allocation18_spill] sm:$0xff] %v7897_v48  ;;  %v7903_v4 = vld [vmem:[%s9444_s1 + $0x1d4] ss:$8 sps:$4 sm:$0xff]  }
  0x9e   :  { %9546 = vst [vmem:[#allocation19_spill] sm:$0xff] %v7903_v4 }
  0x9f   :  { %1005 = vmatpush1.bf16.msra.mxu0 %v7875_v1 }
  0xa0   :  { %1707 = vmatpush1.bf16.msra.mxu1 %v7875_v1  ;;  %1006 = vmatprep.subr.bf16.mxu0 %v7882_v2  ;;  %v7921_v1 = vld [vmem:[%s9444_s1 + $0x1e4] ss:$8 sps:$4 sm:$0xff]  }
  0xa1   :  { %1708 = vmatprep.subr.bf16.mxu1 %v7882_v2  ;;  %v7914_v2 = vld [vmem:[%s9444_s1 + $0x1d0] ss:$8 sps:$4 sm:$0xff]   ;;  %9548 = vst [vmem:[#allocation21_spill] sm:$0xff] %v7921_v1 }
  0xa2   :  { %781 = vmatmul.mubr.bf16.gmra.mrb[8].mxu0 %v7522_v31  ;;  %1622 = vmatmul.mubr.bf16.gmra.mrb[8].mxu1 %v7889_v25  ;;  %9547 = vst [vmem:[#allocation20_spill] sm:$0xff] %v7914_v2 }
  0xa3   :  { %790 = vmatprep.mubr.bf16.mxu0 %v9539_v3  ;;  %1631 = vmatprep.mubr.bf16.mxu1 %v9539_v3 }
  0xa4   :  { %1007 = vmatpush1.bf16.msra.mxu0 %v7897_v48  ;;  %1709 = vmatpush1.bf16.msra.mxu1 %v7897_v48  ;;  %v7933_v48 = vld [vmem:[%s9444_s1 + $0x1e0] ss:$8 sps:$4 sm:$0xff]  }
  0xa5   :  { %1008 = vmatprep.subr.bf16.mxu0 %v7903_v4  ;;  %1710 = vmatprep.subr.bf16.mxu1 %v7903_v4  ;;  %9549 = vst [vmem:[#allocation22_spill] sm:$0xff] %v7933_v48  ;;  %v7940_v4 = vld [vmem:[%s9444_s1 + $0x1f4] ss:$8 sps:$4 sm:$0xff]  }
  0xa6   :  { %9550 = vst [vmem:[#allocation23_spill] sm:$0xff] %v7940_v4 }
  0xa8   :  { %1009 = vmatpush1.bf16.msra.mxu0 %v7914_v2  ;;  %1711 = vmatpush1.bf16.msra.mxu1 %v7914_v2  ;;  %v7958_v2 = vld [vmem:[%s9444_s1 + $0x204] ss:$8 sps:$4 sm:$0xff]  }
  0xa9   :  { %1010 = vmatprep.subr.bf16.mxu0 %v7921_v1  ;;  %1712 = vmatprep.subr.bf16.mxu1 %v7921_v1  ;;  %v7951_v1 = vld [vmem:[%s9444_s1 + $0x1f0] ss:$8 sps:$4 sm:$0xff]   ;;  %9552 = vst [vmem:[#allocation25_spill] sm:$0xff] %v7958_v2 }
  0xaa   :  { %791 = vmatmul.mubr.bf16.gmra.mrb[12].mxu0 %v7564_v37  ;;  %1632 = vmatmul.mubr.bf16.gmra.mrb[12].mxu1 %v7926_v0  ;;  %9551 = vst [vmem:[#allocation24_spill] sm:$0xff] %v7951_v1  ;;  %v7963_v37 = vld [vmem:[%s9445_s0 + $0xe0] sm:$0xff]  }
  0xab   :  { %800 = vmatprep.mubr.bf16.mxu0 %v9539_v3  ;;  %1641 = vmatprep.mubr.bf16.mxu1 %v9539_v3 }
  0xac   :  { %1011 = vmatpush1.bf16.msra.mxu0 %v7933_v48  ;;  %1713 = vmatpush1.bf16.msra.mxu1 %v7933_v48  ;;  %v7999_v48 = vld [vmem:[%s9444_s1 + $0x214] ss:$8 sps:$4 sm:$0xff]  }
  0xad   :  { %1012 = vmatprep.subr.bf16.mxu0 %v7940_v4  ;;  %1714 = vmatprep.subr.bf16.mxu1 %v7940_v4  ;;  %v7976_v4 = vld [vmem:[%s9445_s0 + $0xe8] sm:$0xff]   ;;  %9554 = vst [vmem:[#allocation27_spill] sm:$0xff] %v7999_v48 }
  0xb0   :  { %1013 = vmatpush1.bf16.msra.mxu0 %v7951_v1  ;;  %1715 = vmatpush1.bf16.msra.mxu1 %v7951_v1  ;;  %v7994_v1 = vld [vmem:[%s9444_s1 + $0x200] ss:$8 sps:$4 sm:$0xff]  }
  0xb1   :  { %1232 = vmatprep.subr.bf16.mxu0 %v7958_v2  ;;  %1837 = vmatprep.subr.bf16.mxu1 %v7958_v2  ;;  %v7985_v2 = vld [vmem:[%s9445_s0 + $0xf0] sm:$0xff]   ;;  %9553 = vst [vmem:[#allocation26_spill] sm:$0xff] %v7994_v1 }
  0xb2   :  { %801 = vmatmul.mubr.bf16.gmra.mrb[16].mxu0 %v7606_v43  ;;  %1642 = vmatmul.mubr.bf16.gmra.mrb[16].mxu1 %v7963_v37  ;;  %v8031_v43 = vld [vmem:[%s9444_s1 + $0x234] ss:$8 sps:$4 sm:$0xff]  }
  0xb3   :  { %810 = vmatprep.mubr.bf16.mxu0 %v9539_v3  ;;  %1651 = vmatprep.mubr.bf16.mxu1 %v9539_v3 }
  0xba   :  { %811 = vmatmul.mubr.bf16.gmra.mrb[20].mxu0 %v7624_v45  ;;  %1652 = vmatmul.mubr.bf16.gmra.mrb[20].mxu1 %v7976_v4  ;;  %v8015_v45 = vld [vmem:[%s9444_s1 + $0x224] ss:$8 sps:$4 sm:$0xff]  }
  0xbb   :  { %820 = vmatprep.mubr.bf16.mxu0 %v9539_v3  ;;  %1661 = vmatprep.mubr.bf16.mxu1 %v9539_v3  ;;  %9556 = vst [vmem:[#allocation29_spill] sm:$0xff] %v8015_v45 }
  0xc2   :  { %821 = vmatmul.mubr.bf16.gmra.mrb[24].mxu0 %v7638_v47  ;;  %1662 = vmatmul.mubr.bf16.gmra.mrb[24].mxu1 %v7985_v2  ;;  %v8008_v47 = vld [vmem:[%s9444_s1 + $0x210] ss:$8 sps:$4 sm:$0xff]  }
  0xc3   :  { %1030 = vmatprep.mubr.bf16.mxu0 %v9539_v3  ;;  %1732 = vmatprep.mubr.bf16.mxu1 %v9539_v3  ;;  %9555 = vst [vmem:[#allocation28_spill] sm:$0xff] %v8008_v47 }
  0xca   :  { %1031 = vmatmul.mubr.bf16.vlgmr.msra.gmra.mrb[0].mxu0 %v7819_v18  ;;  %1733 = vmatmul.mubr.bf16.vlgmr.msra.gmra.mrb[0].mxu1 %v7677_v53 }
  0xcb   :  { %1233 = vmatpush1.bf16.msra.mxu0 %v7994_v1  ;;  %1838 = vmatpush1.bf16.msra.mxu1 %v7994_v1  ;;  %v8024_v1 = vld [vmem:[%s9444_s1 + $0x220] ss:$8 sps:$4 sm:$0xff]  }
  0xcc   :  { %1040 = vmatprep.mubr.bf16.mxu0 %v9539_v3  ;;  %1234 = vmatprep.subr.bf16.mxu0 %v7999_v48  ;;  %9557 = vst [vmem:[#allocation30_spill] sm:$0xff] %v8024_v1 }
  0xcd   :  { %1742 = vmatprep.mubr.bf16.mxu1 %v9539_v3  ;;  %1839 = vmatprep.subr.bf16.mxu1 %v7999_v48  ;;  %v8057_v48 = vld [vmem:[%s9444_s1 + $0x240] ss:$8 sps:$4 sm:$0xff]  }
  0xce   :  { %9560 = vst [vmem:[#allocation33_spill] sm:$0xff] %v8057_v48 }
  0xcf   :  { %1235 = vmatpush1.bf16.msra.mxu0 %v8008_v47  ;;  %1840 = vmatpush1.bf16.msra.mxu1 %v8008_v47  ;;  %v8040_v47 = vld [vmem:[%s9444_s1 + $0x230] ss:$8 sps:$4 sm:$0xff]  }
  0xd0   :  { %1236 = vmatprep.subr.bf16.mxu0 %v8015_v45  ;;  %1841 = vmatprep.subr.bf16.mxu1 %v8015_v45  ;;  %9558 = vst [vmem:[#allocation31_spill] sm:$0xff] %v8040_v47  ;;  %v8047_v45 = vld [vmem:[%s9444_s1 + $0x244] ss:$8 sps:$4 sm:$0xff]  }
  0xd1   :  { %9559 = vst [vmem:[#allocation32_spill] sm:$0xff] %v8047_v45 }
  0xd2   :  { %1041 = vmatmul.mubr.bf16.gmra.mrb[4].mxu0 %v7852_v19  ;;  %1743 = vmatmul.mubr.bf16.gmra.mrb[4].mxu1 %v7714_v58 }
  0xd3   :  { %1050 = vmatprep.mubr.bf16.mxu0 %v9539_v3  ;;  %1237 = vmatpush1.bf16.msra.mxu0 %v8024_v1 }
  0xd4   :  { %1752 = vmatprep.mubr.bf16.mxu1 %v9539_v3  ;;  %1842 = vmatpush1.bf16.msra.mxu1 %v8024_v1  ;;  %v8063_v1 = vld [vmem:[%s9444_s1 + $0x254] ss:$8 sps:$4 sm:$0xff]  }
  0xd5   :  { %1238 = vmatprep.subr.bf16.mxu0 %v8031_v43  ;;  %1843 = vmatprep.subr.bf16.mxu1 %v8031_v43  ;;  %9561 = vst [vmem:[#allocation34_spill] sm:$0xff] %v8063_v1 }
  0xd7   :  { %1239 = vmatpush1.bf16.msra.mxu0 %v8040_v47 }
  0xd8   :  { %1844 = vmatpush1.bf16.msra.mxu1 %v8040_v47  ;;  %1240 = vmatprep.subr.bf16.mxu0 %v8047_v45  ;;  %v8081_v47 = vld [vmem:[%s9444_s1 + $0x264] ss:$8 sps:$4 sm:$0xff]  }
  0xd9   :  { %1845 = vmatprep.subr.bf16.mxu1 %v8047_v45  ;;  %v8074_v45 = vld [vmem:[%s9444_s1 + $0x250] ss:$8 sps:$4 sm:$0xff]   ;;  %9563 = vst [vmem:[#allocation36_spill] sm:$0xff] %v8081_v47 }
  0xda   :  { %1051 = vmatmul.mubr.bf16.gmra.mrb[8].mxu0 %v7889_v25  ;;  %1753 = vmatmul.mubr.bf16.gmra.mrb[8].mxu1 %v7751_v63  ;;  %9562 = vst [vmem:[#allocation35_spill] sm:$0xff] %v8074_v45 }
  0xdb   :  { %1060 = vmatprep.mubr.bf16.mxu0 %v9539_v3  ;;  %1762 = vmatprep.mubr.bf16.mxu1 %v9539_v3 }
  0xdc   :  { %1241 = vmatpush1.bf16.msra.mxu0 %v8057_v48  ;;  %1846 = vmatpush1.bf16.msra.mxu1 %v8057_v48  ;;  %v8088_v48 = vld [vmem:[%s9444_s1 + $0x260] ss:$8 sps:$4 sm:$0xff]  }
  0xdd   :  { %1242 = vmatprep.subr.bf16.mxu0 %v8063_v1  ;;  %1847 = vmatprep.subr.bf16.mxu1 %v8063_v1  ;;  %v8095_v1 = vld [vmem:[%s9444_s1 + $0x274] ss:$8 sps:$4 sm:$0xff]  }
  0xde   :  { %9564 = vst [vmem:[#allocation37_spill] sm:$0xff] %v8095_v1 }
  0xe0   :  { %1243 = vmatpush1.bf16.msra.mxu0 %v8074_v45  ;;  %1848 = vmatpush1.bf16.msra.mxu1 %v8074_v45  ;;  %v7250_v45 = vld [vmem:[%s9444_s1 + $0x84] ss:$8 sps:$4 sm:$0xff]  }
  0xe1   :  { %1244 = vmatprep.subr.bf16.mxu0 %v8081_v47  ;;  %1849 = vmatprep.subr.bf16.mxu1 %v8081_v47  ;;  %v8106_v47 = vld [vmem:[%s9444_s1 + $0x270] ss:$8 sps:$4 sm:$0xff]  }
  0xe2   :  { %1061 = vmatmul.mubr.bf16.gmra.mrb[12].mxu0 %v7926_v0  ;;  %1763 = vmatmul.mubr.bf16.gmra.mrb[12].mxu1 %v7788_v5  ;;  %9565 = vst [vmem:[#allocation38_spill] sm:$0xff] %v8106_v47 }
  0xe3   :  { %1070 = vmatprep.mubr.bf16.mxu0 %v9539_v3  ;;  %1772 = vmatprep.mubr.bf16.mxu1 %v9539_v3 }
  0xe4   :  { %1245 = vmatpush1.bf16.msra.mxu0 %v8088_v48  ;;  %1850 = vmatpush1.bf16.msra.mxu1 %v8088_v48 }
  0xe5   :  { %1246 = vmatprep.subr.bf16.mxu0 %v8095_v1  ;;  %1851 = vmatprep.subr.bf16.mxu1 %v8095_v1  ;;  %v7252_v1 = vld [vmem:[%s9444_s1 + $0x94] ss:$8 sps:$4 sm:$0xff]  }
  0xe8   :  { %1247 = vmatpush1.bf16.msra.mxu0 %v8106_v47  ;;  %1852 = vmatpush1.bf16.msra.mxu1 %v8106_v47  ;;  %v7251_v47 = vld [vmem:[%s9444_s1 + $0x80] ss:$8 sps:$4 sm:$0xff]  }
  0xe9   :  { %2052 = vmatprep.subr.bf16.mxu0 %v7250_v45  ;;  %2657 = vmatprep.subr.bf16.mxu1 %v7250_v45  ;;  %v8126_v45 = vld [vmem:[%s9445_s0 + $0x38] sm:$0xff]  }
  0xea   :  { %1071 = vmatmul.mubr.bf16.gmra.mrb[16].mxu0 %v7963_v37  ;;  %1773 = vmatmul.mubr.bf16.gmra.mrb[16].mxu1 %v7801_v6 }
  0xeb   :  { %1080 = vmatprep.mubr.bf16.mxu0 %v9539_v3  ;;  %1782 = vmatprep.mubr.bf16.mxu1 %v9539_v3 }
  0xf2   :  { %1081 = vmatmul.mubr.bf16.gmra.mrb[20].mxu0 %v7976_v4  ;;  %1783 = vmatmul.mubr.bf16.gmra.mrb[20].mxu1 %v7810_v7 }
  0xf3   :  { %1090 = vmatprep.mubr.bf16.mxu0 %v9539_v3  ;;  %1792 = vmatprep.mubr.bf16.mxu1 %v9539_v3 }
  0xfa   :  { %1091 = vmatmul.mubr.bf16.gmra.mrb[24].mxu0 %v7985_v2  ;;  %1793 = vmatmul.mubr.bf16.gmra.mrb[24].mxu1 %v8126_v45 }
  0xfb   :  { %1264 = vmatprep.mubr.bf16.mxu0 %v9539_v3  ;;  %1869 = vmatprep.mubr.bf16.mxu1 %v9539_v3 }
 0x102   :  { %1265 = vmatmul.mubr.bf16.vlgmr.msra.gmra.mrb[0].mxu0 %v7677_v53  ;;  %1870 = vmatmul.mubr.bf16.vlgmr.msra.gmra.mrb[0].mxu1 %v7475_v24  ;;  %v7253_v24 = vld [vmem:[%s9444_s1 + $0x90] ss:$8 sps:$4 sm:$0xff]  }
 0x103   :  { %2053 = vmatpush1.bf16.msra.mxu0 %v7251_v47  ;;  %2658 = vmatpush1.bf16.msra.mxu1 %v7251_v47  ;;  %v7254_v47 = vld [vmem:[%s9444_s1 + $0xa4] ss:$8 sps:$4 sm:$0xff]  }
 0x104   :  { %1274 = vmatprep.mubr.bf16.mxu0 %v9539_v3  ;;  %1879 = vmatprep.mubr.bf16.mxu1 %v9539_v3 }
 0x105   :  { %2054 = vmatprep.subr.bf16.mxu0 %v7252_v1  ;;  %2659 = vmatprep.subr.bf16.mxu1 %v7252_v1  ;;  %v7255_v1 = vld [vmem:[%s9444_s1 + $0xa0] ss:$8 sps:$4 sm:$0xff]  }
 0x107   :  { %2055 = vmatpush1.bf16.msra.mxu0 %v7253_v24  ;;  %2660 = vmatpush1.bf16.msra.mxu1 %v7253_v24  ;;  %v7256_v24 = vld [vmem:[%s9444_s1 + $0xb4] ss:$8 sps:$4 sm:$0xff]  }
 0x108   :  { %2056 = vmatprep.subr.bf16.mxu0 %v7254_v47  ;;  %2661 = vmatprep.subr.bf16.mxu1 %v7254_v47 }
 0x10a   :  { %1275 = vmatmul.mubr.bf16.gmra.mrb[4].mxu0 %v7714_v58  ;;  %1880 = vmatmul.mubr.bf16.gmra.mrb[4].mxu1 %v7515_v30  ;;  %v7257_v30 = vld [vmem:[%s9444_s1 + $0xb0] ss:$8 sps:$4 sm:$0xff]  }
 0x10b   :  { %1284 = vmatprep.mubr.bf16.mxu0 %v9539_v3  ;;  %1889 = vmatprep.mubr.bf16.mxu1 %v9539_v3 }
 0x10c   :  { %2057 = vmatpush1.bf16.msra.mxu0 %v7255_v1  ;;  %2662 = vmatpush1.bf16.msra.mxu1 %v7255_v1 }
 0x10d   :  { %2058 = vmatprep.subr.bf16.mxu0 %v7256_v24  ;;  %2663 = vmatprep.subr.bf16.mxu1 %v7256_v24 }
 0x110   :  { %2059 = vmatpush1.bf16.msra.mxu0 %v7367_v8  ;;  %2664 = vmatpush1.bf16.msra.mxu1 %v7257_v30  ;;  %v8199_v8 = vld [vmem:[%s9445_s0 + $0x78] sm:$0xff]  }
 0x111   :  { %2060 = vmatprep.subr.bf16.mxu0 %v7372_v9  ;;  %2665 = vmatprep.subr.bf16.mxu1 %v7372_v9  ;;  %v7258_v9 = vld [vmem:[%s9445_s0 + $0x80] sm:$0xff]  }
 0x112   :  { %1285 = vmatmul.mubr.bf16.gmra.mrb[8].mxu0 %v7751_v63  ;;  %1890 = vmatmul.mubr.bf16.gmra.mrb[8].mxu1 %v7545_v34  ;;  %v8370_v34 = vld [vmem:[%s9445_s0 + $0x58] sm:$0xff]  }
 0x113   :  { %1294 = vmatprep.mubr.bf16.mxu0 %v9539_v3  ;;  %1899 = vmatprep.mubr.bf16.mxu1 %v9539_v3 }
 0x114   :  { %2061 = vmatpush1.bf16.msra.mxu0 %v7379_v10  ;;  %2666 = vmatpush1.bf16.msra.mxu1 %v7379_v10  ;;  %v8282_v10 = vld [vmem:[%s9445_s0 + $0x88] sm:$0xff]  }
 0x115   :  { %2062 = vmatprep.subr.bf16.mxu0 %v7386_v11  ;;  %2667 = vmatprep.subr.bf16.mxu1 %v7386_v11  ;;  %v9566_v11 = vld [vmem:[#allocation2_spill] sm:$0xff] }
 0x118   :  { %2063 = vmatpush1.bf16.msra.mxu0 %v7393_v12  ;;  %2668 = vmatpush1.bf16.msra.mxu1 %v7393_v12  ;;  %v9567_v12 = vld [vmem:[#allocation6_spill] sm:$0xff] }
 0x119   :  { %2064 = vmatprep.subr.bf16.mxu0 %v7400_v13  ;;  %2669 = vmatprep.subr.bf16.mxu1 %v7400_v13  ;;  %v9568_v13 = vld [vmem:[#allocation7_spill] sm:$0xff] }
 0x11a   :  { %1295 = vmatmul.mubr.bf16.gmra.mrb[12].mxu0 %v7788_v5  ;;  %1900 = vmatmul.mubr.bf16.gmra.mrb[12].mxu1 %v7587_v40  ;;  %v9586_v40 = vld [vmem:[#allocation22_spill] sm:$0xff] }
 0x11b   :  { %1304 = vmatprep.mubr.bf16.mxu0 %v9539_v3  ;;  %1909 = vmatprep.mubr.bf16.mxu1 %v9539_v3 }
 0x11c   :  { %2065 = vmatpush1.bf16.msra.mxu0 %v7407_v14  ;;  %2670 = vmatpush1.bf16.msra.mxu1 %v7407_v14  ;;  %v9569_v14 = vld [vmem:[#allocation8_spill] sm:$0xff] }
 0x11d   :  { %2066 = vmatprep.subr.bf16.mxu0 %v7414_v15  ;;  %2671 = vmatprep.subr.bf16.mxu1 %v7414_v15  ;;  %v9570_v15 = vld [vmem:[#allocation9_spill] sm:$0xff] }
 0x120   :  { %2067 = vmatpush1.bf16.msra.mxu0 %v7421_v16  ;;  %2672 = vmatpush1.bf16.msra.mxu1 %v7421_v16  ;;  %v9571_v16 = vld [vmem:[#allocation3_spill] sm:$0xff] }
 0x121   :  { %2155 = vmatprep.subr.bf16.mxu0 %v7428_v17  ;;  %2760 = vmatprep.subr.bf16.mxu1 %v7428_v17  ;;  %v9572_v17 = vld [vmem:[#allocation4_spill] sm:$0xff] }
 0x122   :  { %1305 = vmatmul.mubr.bf16.gmra.mrb[16].mxu0 %v7801_v6  ;;  %1910 = vmatmul.mubr.bf16.gmra.mrb[16].mxu1 %v7619_v44  ;;  %v9589_v44 = vld [vmem:[#allocation25_spill] sm:$0xff] }
 0x123   :  { %1314 = vmatprep.mubr.bf16.mxu0 %v9539_v3  ;;  %1919 = vmatprep.mubr.bf16.mxu1 %v9539_v3 }
 0x12a   :  { %1315 = vmatmul.mubr.bf16.gmra.mrb[20].mxu0 %v7810_v7  ;;  %1920 = vmatmul.mubr.bf16.gmra.mrb[20].mxu1 %v7633_v46  ;;  %v8404_v46 = vld [vmem:[%s9445_s0 + $0x68] sm:$0xff]  }
 0x12b   :  { %1324 = vmatprep.mubr.bf16.mxu0 %v9539_v3  ;;  %1929 = vmatprep.mubr.bf16.mxu1 %v9539_v3 }
 0x132   :  { %1325 = vmatmul.mubr.bf16.gmra.mrb[24].mxu0 %v8126_v45  ;;  %1930 = vmatmul.mubr.bf16.gmra.mrb[24].mxu1 %v8199_v8 }
 0x133   :  { %2084 = vmatprep.mubr.bf16.mxu0 %v9539_v3  ;;  %2689 = vmatprep.mubr.bf16.mxu1 %v9539_v3 }
 0x13a   :  { %2085 = vmatmul.mubr.bf16.vlgmr.msra.gmra.mrb[28].mxu0 %v7819_v18  ;;  %2690 = vmatmul.mubr.bf16.vlgmr.msra.gmra.mrb[28].mxu1 %v7677_v53 }
 0x13b   :  { %2156 = vmatpush1.bf16.msra.mxu0 %v7445_v20  ;;  %2761 = vmatpush1.bf16.msra.mxu1 %v7445_v20  ;;  %v9573_v20 = vld [vmem:[#allocation5_spill] sm:$0xff] }
 0x13c   :  { %2094 = vmatprep.mubr.bf16.mxu0 %v9539_v3  ;;  %2157 = vmatprep.subr.bf16.mxu0 %v7452_v21 }
 0x13d   :  { %2699 = vmatprep.mubr.bf16.mxu1 %v9539_v3  ;;  %2762 = vmatprep.subr.bf16.mxu1 %v7452_v21  ;;  %v8336_v21 = vld [vmem:[%s9445_s0 + $0x48] sm:$0xff]  }
 0x13f   :  { %2158 = vmatpush1.bf16.msra.mxu0 %v7461_v22  ;;  %2763 = vmatpush1.bf16.msra.mxu1 %v7461_v22  ;;  %v9574_v22 = vld [vmem:[#allocation10_spill] sm:$0xff] }
 0x140   :  { %2159 = vmatprep.subr.bf16.mxu0 %v7468_v23  ;;  %2764 = vmatprep.subr.bf16.mxu1 %v7468_v23  ;;  %v9575_v23 = vld [vmem:[#allocation11_spill] sm:$0xff] }
 0x142   :  { %2095 = vmatmul.mubr.bf16.gmra.mrb[32].mxu0 %v7852_v19  ;;  %2700 = vmatmul.mubr.bf16.gmra.mrb[32].mxu1 %v7714_v58 }
 0x143   :  { %2104 = vmatprep.mubr.bf16.mxu0 %v9539_v3  ;;  %2160 = vmatpush1.bf16.msra.mxu0 %v7487_v26 }
 0x144   :  { %2709 = vmatprep.mubr.bf16.mxu1 %v9539_v3  ;;  %2765 = vmatpush1.bf16.msra.mxu1 %v7487_v26  ;;  %v9576_v26 = vld [vmem:[#allocation12_spill] sm:$0xff] }
 0x145   :  { %2161 = vmatprep.subr.bf16.mxu0 %v7494_v27  ;;  %2766 = vmatprep.subr.bf16.mxu1 %v7494_v27  ;;  %v9577_v27 = vld [vmem:[#allocation13_spill] sm:$0xff] }
 0x147   :  { %2162 = vmatpush1.bf16.msra.mxu0 %v7503_v28 }
 0x148   :  { %2767 = vmatpush1.bf16.msra.mxu1 %v7503_v28  ;;  %2163 = vmatprep.subr.bf16.mxu0 %v7510_v29  ;;  %v8353_v28 = vld [vmem:[%s9445_s0 + $0x50] sm:$0xff]  }
 0x149   :  { %2768 = vmatprep.subr.bf16.mxu1 %v7510_v29  ;;  %v9578_v29 = vld [vmem:[#allocation14_spill] sm:$0xff] }
 0x14a   :  { %2105 = vmatmul.mubr.bf16.gmra.mrb[36].mxu0 %v7889_v25  ;;  %2710 = vmatmul.mubr.bf16.gmra.mrb[36].mxu1 %v7751_v63 }
 0x14b   :  { %2114 = vmatprep.mubr.bf16.mxu0 %v9539_v3  ;;  %2719 = vmatprep.mubr.bf16.mxu1 %v9539_v3 }
 0x14c   :  { %2164 = vmatpush1.bf16.msra.mxu0 %v7530_v32  ;;  %2769 = vmatpush1.bf16.msra.mxu1 %v7530_v32  ;;  %v9580_v32 = vld [vmem:[#allocation16_spill] sm:$0xff] }
 0x14d   :  { %2165 = vmatprep.subr.bf16.mxu0 %v7536_v33  ;;  %2770 = vmatprep.subr.bf16.mxu1 %v7536_v33  ;;  %v9581_v33 = vld [vmem:[#allocation17_spill] sm:$0xff] }
 0x150   :  { %2166 = vmatpush1.bf16.msra.mxu0 %v7552_v35  ;;  %2771 = vmatpush1.bf16.msra.mxu1 %v7552_v35  ;;  %v9582_v35 = vld [vmem:[#allocation18_spill] sm:$0xff] }
 0x151   :  { %2167 = vmatprep.subr.bf16.mxu0 %v7559_v36  ;;  %2772 = vmatprep.subr.bf16.mxu1 %v7559_v36  ;;  %v9583_v36 = vld [vmem:[#allocation19_spill] sm:$0xff] }
 0x152   :  { %2115 = vmatmul.mubr.bf16.gmra.mrb[40].mxu0 %v7926_v0  ;;  %2720 = vmatmul.mubr.bf16.gmra.mrb[40].mxu1 %v7788_v5 }
 0x153   :  { %2124 = vmatprep.mubr.bf16.mxu0 %v9539_v3  ;;  %2729 = vmatprep.mubr.bf16.mxu1 %v9539_v3 }
 0x154   :  { %2168 = vmatpush1.bf16.msra.mxu0 %v7571_v38  ;;  %2773 = vmatpush1.bf16.msra.mxu1 %v7571_v38  ;;  %v9585_v38 = vld [vmem:[#allocation21_spill] sm:$0xff] }
 0x155   :  { %2169 = vmatprep.subr.bf16.mxu0 %v7578_v39  ;;  %2774 = vmatprep.subr.bf16.mxu1 %v7578_v39  ;;  %v8387_v39 = vld [vmem:[%s9445_s0 + $0x60] sm:$0xff]  }
 0x158   :  { %2170 = vmatpush1.bf16.msra.mxu0 %v7594_v41  ;;  %2775 = vmatpush1.bf16.msra.mxu1 %v7594_v41  ;;  %v9587_v41 = vld [vmem:[#allocation23_spill] sm:$0xff] }
 0x159   :  { %2258 = vmatprep.subr.bf16.mxu0 %v7601_v42  ;;  %2863 = vmatprep.subr.bf16.mxu1 %v7601_v42  ;;  %v9588_v42 = vld [vmem:[#allocation24_spill] sm:$0xff] }
 0x15a   :  { %2125 = vmatmul.mubr.bf16.gmra.mrb[44].mxu0 %v7963_v37  ;;  %2730 = vmatmul.mubr.bf16.gmra.mrb[44].mxu1 %v7801_v6 }
 0x15b   :  { %2134 = vmatprep.mubr.bf16.mxu0 %v9539_v3  ;;  %2739 = vmatprep.mubr.bf16.mxu1 %v9539_v3 }
 0x162   :  { %2135 = vmatmul.mubr.bf16.gmra.mrb[48].mxu0 %v7976_v4  ;;  %2740 = vmatmul.mubr.bf16.gmra.mrb[48].mxu1 %v7810_v7 }
 0x163   :  { %2144 = vmatprep.mubr.bf16.mxu0 %v9539_v3  ;;  %2749 = vmatprep.mubr.bf16.mxu1 %v9539_v3 }
 0x16a   :  { %2145 = vmatmul.mubr.bf16.gmra.mrb[52].mxu0 %v7985_v2  ;;  %2750 = vmatmul.mubr.bf16.gmra.mrb[52].mxu1 %v8126_v45 }
 0x16b   :  { %2187 = vmatprep.mubr.bf16.mxu0 %v9539_v3  ;;  %2792 = vmatprep.mubr.bf16.mxu1 %v9539_v3 }
 0x172   :  { %2188 = vmatmul.mubr.bf16.vlgmr.msra.gmra.mrb[28].mxu0 %v7258_v9  ;;  %2793 = vmatmul.mubr.bf16.vlgmr.msra.gmra.mrb[28].mxu1 %v7819_v18 }
 0x173   :  { %2259 = vmatpush1.bf16.msra.mxu0 %v7650_v49  ;;  %2864 = vmatpush1.bf16.msra.mxu1 %v7650_v49  ;;  %v8413_v49 = vld [vmem:[%s9445_s0 + $0x70] sm:$0xff]  }
 0x174   :  { %2197 = vmatprep.mubr.bf16.mxu0 %v9539_v3  ;;  %2260 = vmatprep.subr.bf16.mxu0 %v7655_v50 }
 0x175   :  { %2802 = vmatprep.mubr.bf16.mxu1 %v9539_v3  ;;  %2865 = vmatprep.subr.bf16.mxu1 %v7655_v50 }
 0x177   :  { %2261 = vmatpush1.bf16.msra.mxu0 %v7663_v51  ;;  %2866 = vmatpush1.bf16.msra.mxu1 %v7663_v51 }
 0x178   :  { %2262 = vmatprep.subr.bf16.mxu0 %v7670_v52  ;;  %2867 = vmatprep.subr.bf16.mxu1 %v7670_v52 }
 0x17a   :  { %2198 = vmatmul.mubr.bf16.gmra.mrb[32].mxu0 %v8282_v10  ;;  %2803 = vmatmul.mubr.bf16.gmra.mrb[32].mxu1 %v7852_v19 }
 0x17b   :  { %2207 = vmatprep.mubr.bf16.mxu0 %v9539_v3  ;;  %2263 = vmatpush1.bf16.msra.mxu0 %v7684_v54 }
 0x17c   :  { %2812 = vmatprep.mubr.bf16.mxu1 %v9539_v3  ;;  %2868 = vmatpush1.bf16.msra.mxu1 %v7684_v54 }
 0x17d   :  { %2264 = vmatprep.subr.bf16.mxu0 %v7691_v55  ;;  %2869 = vmatprep.subr.bf16.mxu1 %v7691_v55 }
 0x17f   :  { %2265 = vmatpush1.bf16.msra.mxu0 %v7700_v56 }
 0x180   :  { %2870 = vmatpush1.bf16.msra.mxu1 %v7700_v56  ;;  %2266 = vmatprep.subr.bf16.mxu0 %v7707_v57 }
 0x181   :  { %2871 = vmatprep.subr.bf16.mxu1 %v7707_v57 }
 0x182   :  { %2208 = vmatmul.mubr.bf16.gmra.mrb[36].mxu0 %v7522_v31  ;;  %2813 = vmatmul.mubr.bf16.gmra.mrb[36].mxu1 %v7889_v25  ;;  %v9579_v31 = vld [vmem:[#allocation15_spill] sm:$0xff] }
 0x183   :  { %2217 = vmatprep.mubr.bf16.mxu0 %v9539_v3  ;;  %2822 = vmatprep.mubr.bf16.mxu1 %v9539_v3 }
 0x184   :  { %2267 = vmatpush1.bf16.msra.mxu0 %v7722_v59  ;;  %2872 = vmatpush1.bf16.msra.mxu1 %v7722_v59 }
 0x185   :  { %2268 = vmatprep.subr.bf16.mxu0 %v7728_v60  ;;  %2873 = vmatprep.subr.bf16.mxu1 %v7728_v60 }
 0x188   :  { %2269 = vmatpush1.bf16.msra.mxu0 %v7739_v61  ;;  %2874 = vmatpush1.bf16.msra.mxu1 %v7739_v61 }
 0x189   :  { %2270 = vmatprep.subr.bf16.mxu0 %v7746_v62  ;;  %2875 = vmatprep.subr.bf16.mxu1 %v7746_v62 }
 0x18a   :  { %2218 = vmatmul.mubr.bf16.gmra.mrb[40].mxu0 %v9566_v11  ;;  %2823 = vmatmul.mubr.bf16.gmra.mrb[40].mxu1 %v7926_v0 }
 0x18b   :  { %2227 = vmatprep.mubr.bf16.mxu0 %v9539_v3  ;;  %2832 = vmatprep.mubr.bf16.mxu1 %v9539_v3 }
 0x18c   :  { %2271 = vmatpush1.bf16.msra.mxu0 %v9567_v12  ;;  %2876 = vmatpush1.bf16.msra.mxu1 %v9567_v12 }
 0x18d   :  { %2272 = vmatprep.subr.bf16.mxu0 %v9568_v13  ;;  %2877 = vmatprep.subr.bf16.mxu1 %v9568_v13 }
 0x190   :  { %2273 = vmatpush1.bf16.msra.mxu0 %v9569_v14  ;;  %2878 = vmatpush1.bf16.msra.mxu1 %v9569_v14 }
 0x191   :  { %2389 = vmatprep.subr.bf16.mxu0 %v9570_v15  ;;  %2994 = vmatprep.subr.bf16.mxu1 %v9570_v15 }
 0x192   :  { %2228 = vmatmul.mubr.bf16.gmra.mrb[44].mxu0 %v9571_v16  ;;  %2833 = vmatmul.mubr.bf16.gmra.mrb[44].mxu1 %v7963_v37  ;;  %v9584_v37 = vld [vmem:[#allocation20_spill] sm:$0xff] }
 0x193   :  { %2237 = vmatprep.mubr.bf16.mxu0 %v9539_v3  ;;  %2842 = vmatprep.mubr.bf16.mxu1 %v9539_v3 }
 0x19a   :  { %2238 = vmatmul.mubr.bf16.gmra.mrb[48].mxu0 %v9572_v17  ;;  %2843 = vmatmul.mubr.bf16.gmra.mrb[48].mxu1 %v7976_v4  ;;  %v9590_v17 = vld [vmem:[#allocation26_spill] sm:$0xff] }
 0x19b   :  { %2247 = vmatprep.mubr.bf16.mxu0 %v9539_v3  ;;  %2852 = vmatprep.mubr.bf16.mxu1 %v9539_v3 }
 0x1a2   :  { %2248 = vmatmul.mubr.bf16.gmra.mrb[52].mxu0 %v9573_v20  ;;  %2853 = vmatmul.mubr.bf16.gmra.mrb[52].mxu1 %v7985_v2  ;;  %v9591_v20 = vld [vmem:[#allocation27_spill] sm:$0xff] }
 0x1a3   :  { %2290 = vmatprep.mubr.bf16.mxu0 %v9539_v3  ;;  %2895 = vmatprep.mubr.bf16.mxu1 %v9539_v3 }
 0x1aa   :  { %2291 = vmatmul.mubr.bf16.vlgmr.msra.gmra.mrb[28].mxu0 %v7677_v53  ;;  %2896 = vmatmul.mubr.bf16.vlgmr.msra.gmra.mrb[28].mxu1 %v8336_v21 }
 0x1ab   :  { %2390 = vmatpush1.bf16.msra.mxu0 %v9574_v22  ;;  %2995 = vmatpush1.bf16.msra.mxu1 %v9574_v22 }
 0x1ac   :  { %2300 = vmatprep.mubr.bf16.mxu0 %v9539_v3  ;;  %2391 = vmatprep.subr.bf16.mxu0 %v9575_v23 }
 0x1ad   :  { %2905 = vmatprep.mubr.bf16.mxu1 %v9539_v3  ;;  %2996 = vmatprep.subr.bf16.mxu1 %v9575_v23 }
 0x1af   :  { %2392 = vmatpush1.bf16.msra.mxu0 %v9576_v26  ;;  %2997 = vmatpush1.bf16.msra.mxu1 %v9576_v26 }
 0x1b0   :  { %2393 = vmatprep.subr.bf16.mxu0 %v9577_v27  ;;  %2998 = vmatprep.subr.bf16.mxu1 %v9577_v27 }
 0x1b2   :  { %2301 = vmatmul.mubr.bf16.gmra.mrb[32].mxu0 %v7714_v58  ;;  %2906 = vmatmul.mubr.bf16.gmra.mrb[32].mxu1 %v8353_v28  ;;  %v8421_v58 = vld [vmem:[%s9447_s2] ss:$0 sm:$0xff] }
 0x1b3   :  { %2310 = vmatprep.mubr.bf16.mxu0 %v9539_v3  ;;  %2394 = vmatpush1.bf16.msra.mxu0 %v9578_v29 }
 0x1b4   :  { %2915 = vmatprep.mubr.bf16.mxu1 %v9539_v3  ;;  %2999 = vmatpush1.bf16.msra.mxu1 %v9578_v29 }
 0x1b5   :  { %2395 = vmatprep.subr.bf16.mxu0 %v9579_v31  ;;  %3000 = vmatprep.subr.bf16.mxu1 %v9579_v31 }
 0x1b7   :  { %2396 = vmatpush1.bf16.msra.mxu0 %v9580_v32 }
 0x1b8   :  { %3001 = vmatpush1.bf16.msra.mxu1 %v9580_v32  ;;  %2397 = vmatprep.subr.bf16.mxu0 %v9581_v33 }
 0x1b9   :  { %3002 = vmatprep.subr.bf16.mxu1 %v9581_v33 }
 0x1ba   :  { %2311 = vmatmul.mubr.bf16.gmra.mrb[36].mxu0 %v7751_v63  ;;  %2916 = vmatmul.mubr.bf16.gmra.mrb[36].mxu1 %v8370_v34 }
 0x1bb   :  { %2320 = vmatprep.mubr.bf16.mxu0 %v9539_v3  ;;  %2925 = vmatprep.mubr.bf16.mxu1 %v9539_v3 }
 0x1bc   :  { %2398 = vmatpush1.bf16.msra.mxu0 %v9582_v35  ;;  %3003 = vmatpush1.bf16.msra.mxu1 %v9582_v35 }
 0x1bd   :  { %2399 = vmatprep.subr.bf16.mxu0 %v9583_v36  ;;  %3004 = vmatprep.subr.bf16.mxu1 %v9583_v36 }
 0x1c0   :  { %2400 = vmatpush1.bf16.msra.mxu0 %v9584_v37  ;;  %3005 = vmatpush1.bf16.msra.mxu1 %v9584_v37  ;;  %v9592_v37 = vld [vmem:[#allocation28_spill] sm:$0xff] }
 0x1c1   :  { %2401 = vmatprep.subr.bf16.mxu0 %v9585_v38  ;;  %3006 = vmatprep.subr.bf16.mxu1 %v9585_v38 }
 0x1c2   :  { %2321 = vmatmul.mubr.bf16.gmra.mrb[40].mxu0 %v7788_v5  ;;  %2926 = vmatmul.mubr.bf16.gmra.mrb[40].mxu1 %v8387_v39 }
 0x1c3   :  { %2330 = vmatprep.mubr.bf16.mxu0 %v9539_v3  ;;  %2935 = vmatprep.mubr.bf16.mxu1 %v9539_v3 }
 0x1c4   :  { %2402 = vmatpush1.bf16.msra.mxu0 %v9586_v40  ;;  %3007 = vmatpush1.bf16.msra.mxu1 %v9586_v40 }
 0x1c5   :  { %2403 = vmatprep.subr.bf16.mxu0 %v9587_v41  ;;  %3008 = vmatprep.subr.bf16.mxu1 %v9587_v41 }
 0x1c8   :  { %2404 = vmatpush1.bf16.msra.mxu0 %v9588_v42  ;;  %3009 = vmatpush1.bf16.msra.mxu1 %v9588_v42  ;;  %v9593_v42 = vld [vmem:[#allocation29_spill] sm:$0xff] }
 0x1c9   :  { %2526 = vmatprep.subr.bf16.mxu0 %v9589_v44  ;;  %3131 = vmatprep.subr.bf16.mxu1 %v9589_v44 }
 0x1ca   :  { %2331 = vmatmul.mubr.bf16.gmra.mrb[44].mxu0 %v7801_v6  ;;  %2936 = vmatmul.mubr.bf16.gmra.mrb[44].mxu1 %v8404_v46 }
 0x1cb   :  { %2340 = vmatprep.mubr.bf16.mxu0 %v9539_v3  ;;  %2945 = vmatprep.mubr.bf16.mxu1 %v9539_v3 }
 0x1d2   :  { %2341 = vmatmul.mubr.bf16.gmra.mrb[48].mxu0 %v7810_v7  ;;  %2946 = vmatmul.mubr.bf16.gmra.mrb[48].mxu1 %v8413_v49 }
 0x1d3   :  { %2350 = vmatprep.mubr.bf16.mxu0 %v9539_v3  ;;  %2955 = vmatprep.mubr.bf16.mxu1 %v9539_v3 }
 0x1d5   :  { %v1266_v50 = vpop.f32.mrb[0].mxu0  ;;  %v1871_v51 = vpop.f32.mrb[0].mxu1 }
 0x1d6   :  { %v1968_v52 = vmax.f32 %v1266_v50, %v1871_v51  ;;  %v1268_v53 = vpop.f32.mrb[1].mxu0  ;;  %v1873_v54 = vpop.f32.mrb[1].mxu1 }
 0x1d7   :  { %v1969_v55 = vmax.f32 %v1268_v53, %v1873_v54  ;;  %v1270_v56 = vpop.f32.mrb[2].mxu0  ;;  %v1875_v57 = vpop.f32.mrb[2].mxu1 }
 0x1d8   :  { %v1970_v59 = vmax.f32 %v1270_v56, %v1875_v57  ;;  %v1272_v60 = vpop.f32.mrb[3].mxu0  ;;  %v1877_v61 = vpop.f32.mrb[3].mxu1 }
 0x1d9   :  { %v1996_v62 = vmax.f32 %v1968_v52, %v1969_v55  ;;  %v1971_v63 = vmax.f32 %v1272_v60, %v1877_v61  ;;  %v8451_v52 = vld [vmem:[%s9445_s0 + $0x90] sm:$0xff]   ;;  %v9594_v55 = vld [vmem:[#allocation30_spill] sm:$0xff] }
 0x1da   :  { %2351 = vmatmul.mubr.bf16.gmra.mrb[52].mxu0 %v8126_v45  ;;  %2956 = vmatmul.mubr.bf16.gmra.mrb[52].mxu1 %v8199_v8 }
 0x1db   :  { %v2017_v0 = vadd.f32 %v8421_v58, %v1996_v62  ;;  %v1997_v2 = vmax.f32 %v1970_v59, %v1971_v63  ;;  %2421 = vmatprep.mubr.bf16.mxu0 %v9539_v3  ;;  %3026 = vmatprep.mubr.bf16.mxu1 %v9539_v3 }
 0x1dd   :  { %v2018_v4 = vadd.f32 %v8421_v58, %v1997_v2  ;;  %v1276_v5 = vpop.f32.mrb[4].mxu0  ;;  %v1881_v6 = vpop.f32.mrb[4].mxu1  ;;  %v2031_v25 = vmax.f32 %v2017_v0, 0.0 }
 0x1de   :  { %v1972_v7 = vmax.f32 %v1276_v5, %v1881_v6  ;;  %v1278_v18 = vpop.f32.mrb[5].mxu0  ;;  %v1883_v19 = vpop.f32.mrb[5].mxu1  ;;  %v9595_v5 = vld [vmem:[#allocation31_spill] sm:$0xff] }
 0x1df   :  { %v2032_v47 = vmax.f32 %v2018_v4, 0.0  ;;  %v1973_v1 = vmax.f32 %v1278_v18, %v1883_v19  ;;  %v1280_v45 = vpop.f32.mrb[6].mxu0  ;;  %v1885_v24 = vpop.f32.mrb[6].mxu1  ;;  %v9596_v19 = vld [vmem:[#allocation32_spill] sm:$0xff] }
 0x1e0   :  { %v1974_v30 = vmax.f32 %v1280_v45, %v1885_v24  ;;  %v1282_v9 = vpop.f32.mrb[7].mxu0  ;;  %v1887_v11 = vpop.f32.mrb[7].mxu1 }
 0x1e1   :  { %v8429_v12 = vpack.c.bf16 %v2032_v47, %v2031_v25  ;;  %v1998_v13 = vmax.f32 %v1972_v7, %v1973_v1  ;;  %v1975_v14 = vmax.f32 %v1282_v9, %v1887_v11  ;;  %v8472_v1 = vld [vmem:[%s9445_s0 + $0x98] sm:$0xff]  }
 0x1e2   :  { %2422 = vmatmul.mubr.bf16.vlgmr.msra.gmra.mrb[28].mxu0 %v8336_v21  ;;  %3027 = vmatmul.mubr.bf16.vlgmr.msra.gmra.mrb[28].mxu1 %v8282_v10 }
 0x1e3   :  { %v2019_v15 = vadd.f32 %v8421_v58, %v1998_v13  ;;  %v1999_v16 = vmax.f32 %v1974_v30, %v1975_v14  ;;  %2527 = vmatpush1.bf16.msra.mxu0 %v9590_v17  ;;  %3132 = vmatpush1.bf16.msra.mxu1 %v9590_v17  ;;  %v9597_v30 = vld [vmem:[#allocation33_spill] sm:$0xff]  ;;  %v9598_v13 = vld [vmem:[#allocation34_spill] sm:$0xff] }
 0x1e4   :  { %2431 = vmatprep.mubr.bf16.mxu0 %v9539_v3  ;;  %2528 = vmatprep.subr.bf16.mxu0 %v9591_v20 }
 0x1e5   :  { %v2020_v22 = vadd.f32 %v8421_v58, %v1999_v16  ;;  %v1286_v23 = vpop.f32.mrb[8].mxu0  ;;  %v1891_v26 = vpop.f32.mrb[8].mxu1  ;;  %3036 = vmatprep.mubr.bf16.mxu1 %v9539_v3  ;;  %3133 = vmatprep.subr.bf16.mxu1 %v9591_v20  ;;  %v2033_v31 = vmax.f32 %v2019_v15, 0.0 }
 0x1e6   :  { %v1976_v21 = vmax.f32 %v1286_v23, %v1891_v26  ;;  %v1288_v27 = vpop.f32.mrb[9].mxu0  ;;  %v1893_v29 = vpop.f32.mrb[9].mxu1 }
 0x1e7   :  { %v2034_v32 = vmax.f32 %v2020_v22, 0.0  ;;  %v1977_v33 = vmax.f32 %v1288_v27, %v1893_v29  ;;  %v1290_v35 = vpop.f32.mrb[10].mxu0  ;;  %v1895_v36 = vpop.f32.mrb[10].mxu1  ;;  %2529 = vmatpush1.bf16.msra.mxu0 %v9592_v37  ;;  %3134 = vmatpush1.bf16.msra.mxu1 %v9592_v37  ;;  %v8493_v37 = vld [vmem:[%s9445_s0 + $0xa0] sm:$0xff]  }
 0x1e8   :  { %v1978_v38 = vmax.f32 %v1290_v35, %v1895_v36  ;;  %v1292_v40 = vpop.f32.mrb[11].mxu0  ;;  %v1897_v41 = vpop.f32.mrb[11].mxu1  ;;  %2530 = vmatprep.subr.bf16.mxu0 %v9593_v42  ;;  %3135 = vmatprep.subr.bf16.mxu1 %v9593_v42  ;;  %v9600_v36 = vld [vmem:[#allocation36_spill] sm:$0xff] }
 0x1e9   :  { %v8445_v44 = vpack.c.bf16 %v2034_v32, %v2033_v31  ;;  %v2000_v50 = vmax.f32 %v1976_v21, %v1977_v33  ;;  %v1979_v51 = vmax.f32 %v1292_v40, %v1897_v41  ;;  %v9599_v31 = vld [vmem:[#allocation35_spill] sm:$0xff] }
 0x1ea   :  { %2432 = vmatmul.mubr.bf16.gmra.mrb[32].mxu0 %v8353_v28  ;;  %3037 = vmatmul.mubr.bf16.gmra.mrb[32].mxu1 %v8451_v52 }
 0x1eb   :  { %v2021_v53 = vadd.f32 %v8421_v58, %v2000_v50  ;;  %v2001_v54 = vmax.f32 %v1978_v38, %v1979_v51  ;;  %2441 = vmatprep.mubr.bf16.mxu0 %v9539_v3  ;;  %2531 = vmatpush1.bf16.msra.mxu0 %v9594_v55  ;;  %v9601_v50 = vld [vmem:[#allocation37_spill] sm:$0xff]  ;;  %v7075_v51 = vld [vmem:[%s9446_s3 + $0x84] ss:$8 sps:$4 sm:$0xff]  }
 0x1ec   :  { %3046 = vmatprep.mubr.bf16.mxu1 %v9539_v3  ;;  %3136 = vmatpush1.bf16.msra.mxu1 %v9594_v55 }
 0x1ed   :  { %v2022_v28 = vadd.f32 %v8421_v58, %v2001_v54  ;;  %v1296_v56 = vpop.f32.mrb[12].mxu0  ;;  %v1901_v57 = vpop.f32.mrb[12].mxu1  ;;  %2532 = vmatprep.subr.bf16.mxu0 %v8031_v43  ;;  %3137 = vmatprep.subr.bf16.mxu1 %v8031_v43  ;;  %v2035_v62 = vmax.f32 %v2021_v53, 0.0 }
 0x1ee   :  { %v1980_v59 = vmax.f32 %v1296_v56, %v1901_v57  ;;  %v1298_v60 = vpop.f32.mrb[13].mxu0  ;;  %v1903_v61 = vpop.f32.mrb[13].mxu1 }
 0x1ef   :  { %v2036_v63 = vmax.f32 %v2022_v28, 0.0  ;;  %v1981_v0 = vmax.f32 %v1298_v60, %v1903_v61  ;;  %v1300_v2 = vpop.f32.mrb[14].mxu0  ;;  %v1905_v4 = vpop.f32.mrb[14].mxu1  ;;  %2533 = vmatpush1.bf16.msra.mxu0 %v9595_v5 }
 0x1f0   :  { %v1982_v6 = vmax.f32 %v1300_v2, %v1905_v4  ;;  %v1302_v7 = vpop.f32.mrb[15].mxu0  ;;  %v1907_v18 = vpop.f32.mrb[15].mxu1  ;;  %3138 = vmatpush1.bf16.msra.mxu1 %v9595_v5  ;;  %2534 = vmatprep.subr.bf16.mxu0 %v9596_v19  ;;  %v8515_v5 = vld [vmem:[%s9445_s0 + $0xa8] sm:$0xff]  }
 0x1f1   :  { %v8465_v25 = vpack.c.bf16 %v2036_v63, %v2035_v62  ;;  %v2002_v43 = vmax.f32 %v1980_v59, %v1981_v0  ;;  %v1983_v47 = vmax.f32 %v1302_v7, %v1907_v18  ;;  %3139 = vmatprep.subr.bf16.mxu1 %v9596_v19  ;;  %v9602_v63 = vld [vmem:[#allocation38_spill] sm:$0xff] }
 0x1f2   :  { %2442 = vmatmul.mubr.bf16.gmra.mrb[36].mxu0 %v8370_v34  ;;  %3047 = vmatmul.mubr.bf16.gmra.mrb[36].mxu1 %v8472_v1 }
 0x1f3   :  { %v2023_v45 = vadd.f32 %v8421_v58, %v2002_v43  ;;  %v2003_v24 = vmax.f32 %v1982_v6, %v1983_v47  ;;  %2451 = vmatprep.mubr.bf16.mxu0 %v9539_v3  ;;  %3056 = vmatprep.mubr.bf16.mxu1 %v9539_v3 }
 0x1f4   :  { %2535 = vmatpush1.bf16.msra.mxu0 %v9597_v30  ;;  %3140 = vmatpush1.bf16.msra.mxu1 %v9597_v30 }
 0x1f5   :  { %v2024_v34 = vadd.f32 %v8421_v58, %v2003_v24  ;;  %v1306_v9 = vpop.f32.mrb[16].mxu0  ;;  %v1911_v11 = vpop.f32.mrb[16].mxu1  ;;  %2536 = vmatprep.subr.bf16.mxu0 %v9598_v13  ;;  %3141 = vmatprep.subr.bf16.mxu1 %v9598_v13  ;;  %v2037_v17 = vmax.f32 %v2023_v45, 0.0 }
 0x1f6   :  { %v1984_v14 = vmax.f32 %v1306_v9, %v1911_v11  ;;  %v1308_v15 = vpop.f32.mrb[17].mxu0  ;;  %v1913_v16 = vpop.f32.mrb[17].mxu1 }
 0x1f7   :  { %v2038_v20 = vmax.f32 %v2024_v34, 0.0  ;;  %v1985_v22 = vmax.f32 %v1308_v15, %v1913_v16  ;;  %v1310_v23 = vpop.f32.mrb[18].mxu0  ;;  %v1915_v26 = vpop.f32.mrb[18].mxu1 }
 0x1f8   :  { %v1986_v21 = vmax.f32 %v1310_v23, %v1915_v26  ;;  %v1312_v27 = vpop.f32.mrb[19].mxu0  ;;  %v1917_v29 = vpop.f32.mrb[19].mxu1  ;;  %2537 = vmatpush1.bf16.msra.mxu0 %v9599_v31  ;;  %3142 = vmatpush1.bf16.msra.mxu1 %v9599_v31 }
 0x1f9   :  { %v8485_v32 = vpack.c.bf16 %v2038_v20, %v2037_v17  ;;  %v2004_v33 = vmax.f32 %v1984_v14, %v1985_v22  ;;  %v1987_v35 = vmax.f32 %v1312_v27, %v1917_v29  ;;  %2538 = vmatprep.subr.bf16.mxu0 %v9600_v36  ;;  %3143 = vmatprep.subr.bf16.mxu1 %v9600_v36  ;;  %v8528_v22 = vld [vmem:[%s9445_s0 + $0xb0] sm:$0xff]  }
 0x1fa   :  { %2452 = vmatmul.mubr.bf16.gmra.mrb[40].mxu0 %v8387_v39  ;;  %3057 = vmatmul.mubr.bf16.gmra.mrb[40].mxu1 %v8493_v37  ;;  %v7076_v36 = vld [vmem:[%s9446_s3 + $0x90] ss:$8 sps:$4 sm:$0xff]  }
 0x1fb   :  { %v2025_v38 = vadd.f32 %v8421_v58, %v2004_v33  ;;  %v2005_v40 = vmax.f32 %v1986_v21, %v1987_v35  ;;  %2461 = vmatprep.mubr.bf16.mxu0 %v9539_v3  ;;  %3066 = vmatprep.mubr.bf16.mxu1 %v9539_v3  ;;  %v7073_v33 = vld [vmem:[%s9446_s3 + $0x80] ss:$8 sps:$4 sm:$0xff]   ;;  %v7078_v35 = vld [vmem:[%s9446_s3 + $0x94] ss:$8 sps:$4 sm:$0xff]  }
 0x1fc   :  { %2539 = vmatpush1.bf16.msra.mxu0 %v8088_v48  ;;  %3144 = vmatpush1.bf16.msra.mxu1 %v8088_v48 }
 0x1fd   :  { %v2026_v39 = vadd.f32 %v8421_v58, %v2005_v40  ;;  %v1316_v41 = vpop.f32.mrb[20].mxu0  ;;  %v1921_v42 = vpop.f32.mrb[20].mxu1  ;;  %2540 = vmatprep.subr.bf16.mxu0 %v9601_v50  ;;  %3145 = vmatprep.subr.bf16.mxu1 %v9601_v50  ;;  %v2039_v28 = vmax.f32 %v2025_v38, 0.0  ;;  %v7079_v38 = vld [vmem:[%s9446_s3 + $0xa0] ss:$8 sps:$4 sm:$0xff]  }
 0x1fe   :  { %v1988_v53 = vmax.f32 %v1316_v41, %v1921_v42  ;;  %v1318_v54 = vpop.f32.mrb[21].mxu0  ;;  %v1923_v55 = vpop.f32.mrb[21].mxu1  ;;  %v7084_v40 = vld [vmem:[%s9446_s3 + $0xb4] ss:$8 sps:$4 sm:$0xff]   ;;  %v7082_v41 = vld [vmem:[%s9446_s3 + $0xb0] ss:$8 sps:$4 sm:$0xff]  }
 0x1ff   :  { %v2040_v56 = vmax.f32 %v2026_v39, 0.0  ;;  %v1989_v57 = vmax.f32 %v1318_v54, %v1923_v55  ;;  %v1320_v59 = vpop.f32.mrb[22].mxu0  ;;  %v1925_v48 = vpop.f32.mrb[22].mxu1  ;;  %v7272_v39 = vld [vmem:[%s9445_s0 + $0xd0] sm:$0xff]   ;;  %v7085_v42 = vld [vmem:[%s9446_s3 + $0xc0] ss:$8 sps:$4 sm:$0xff]  }
 0x200   :  { %v1990_v60 = vmax.f32 %v1320_v59, %v1925_v48  ;;  %v1322_v61 = vpop.f32.mrb[23].mxu0  ;;  %v1927_v62 = vpop.f32.mrb[23].mxu1  ;;  %2541 = vmatpush1.bf16.msra.mxu0 %v9602_v63  ;;  %3146 = vmatpush1.bf16.msra.mxu1 %v9602_v63  ;;  %v7090_v50 = vld [vmem:[%s9446_s3 + $0xd4] ss:$8 sps:$4 sm:$0xff]   ;;  %v7092_v54 = vld [vmem:[%s9446_s3 + $0xe0] ss:$8 sps:$4 sm:$0xff]  }
 0x201   :  { %v8509_v0 = vpack.c.bf16 %v2040_v56, %v2039_v28  ;;  %v2006_v2 = vmax.f32 %v1988_v53, %v1989_v57  ;;  %v1991_v4 = vmax.f32 %v1322_v61, %v1927_v62  ;;  %4298 = vmatprep.subr.bf16.mxu1 %v7075_v51  ;;  %3452 = vmatprep.subr.bf16.mxu0 %v7075_v51  ;;  %v7273_v51 = vld [vmem:[%s9445_s0 + $0xd8] sm:$0xff]   ;;  %v7274_v28 = vld [vmem:[%s9445_s0 + $0xe0] sm:$0xff]   ;;  %v7275_v57 = vld [vmem:[%s9445_s0 + $0xe8] sm:$0xff]  }
 0x202   :  { %2462 = vmatmul.mubr.bf16.gmra.mrb[44].mxu0 %v8404_v46  ;;  %3067 = vmatmul.mubr.bf16.gmra.mrb[44].mxu1 %v8515_v5  ;;  %v7088_v53 = vld [vmem:[%s9446_s3 + $0xd0] ss:$8 sps:$4 sm:$0xff]   ;;  %v7097_v55 = vld [vmem:[%s9446_s3 + $0xf4] ss:$8 sps:$4 sm:$0xff]   ;;  %v8658_v63 = vld [vmem:[%s9446_s3 + $0x24] ss:$8 sps:$4 sm:$0xff]  }
 0x203   :  { %v2027_v6 = vadd.f32 %v8421_v58, %v2006_v2  ;;  %v2007_v7 = vmax.f32 %v1990_v60, %v1991_v4  ;;  %2471 = vmatprep.mubr.bf16.mxu0 %v9539_v3  ;;  %3076 = vmatprep.mubr.bf16.mxu1 %v9539_v3  ;;  %v7095_v56 = vld [vmem:[%s9446_s3 + $0xf0] ss:$8 sps:$4 sm:$0xff]   ;;  %v8639_v60 = vld [vmem:[%s9446_s3] ss:$8 sps:$4 sm:$0xff]   ;;  %v8644_v61 = vld [vmem:[%s9446_s3 + $0x14] ss:$8 sps:$4 sm:$0xff]  }
 0x204   :  { %v7276_v59 = vld [vmem:[%s9445_s0 + $0xf0] sm:$0xff]   ;;  %v7091_v48 = vld [vmem:[%s9445_s0 + $0xf8] sm:$0xff]   ;;  %v8664_v2 = vld [vmem:[%s9446_s3 + $0x20] ss:$8 sps:$4 sm:$0xff]  }
 0x205   :  { %v2028_v18 = vadd.f32 %v8421_v58, %v2007_v7  ;;  %v1326_v19 = vpop.f32.mrb[24].mxu0  ;;  %v1931_v43 = vpop.f32.mrb[24].mxu1  ;;  %v2041_v24 = vmax.f32 %v2027_v6, 0.0  ;;  %v8652_v62 = vld [vmem:[%s9446_s3 + $0x10] ss:$8 sps:$4 sm:$0xff]  }
 0x206   :  { %v1992_v47 = vmax.f32 %v1326_v19, %v1931_v43  ;;  %v1328_v46 = vpop.f32.mrb[25].mxu0  ;;  %v1933_v45 = vpop.f32.mrb[25].mxu1  ;;  %v8670_v4 = vld [vmem:[%s9446_s3 + $0x34] ss:$8 sps:$4 sm:$0xff]   ;;  %v8684_v6 = vld [vmem:[%s9446_s3 + $0x44] ss:$8 sps:$4 sm:$0xff]  }
 0x207   :  { %v2042_v30 = vmax.f32 %v2028_v18, 0.0  ;;  %v1993_v34 = vmax.f32 %v1328_v46, %v1933_v45  ;;  %v1330_v9 = vpop.f32.mrb[26].mxu0  ;;  %v1935_v11 = vpop.f32.mrb[26].mxu1  ;;  %v8690_v7 = vld [vmem:[%s9446_s3 + $0x40] ss:$8 sps:$4 sm:$0xff]  }
 0x208   :  { %v1994_v13 = vmax.f32 %v1330_v9, %v1935_v11  ;;  %v1332_v14 = vpop.f32.mrb[27].mxu0  ;;  %v1937_v15 = vpop.f32.mrb[27].mxu1  ;;  %v8701_v18 = vld [vmem:[%s9446_s3 + $0x54] ss:$8 sps:$4 sm:$0xff]   ;;  %v8706_v19 = vld [vmem:[%s9446_s3 + $0x50] ss:$8 sps:$4 sm:$0xff]  }
 0x209   :  { %v8522_v16 = vpack.c.bf16 %v2042_v30, %v2041_v24  ;;  %v2008_v17 = vmax.f32 %v1992_v47, %v1993_v34  ;;  %v1995_v20 = vmax.f32 %v1332_v14, %v1937_v15  ;;  %v8713_v43 = vld [vmem:[%s9446_s3 + $0x64] ss:$8 sps:$4 sm:$0xff]   ;;  %v8719_v47 = vld [vmem:[%s9446_s3 + $0x60] ss:$8 sps:$4 sm:$0xff]   ;;  %v8727_v46 = vld [vmem:[%s9446_s3 + $0x74] ss:$8 sps:$4 sm:$0xff]  }
 0x20a   :  { %2472 = vmatmul.mubr.bf16.gmra.mrb[48].mxu0 %v8413_v49  ;;  %3077 = vmatmul.mubr.bf16.gmra.mrb[48].mxu1 %v8528_v22  ;;  %v8538_v49 = vld [vmem:[%s9445_s0 + $0xb8] sm:$0xff]   ;;  %v8739_v24 = vld [vmem:[%s9446_s3 + $0x104] ss:$8 sps:$4 sm:$0xff]  }
 0x20b   :  { %v2029_v23 = vadd.f32 %v8421_v58, %v2008_v17  ;;  %v2009_v26 = vmax.f32 %v1994_v13, %v1995_v20  ;;  %2481 = vmatprep.mubr.bf16.mxu0 %v9539_v3  ;;  %3086 = vmatprep.mubr.bf16.mxu1 %v9539_v3  ;;  %v8732_v45 = vld [vmem:[%s9446_s3 + $0x70] ss:$8 sps:$4 sm:$0xff]  }
 0x20d   :  { %v2030_v21 = vadd.f32 %v8421_v58, %v2009_v26  ;;  %v2043_v27 = vmax.f32 %v2029_v23, 0.0 }
 0x20f   :  { %v2044_v29 = vmax.f32 %v2030_v21, 0.0 }
 0x211   :  { %v8540_v31 = vpack.c.bf16 %v2044_v29, %v2043_v27 }
 0x212   :  { %2482 = vmatmul.mubr.bf16.gmra.mrb[52].mxu0 %v8199_v8  ;;  %3087 = vmatmul.mubr.bf16.gmra.mrb[52].mxu1 %v8538_v49  ;;  %v7271_v8 = vld [vmem:[%s9445_s0 + $0xc8] sm:$0xff]  }
 0x213   :  { %2558 = vmatprep.mubr.bf16.mxu0 %v9539_v3  ;;  %3163 = vmatprep.mubr.bf16.mxu1 %v9539_v3 }
 0x21a   :  { %2559 = vmatmul.mubr.bf16.vlgmr.msra.gmra.mrb[28].mxu0 %v8282_v10  ;;  %3164 = vmatmul.mubr.bf16.vlgmr.msra.gmra.mrb[28].mxu1 %v7271_v8  ;;  %v7081_v10 = vld [vmem:[%s9446_s3 + $0xa4] ss:$8 sps:$4 sm:$0xff]  }
 0x21b   :  { %2568 = vmatprep.mubr.bf16.mxu0 %v9539_v3  ;;  %3173 = vmatprep.mubr.bf16.mxu1 %v9539_v3 }
 0x21c   :  { %4299 = vmatpush1.bf16.msra.mxu1 %v7073_v33  ;;  %3453 = vmatpush1.bf16.msra.mxu0 %v7073_v33 }
 0x21d   :  { %4300 = vmatprep.subr.bf16.mxu1 %v7078_v35  ;;  %3454 = vmatprep.subr.bf16.mxu0 %v7078_v35 }
 0x220   :  { %4301 = vmatpush1.bf16.msra.mxu1 %v7076_v36  ;;  %3455 = vmatpush1.bf16.msra.mxu0 %v7076_v36 }
 0x221   :  { %4302 = vmatprep.subr.bf16.mxu1 %v7081_v10  ;;  %3456 = vmatprep.subr.bf16.mxu0 %v7081_v10 }
 0x222   :  { %2569 = vmatmul.mubr.bf16.gmra.mrb[32].mxu0 %v8451_v52  ;;  %3174 = vmatmul.mubr.bf16.gmra.mrb[32].mxu1 %v7272_v39  ;;  %v7087_v52 = vld [vmem:[%s9446_s3 + $0xc4] ss:$8 sps:$4 sm:$0xff]  }
 0x223   :  { %2578 = vmatprep.mubr.bf16.mxu0 %v9539_v3  ;;  %3183 = vmatprep.mubr.bf16.mxu1 %v9539_v3 }
 0x224   :  { %4303 = vmatpush1.bf16.msra.mxu1 %v7079_v38  ;;  %3457 = vmatpush1.bf16.msra.mxu0 %v7079_v38 }
 0x225   :  { %4304 = vmatprep.subr.bf16.mxu1 %v7084_v40  ;;  %3458 = vmatprep.subr.bf16.mxu0 %v7084_v40 }
 0x228   :  { %4305 = vmatpush1.bf16.msra.mxu1 %v7082_v41  ;;  %3459 = vmatpush1.bf16.msra.mxu0 %v7082_v41 }
 0x229   :  { %4306 = vmatprep.subr.bf16.mxu1 %v7087_v52  ;;  %3460 = vmatprep.subr.bf16.mxu0 %v7087_v52 }
 0x22a   :  { %2579 = vmatmul.mubr.bf16.gmra.mrb[36].mxu0 %v8472_v1  ;;  %3184 = vmatmul.mubr.bf16.gmra.mrb[36].mxu1 %v7273_v51  ;;  %v7094_v1 = vld [vmem:[%s9446_s3 + $0xe4] ss:$8 sps:$4 sm:$0xff]  }
 0x22b   :  { %2588 = vmatprep.mubr.bf16.mxu0 %v9539_v3  ;;  %3193 = vmatprep.mubr.bf16.mxu1 %v9539_v3 }
 0x22c   :  { %4307 = vmatpush1.bf16.msra.mxu1 %v7085_v42  ;;  %3461 = vmatpush1.bf16.msra.mxu0 %v7085_v42 }
 0x22d   :  { %4308 = vmatprep.subr.bf16.mxu1 %v7090_v50  ;;  %3462 = vmatprep.subr.bf16.mxu0 %v7090_v50 }
 0x230   :  { %4309 = vmatpush1.bf16.msra.mxu1 %v7088_v53  ;;  %3463 = vmatpush1.bf16.msra.mxu0 %v7088_v53 }
 0x231   :  { %4310 = vmatprep.subr.bf16.mxu1 %v7094_v1  ;;  %3464 = vmatprep.subr.bf16.mxu0 %v7094_v1 }
 0x232   :  { %2589 = vmatmul.mubr.bf16.gmra.mrb[40].mxu0 %v8493_v37  ;;  %3194 = vmatmul.mubr.bf16.gmra.mrb[40].mxu1 %v7274_v28  ;;  %v7100_v37 = vld [vmem:[%s9446_s3 + $0x4] ss:$8 sps:$4 sm:$0xff]  }
 0x233   :  { %2598 = vmatprep.mubr.bf16.mxu0 %v9539_v3  ;;  %3203 = vmatprep.mubr.bf16.mxu1 %v9539_v3 }
 0x234   :  { %4311 = vmatpush1.bf16.msra.mxu1 %v7092_v54  ;;  %3465 = vmatpush1.bf16.msra.mxu0 %v7092_v54 }
 0x235   :  { %4312 = vmatprep.subr.bf16.mxu1 %v7097_v55  ;;  %3466 = vmatprep.subr.bf16.mxu0 %v7097_v55  ;;  %v8747_v55 = vld [vmem:[%s9446_s3 + $0x100] ss:$8 sps:$4 sm:$0xff]  }
 0x238   :  { %4313 = vmatpush1.bf16.msra.mxu1 %v7095_v56  ;;  %3467 = vmatpush1.bf16.msra.mxu0 %v7095_v56 }
 0x239   :  { %4381 = vmatprep.subr.bf16.mxu1 %v7100_v37  ;;  %3615 = vmatprep.subr.bf16.mxu0 %v7100_v37  ;;  %v8753_v37 = vld [vmem:[%s9446_s3 + $0x114] ss:$8 sps:$4 sm:$0xff]  }
 0x23a   :  { %2599 = vmatmul.mubr.bf16.gmra.mrb[44].mxu0 %v8515_v5  ;;  %3204 = vmatmul.mubr.bf16.gmra.mrb[44].mxu1 %v7275_v57  ;;  %v8678_v5 = vld [vmem:[%s9446_s3 + $0x30] ss:$8 sps:$4 sm:$0xff]  }
 0x23b   :  { %2608 = vmatprep.mubr.bf16.mxu0 %v9539_v3  ;;  %3213 = vmatprep.mubr.bf16.mxu1 %v9539_v3 }
 0x242   :  { %2609 = vmatmul.mubr.bf16.gmra.mrb[48].mxu0 %v8528_v22  ;;  %3214 = vmatmul.mubr.bf16.gmra.mrb[48].mxu1 %v7276_v59 }
 0x243   :  { %2618 = vmatprep.mubr.bf16.mxu0 %v9539_v3  ;;  %3223 = vmatprep.mubr.bf16.mxu1 %v9539_v3 }
 0x24a   :  { %2619 = vmatmul.mubr.bf16.gmra.mrb[52].mxu0 %v8538_v49  ;;  %3224 = vmatmul.mubr.bf16.gmra.mrb[52].mxu1 %v7091_v48 }
 0x24b   :  { %4330 = vmatprep.mubr.bf16.mxu1 %v9539_v3  ;;  %3484 = vmatprep.mubr.bf16.mxu0 %v9539_v3 }
 0x252   :  { %4331 = vmatmul.mubr.bf16.vlgmr.msra.gmra.mrb[56].mxu1 %v8445_v44 }
 0x253   :  { %4340 = vmatprep.mubr.bf16.mxu1 %v9539_v3  ;;  %4382 = vmatpush1.bf16.msra.mxu1 %v8639_v60 }
 0x254   :  { %4383 = vmatprep.subr.bf16.mxu1 %v8644_v61 }
 0x257   :  { %4384 = vmatpush1.bf16.msra.mxu1 %v8652_v62 }
 0x258   :  { %4385 = vmatprep.subr.bf16.mxu1 %v8658_v63 }
 0x25a   :  { %4341 = vmatmul.mubr.bf16.gmra.mrb[60].mxu1 %v8465_v25 }
 0x25b   :  { %4350 = vmatprep.mubr.bf16.mxu1 %v9539_v3  ;;  %4386 = vmatpush1.bf16.msra.mxu1 %v8664_v2 }
 0x25c   :  { %4387 = vmatprep.subr.bf16.mxu1 %v8670_v4 }
 0x25f   :  { %4388 = vmatpush1.bf16.msra.mxu1 %v8678_v5 }
 0x260   :  { %4389 = vmatprep.subr.bf16.mxu1 %v8684_v6 }
 0x262   :  { %4351 = vmatmul.mubr.bf16.gmra.mrb[64].mxu1 %v8485_v32 }
 0x263   :  { %4360 = vmatprep.mubr.bf16.mxu1 %v9539_v3  ;;  %4390 = vmatpush1.bf16.msra.mxu1 %v8690_v7 }
 0x264   :  { %4391 = vmatprep.subr.bf16.mxu1 %v8701_v18 }
 0x267   :  { %4392 = vmatpush1.bf16.msra.mxu1 %v8706_v19 }
 0x268   :  { %4393 = vmatprep.subr.bf16.mxu1 %v8713_v43 }
 0x26a   :  { %4361 = vmatmul.mubr.bf16.gmra.mrb[68].mxu1 %v8509_v0 }
 0x26b   :  { %4370 = vmatprep.mubr.bf16.mxu1 %v9539_v3  ;;  %4394 = vmatpush1.bf16.msra.mxu1 %v8719_v47 }
 0x26c   :  { %4395 = vmatprep.subr.bf16.mxu1 %v8727_v46 }
 0x26f   :  { %4396 = vmatpush1.bf16.msra.mxu1 %v8732_v45 }
 0x270   :  { %4464 = vmatprep.subr.bf16.mxu1 %v8739_v24 }
 0x272   :  { %4371 = vmatmul.mubr.bf16.gmra.mrb[72].mxu1 %v8522_v16 }
 0x273   :  { %4413 = vmatprep.mubr.bf16.mxu1 %v9539_v3 }
 0x2ed   :  { %v2560_v30 = vpop.f32.mrb[28].mxu0  ;;  %v3165_v34 = vpop.f32.mrb[28].mxu1 }
 0x2ee   :  { %v3262_v9 = vmax.f32 %v2560_v30, %v3165_v34  ;;  %v2562_v11 = vpop.f32.mrb[29].mxu0  ;;  %v3167_v13 = vpop.f32.mrb[29].mxu1 }
 0x2ef   :  { %v3263_v14 = vmax.f32 %v2562_v11, %v3167_v13  ;;  %v2564_v15 = vpop.f32.mrb[30].mxu0  ;;  %v3169_v17 = vpop.f32.mrb[30].mxu1  ;;  %v8764_v11 = vld [vmem:[%s9446_s3 + $0x110] ss:$8 sps:$4 sm:$0xff]  }
 0x2f0   :  { %v3264_v20 = vmax.f32 %v2564_v15, %v3169_v17  ;;  %v2566_v22 = vpop.f32.mrb[31].mxu0  ;;  %v3171_v23 = vpop.f32.mrb[31].mxu1 }
 0x2f1   :  { %v3290_v26 = vmax.f32 %v3262_v9, %v3263_v14  ;;  %v3265_v21 = vmax.f32 %v2566_v22, %v3171_v23 }
 0x2f3   :  { %v3304_v49 = vadd.f32 %v8421_v58, %v3290_v26  ;;  %v3291_v27 = vmax.f32 %v3264_v20, %v3265_v21 }
 0x2f5   :  { %v3305_v29 = vadd.f32 %v8421_v58, %v3291_v27  ;;  %v2570_v33 = vpop.f32.mrb[32].mxu0  ;;  %v3175_v35 = vpop.f32.mrb[32].mxu1  ;;  %v3318_v38 = vmax.f32 %v3304_v49, 0.0  ;;  %v8775_v49 = vld [vmem:[%s9446_s3 + $0x124] ss:$8 sps:$4 sm:$0xff]  }
 0x2f6   :  { %v3266_v8 = vmax.f32 %v2570_v33, %v3175_v35  ;;  %v2572_v36 = vpop.f32.mrb[33].mxu0  ;;  %v3177_v10 = vpop.f32.mrb[33].mxu1 }
 0x2f7   :  { %v3319_v40 = vmax.f32 %v3305_v29, 0.0  ;;  %v3267_v39 = vmax.f32 %v2572_v36, %v3177_v10  ;;  %v2574_v41 = vpop.f32.mrb[34].mxu0  ;;  %v3179_v52 = vpop.f32.mrb[34].mxu1 }
 0x2f8   :  { %v3268_v42 = vmax.f32 %v2574_v41, %v3179_v52  ;;  %v2576_v50 = vpop.f32.mrb[35].mxu0  ;;  %v3181_v51 = vpop.f32.mrb[35].mxu1 }
 0x2f9   :  { %v3332_v53 = vpack.c.bf16 %v3319_v40, %v3318_v38  ;;  %v3292_v1 = vmax.f32 %v3266_v8, %v3267_v39  ;;  %v3269_v54 = vmax.f32 %v2576_v50, %v3181_v51 }
 0x2fb   :  { %v3306_v28 = vadd.f32 %v8421_v58, %v3292_v1  ;;  %v3293_v56 = vmax.f32 %v3268_v42, %v3269_v54  ;;  %3485 = vmatmul.mubr.bf16.vlgmr.msra.gmra.mrb[56].mxu0 %v3332_v53  ;;  %4414 = vmatmul.mubr.bf16.vlgmr.msra.gmra.mrb[56].mxu1 %v3332_v53 }
 0x2fc   :  { %3616 = vmatpush1.bf16.msra.mxu0 %v8639_v60  ;;  %3494 = vmatprep.mubr.bf16.mxu0 %v9539_v3 }
 0x2fd   :  { %v3307_v57 = vadd.f32 %v8421_v58, %v3293_v56  ;;  %v2580_v59 = vpop.f32.mrb[36].mxu0  ;;  %v3185_v48 = vpop.f32.mrb[36].mxu1  ;;  %3617 = vmatprep.subr.bf16.mxu0 %v8644_v61  ;;  %4423 = vmatprep.mubr.bf16.mxu1 %v9539_v3  ;;  %v3320_v60 = vmax.f32 %v3306_v28, 0.0  ;;  %v8810_v28 = vld [vmem:[%s9446_s3 + $0x144] ss:$8 sps:$4 sm:$0xff]  }
 0x2fe   :  { %v3270_v30 = vmax.f32 %v2580_v59, %v3185_v48  ;;  %v2582_v34 = vpop.f32.mrb[37].mxu0  ;;  %v3187_v9 = vpop.f32.mrb[37].mxu1  ;;  %4465 = vmatpush1.bf16.msra.mxu1 %v8747_v55 }
 0x2ff   :  { %v3321_v13 = vmax.f32 %v3307_v57, 0.0  ;;  %v3271_v14 = vmax.f32 %v2582_v34, %v3187_v9  ;;  %v2584_v15 = vpop.f32.mrb[38].mxu0  ;;  %v3189_v17 = vpop.f32.mrb[38].mxu1  ;;  %4466 = vmatprep.subr.bf16.mxu1 %v8753_v37 }
 0x300   :  { %v3272_v61 = vmax.f32 %v2584_v15, %v3189_v17  ;;  %v2586_v20 = vpop.f32.mrb[39].mxu0  ;;  %v3191_v22 = vpop.f32.mrb[39].mxu1  ;;  %3618 = vmatpush1.bf16.msra.mxu0 %v8652_v62  ;;  %v8783_v62 = vld [vmem:[%s9446_s3 + $0x120] ss:$8 sps:$4 sm:$0xff]  }
 0x301   :  { %v8768_v23 = vpack.c.bf16 %v3321_v13, %v3320_v60  ;;  %v3294_v26 = vmax.f32 %v3270_v30, %v3271_v14  ;;  %v3273_v21 = vmax.f32 %v2586_v20, %v3191_v22  ;;  %3619 = vmatprep.subr.bf16.mxu0 %v8658_v63  ;;  %v8790_v63 = vld [vmem:[%s9446_s3 + $0x134] ss:$8 sps:$4 sm:$0xff]  }
 0x302   :  { %4467 = vmatpush1.bf16.msra.mxu1 %v8764_v11  ;;  %v8828_v30 = vld [vmem:[%s9446_s3 + $0x154] ss:$8 sps:$4 sm:$0xff]  }
 0x303   :  { %v3308_v27 = vadd.f32 %v8421_v58, %v3294_v26  ;;  %v3295_v29 = vmax.f32 %v3272_v61, %v3273_v21  ;;  %3495 = vmatmul.mubr.bf16.gmra.mrb[60].mxu0 %v8768_v23  ;;  %4424 = vmatmul.mubr.bf16.gmra.mrb[60].mxu1 %v8768_v23  ;;  %v8837_v26 = vld [vmem:[%s9446_s3 + $0x150] ss:$8 sps:$4 sm:$0xff]  }
 0x304   :  { %3620 = vmatpush1.bf16.msra.mxu0 %v8664_v2  ;;  %3504 = vmatprep.mubr.bf16.mxu0 %v9539_v3 }
 0x305   :  { %v3309_v33 = vadd.f32 %v8421_v58, %v3295_v29  ;;  %v2590_v35 = vpop.f32.mrb[40].mxu0  ;;  %v3195_v8 = vpop.f32.mrb[40].mxu1  ;;  %3621 = vmatprep.subr.bf16.mxu0 %v8670_v4  ;;  %4433 = vmatprep.mubr.bf16.mxu1 %v9539_v3  ;;  %v3322_v2 = vmax.f32 %v3308_v27, 0.0  ;;  %v8801_v4 = vld [vmem:[%s9446_s3 + $0x130] ss:$8 sps:$4 sm:$0xff]  }
 0x306   :  { %v3274_v36 = vmax.f32 %v2590_v35, %v3195_v8  ;;  %v2592_v10 = vpop.f32.mrb[41].mxu0  ;;  %v3197_v38 = vpop.f32.mrb[41].mxu1  ;;  %4468 = vmatprep.subr.bf16.mxu1 %v8775_v49  ;;  %v8846_v29 = vld [vmem:[%s9446_s3 + $0x164] ss:$8 sps:$4 sm:$0xff]  }
 0x307   :  { %v3323_v40 = vmax.f32 %v3309_v33, 0.0  ;;  %v3275_v39 = vmax.f32 %v2592_v10, %v3197_v38  ;;  %v2594_v41 = vpop.f32.mrb[42].mxu0  ;;  %v3199_v52 = vpop.f32.mrb[42].mxu1  ;;  %4469 = vmatpush1.bf16.msra.mxu1 %v8783_v62  ;;  %v8864_v10 = vld [vmem:[%s9446_s3 + $0x174] ss:$8 sps:$4 sm:$0xff]  }
 0x308   :  { %v3276_v42 = vmax.f32 %v2594_v41, %v3199_v52  ;;  %v2596_v50 = vpop.f32.mrb[43].mxu0  ;;  %v3201_v51 = vpop.f32.mrb[43].mxu1  ;;  %3622 = vmatpush1.bf16.msra.mxu0 %v8678_v5  ;;  %4470 = vmatprep.subr.bf16.mxu1 %v8790_v63 }
 0x309   :  { %v8804_v53 = vpack.c.bf16 %v3323_v40, %v3322_v2  ;;  %v3296_v1 = vmax.f32 %v3274_v36, %v3275_v39  ;;  %v3277_v54 = vmax.f32 %v2596_v50, %v3201_v51  ;;  %3623 = vmatprep.subr.bf16.mxu0 %v8684_v6  ;;  %v8820_v6 = vld [vmem:[%s9446_s3 + $0x140] ss:$8 sps:$4 sm:$0xff]  }
 0x30b   :  { %v3310_v5 = vadd.f32 %v8421_v58, %v3296_v1  ;;  %v3297_v56 = vmax.f32 %v3276_v42, %v3277_v54  ;;  %3505 = vmatmul.mubr.bf16.gmra.mrb[64].mxu0 %v8804_v53  ;;  %4434 = vmatmul.mubr.bf16.gmra.mrb[64].mxu1 %v8804_v53  ;;  %v8872_v54 = vld [vmem:[%s9446_s3 + $0x170] ss:$8 sps:$4 sm:$0xff]  }
 0x30c   :  { %3624 = vmatpush1.bf16.msra.mxu0 %v8690_v7  ;;  %4471 = vmatpush1.bf16.msra.mxu1 %v8801_v4 }
 0x30d   :  { %v3311_v57 = vadd.f32 %v8421_v58, %v3297_v56  ;;  %v2600_v59 = vpop.f32.mrb[44].mxu0  ;;  %v3205_v48 = vpop.f32.mrb[44].mxu1  ;;  %3514 = vmatprep.mubr.bf16.mxu0 %v9539_v3  ;;  %4443 = vmatprep.mubr.bf16.mxu1 %v9539_v3  ;;  %v3324_v60 = vmax.f32 %v3310_v5, 0.0 }
 0x30e   :  { %v3278_v7 = vmax.f32 %v2600_v59, %v3205_v48  ;;  %v2602_v34 = vpop.f32.mrb[45].mxu0  ;;  %v3207_v9 = vpop.f32.mrb[45].mxu1  ;;  %4472 = vmatprep.subr.bf16.mxu1 %v8810_v28  ;;  %3625 = vmatprep.subr.bf16.mxu0 %v8701_v18 }
 0x30f   :  { %v3325_v13 = vmax.f32 %v3311_v57, 0.0  ;;  %v3279_v14 = vmax.f32 %v2602_v34, %v3207_v9  ;;  %v2604_v15 = vpop.f32.mrb[46].mxu0  ;;  %v3209_v17 = vpop.f32.mrb[46].mxu1 }
 0x310   :  { %v3280_v61 = vmax.f32 %v2604_v15, %v3209_v17  ;;  %v2606_v20 = vpop.f32.mrb[47].mxu0  ;;  %v3211_v22 = vpop.f32.mrb[47].mxu1  ;;  %4473 = vmatpush1.bf16.msra.mxu1 %v8820_v6  ;;  %3626 = vmatpush1.bf16.msra.mxu0 %v8706_v19 }
 0x311   :  { %v8839_v21 = vpack.c.bf16 %v3325_v13, %v3324_v60  ;;  %v3298_v18 = vmax.f32 %v3278_v7, %v3279_v14  ;;  %v3281_v27 = vmax.f32 %v2606_v20, %v3211_v22  ;;  %4474 = vmatprep.subr.bf16.mxu1 %v8828_v30  ;;  %3627 = vmatprep.subr.bf16.mxu0 %v8713_v43  ;;  %v8856_v43 = vld [vmem:[%s9446_s3 + $0x160] ss:$8 sps:$4 sm:$0xff]  }
 0x313   :  { %v3312_v19 = vadd.f32 %v8421_v58, %v3298_v18  ;;  %v3299_v33 = vmax.f32 %v3280_v61, %v3281_v27  ;;  %3515 = vmatmul.mubr.bf16.gmra.mrb[68].mxu0 %v8839_v21  ;;  %4444 = vmatmul.mubr.bf16.gmra.mrb[68].mxu1 %v8839_v21 }
 0x314   :  { %4475 = vmatpush1.bf16.msra.mxu1 %v8837_v26  ;;  %3524 = vmatprep.mubr.bf16.mxu0 %v9539_v3 }
 0x315   :  { %v3313_v35 = vadd.f32 %v8421_v58, %v3299_v33  ;;  %v2610_v8 = vpop.f32.mrb[48].mxu0  ;;  %v3215_v36 = vpop.f32.mrb[48].mxu1  ;;  %3628 = vmatpush1.bf16.msra.mxu0 %v8719_v47  ;;  %4453 = vmatprep.mubr.bf16.mxu1 %v9539_v3  ;;  %v3326_v39 = vmax.f32 %v3312_v19, 0.0 }
 0x316   :  { %v3282_v38 = vmax.f32 %v2610_v8, %v3215_v36  ;;  %v2612_v2 = vpop.f32.mrb[49].mxu0  ;;  %v3217_v40 = vpop.f32.mrb[49].mxu1  ;;  %4476 = vmatprep.subr.bf16.mxu1 %v8846_v29  ;;  %3629 = vmatprep.subr.bf16.mxu0 %v8727_v46  ;;  %v8881_v46 = vld [vmem:[%s9446_s3 + $0x184] ss:$8 sps:$4 sm:$0xff]  }
 0x317   :  { %v3327_v41 = vmax.f32 %v3313_v35, 0.0  ;;  %v3283_v52 = vmax.f32 %v2612_v2, %v3217_v40  ;;  %v2614_v42 = vpop.f32.mrb[50].mxu0  ;;  %v3219_v50 = vpop.f32.mrb[50].mxu1  ;;  %v8897_v35 = vld [vmem:[%s9446_s3 + $0x180] ss:$8 sps:$4 sm:$0xff]  }
 0x318   :  { %v3284_v47 = vmax.f32 %v2614_v42, %v3219_v50  ;;  %v2616_v51 = vpop.f32.mrb[51].mxu0  ;;  %v3221_v1 = vpop.f32.mrb[51].mxu1  ;;  %4477 = vmatpush1.bf16.msra.mxu1 %v8856_v43  ;;  %v7277_v2 = vld [vmem:[%s9447_s2] ss:$0 sm:$0xff]  ;;  %v7178_v42 = vld [vmem:[%s9446_s3 + $0x224] ss:$8 sps:$4 sm:$0xff]  }
 0x319   :  { %v8874_v5 = vpack.c.bf16 %v3327_v41, %v3326_v39  ;;  %v3300_v56 = vmax.f32 %v3282_v38, %v3283_v52  ;;  %v3285_v57 = vmax.f32 %v2616_v51, %v3221_v1  ;;  %3630 = vmatpush1.bf16.msra.mxu0 %v8732_v45  ;;  %4478 = vmatprep.subr.bf16.mxu1 %v8864_v10  ;;  %v8905_v38 = vld [vmem:[%s9446_s3 + $0x194] ss:$8 sps:$4 sm:$0xff]   ;;  %v8936_v41 = vld [vmem:[%s9446_s3 + $0x1a0] ss:$8 sps:$4 sm:$0xff]   ;;  %v7179_v51 = vld [vmem:[%s9446_s3 + $0x230] ss:$8 sps:$4 sm:$0xff]  }
 0x31a   :  { %3795 = vmatprep.subr.bf16.mxu0 %v8739_v24  ;;  %v9042_v52 = vld [vmem:[%s9446_s3 + $0x214] ss:$8 sps:$4 sm:$0xff]   ;;  %v7176_v50 = vld [vmem:[%s9446_s3 + $0x220] ss:$8 sps:$4 sm:$0xff]   ;;  %v7184_v1 = vld [vmem:[%s9446_s3 + $0x244] ss:$8 sps:$4 sm:$0xff]  }
 0x31b   :  { %v3314_v59 = vadd.f32 %v8421_v58, %v3300_v56  ;;  %v3301_v48 = vmax.f32 %v3284_v47, %v3285_v57  ;;  %3525 = vmatmul.mubr.bf16.gmra.mrb[72].mxu0 %v8874_v5  ;;  %4454 = vmatmul.mubr.bf16.gmra.mrb[72].mxu1 %v8874_v5  ;;  %v7181_v47 = vld [vmem:[%s9446_s3 + $0x234] ss:$8 sps:$4 sm:$0xff]   ;;  %v7185_v57 = vld [vmem:[%s9446_s3 + $0x250] ss:$8 sps:$4 sm:$0xff]  }
 0x31c   :  { %4479 = vmatpush1.bf16.msra.mxu1 %v8872_v54  ;;  %3647 = vmatprep.mubr.bf16.mxu0 %v9539_v3  ;;  %v7187_v56 = vld [vmem:[%s9446_s3 + $0x254] ss:$8 sps:$4 sm:$0xff]  }
 0x31d   :  { %v3315_v45 = vadd.f32 %v8421_v58, %v3301_v48  ;;  %v2620_v7 = vpop.f32.mrb[52].mxu0  ;;  %v3225_v34 = vpop.f32.mrb[52].mxu1  ;;  %4496 = vmatprep.mubr.bf16.mxu1 %v9539_v3  ;;  %4567 = vmatprep.subr.bf16.mxu1 %v8881_v46  ;;  %v3328_v13 = vmax.f32 %v3314_v59, 0.0  ;;  %v7188_v59 = vld [vmem:[%s9446_s3 + $0x260] ss:$8 sps:$4 sm:$0xff]  }
 0x31e   :  { %v3286_v24 = vmax.f32 %v2620_v7, %v3225_v34  ;;  %v2622_v9 = vpop.f32.mrb[53].mxu0  ;;  %v3227_v60 = vpop.f32.mrb[53].mxu1  ;;  %v7193_v48 = vld [vmem:[%s9446_s3 + $0x274] ss:$8 sps:$4 sm:$0xff]   ;;  %v7203_v7 = vld [vmem:[%s9448_s5 + $0x28] sm:$0xff]   ;;  %v7204_v34 = vld [vmem:[%s9448_s5 + $0x60] sm:$0xff]  }
 0x31f   :  { %v3329_v14 = vmax.f32 %v3315_v45, 0.0  ;;  %v3287_v15 = vmax.f32 %v2622_v9, %v3227_v60  ;;  %v2624_v17 = vpop.f32.mrb[54].mxu0  ;;  %v3229_v61 = vpop.f32.mrb[54].mxu1  ;;  %v7191_v45 = vld [vmem:[%s9446_s3 + $0x270] ss:$8 sps:$4 sm:$0xff]   ;;  %v7206_v9 = vld [vmem:[%s9448_s5 + $0x68] sm:$0xff]  }
 0x320   :  { %v3288_v20 = vmax.f32 %v2624_v17, %v3229_v61  ;;  %v2626_v22 = vpop.f32.mrb[55].mxu0  ;;  %v3231_v18 = vpop.f32.mrb[55].mxu1  ;;  %v7207_v60 = vld [vmem:[%s9448_s5 + $0x38] sm:$0xff]  }
 0x321   :  { %v3302_v27 = vmax.f32 %v3286_v24, %v3287_v15  ;;  %v3289_v19 = vmax.f32 %v2626_v22, %v3231_v18  ;;  %v8892_v33 = vpack.c.bf16 %v3329_v14, %v3328_v13  ;;  %v7205_v24 = vld [vmem:[%s9448_s5 + $0x30] sm:$0xff]   ;;  %v7210_v14 = vld [vmem:[%s9448_s5 + $0x78] sm:$0xff]  }
 0x322   :  { %v7208_v13 = vld [vmem:[%s9448_s5 + $0x70] sm:$0xff]  }
 0x323   :  { %v3316_v8 = vadd.f32 %v8421_v58, %v3302_v27  ;;  %v3303_v36 = vmax.f32 %v3288_v20, %v3289_v19  ;;  %3648 = vmatmul.mubr.bf16.vlgmr.msra.gmra.mrb[56].mxu0 %v8429_v12  ;;  %4497 = vmatmul.mubr.bf16.vlgmr.msra.gmra.mrb[56].mxu1 %v8768_v23  ;;  %v8918_v58 = vld [vmem:[%s9446_s3 + $0x190] ss:$8 sps:$4 sm:$0xff]  }
 0x324   :  { %3796 = vmatpush1.bf16.msra.mxu0 %v8747_v55  ;;  %3657 = vmatprep.mubr.bf16.mxu0 %v9539_v3 }
 0x325   :  { %v3317_v40 = vadd.f32 %v7277_v2, %v3303_v36  ;;  %3797 = vmatprep.subr.bf16.mxu0 %v8753_v37  ;;  %4506 = vmatprep.mubr.bf16.mxu1 %v9539_v3  ;;  %v3330_v12 = vmax.f32 %v3316_v8, 0.0  ;;  %v8929_v37 = vld [vmem:[%s9446_s3 + $0x1a4] ss:$8 sps:$4 sm:$0xff]  }
 0x326   :  { %4568 = vmatpush1.bf16.msra.mxu1 %v8897_v35 }
 0x327   :  { %v3331_v55 = vmax.f32 %v3317_v40, 0.0  ;;  %4569 = vmatprep.subr.bf16.mxu1 %v8905_v38 }
 0x328   :  { %3798 = vmatpush1.bf16.msra.mxu0 %v8764_v11  ;;  %v8943_v11 = vld [vmem:[%s9446_s3 + $0x1b4] ss:$8 sps:$4 sm:$0xff]  }
 0x329   :  { %3799 = vmatprep.subr.bf16.mxu0 %v8775_v49  ;;  %v8923_v39 = vpack.c.bf16 %v3331_v55, %v3330_v12  ;;  %v8953_v49 = vld [vmem:[%s9446_s3 + $0x1b0] ss:$8 sps:$4 sm:$0xff]  }
 0x32a   :  { %4570 = vmatpush1.bf16.msra.mxu1 %v8918_v58 }
 0x32b   :  { %3658 = vmatmul.mubr.bf16.gmra.mrb[60].mxu0 %v8445_v44  ;;  %4507 = vmatmul.mubr.bf16.gmra.mrb[60].mxu1 %v8804_v53 }
 0x32c   :  { %3800 = vmatpush1.bf16.msra.mxu0 %v8783_v62  ;;  %3667 = vmatprep.mubr.bf16.mxu0 %v9539_v3  ;;  %v8960_v62 = vld [vmem:[%s9446_s3 + $0x1c4] ss:$8 sps:$4 sm:$0xff]  }
 0x32d   :  { %3801 = vmatprep.subr.bf16.mxu0 %v8790_v63  ;;  %4516 = vmatprep.mubr.bf16.mxu1 %v9539_v3  ;;  %v8969_v63 = vld [vmem:[%s9446_s3 + $0x1c0] ss:$8 sps:$4 sm:$0xff]  }
 0x32e   :  { %4571 = vmatprep.subr.bf16.mxu1 %v8929_v37 }
 0x32f   :  { %4572 = vmatpush1.bf16.msra.mxu1 %v8936_v41 }
 0x330   :  { %3802 = vmatpush1.bf16.msra.mxu0 %v8801_v4  ;;  %4573 = vmatprep.subr.bf16.mxu1 %v8943_v11  ;;  %v8976_v4 = vld [vmem:[%s9446_s3 + $0x1d4] ss:$8 sps:$4 sm:$0xff]  }
 0x331   :  { %3803 = vmatprep.subr.bf16.mxu0 %v8810_v28  ;;  %v8985_v28 = vld [vmem:[%s9446_s3 + $0x1d0] ss:$8 sps:$4 sm:$0xff]  }
 0x333   :  { %3668 = vmatmul.mubr.bf16.gmra.mrb[64].mxu0 %v8465_v25  ;;  %4517 = vmatmul.mubr.bf16.gmra.mrb[64].mxu1 %v8839_v21 }
 0x334   :  { %3804 = vmatpush1.bf16.msra.mxu0 %v8820_v6  ;;  %4574 = vmatpush1.bf16.msra.mxu1 %v8953_v49  ;;  %v8992_v6 = vld [vmem:[%s9446_s3 + $0x1e4] ss:$8 sps:$4 sm:$0xff]  }
 0x335   :  { %3677 = vmatprep.mubr.bf16.mxu0 %v9539_v3  ;;  %4526 = vmatprep.mubr.bf16.mxu1 %v9539_v3 }
 0x336   :  { %4575 = vmatprep.subr.bf16.mxu1 %v8960_v62  ;;  %3805 = vmatprep.subr.bf16.mxu0 %v8828_v30  ;;  %v9001_v30 = vld [vmem:[%s9446_s3 + $0x1e0] ss:$8 sps:$4 sm:$0xff]  }
 0x338   :  { %4576 = vmatpush1.bf16.msra.mxu1 %v8969_v63  ;;  %3806 = vmatpush1.bf16.msra.mxu0 %v8837_v26  ;;  %v9008_v26 = vld [vmem:[%s9446_s3 + $0x1f4] ss:$8 sps:$4 sm:$0xff]  }
 0x339   :  { %4577 = vmatprep.subr.bf16.mxu1 %v8976_v4  ;;  %3807 = vmatprep.subr.bf16.mxu0 %v8846_v29  ;;  %v9016_v29 = vld [vmem:[%s9446_s3 + $0x1f0] ss:$8 sps:$4 sm:$0xff]  }
 0x33b   :  { %3678 = vmatmul.mubr.bf16.gmra.mrb[68].mxu0 %v8485_v32  ;;  %4527 = vmatmul.mubr.bf16.gmra.mrb[68].mxu1 %v8874_v5 }
 0x33c   :  { %4578 = vmatpush1.bf16.msra.mxu1 %v8985_v28  ;;  %3687 = vmatprep.mubr.bf16.mxu0 %v9539_v3 }
 0x33d   :  { %3808 = vmatpush1.bf16.msra.mxu0 %v8856_v43  ;;  %4536 = vmatprep.mubr.bf16.mxu1 %v9539_v3  ;;  %v9023_v43 = vld [vmem:[%s9446_s3 + $0x204] ss:$8 sps:$4 sm:$0xff]  }
 0x33e   :  { %4579 = vmatprep.subr.bf16.mxu1 %v8992_v6  ;;  %3809 = vmatprep.subr.bf16.mxu0 %v8864_v10  ;;  %v9035_v10 = vld [vmem:[%s9446_s3 + $0x200] ss:$8 sps:$4 sm:$0xff]  }
 0x340   :  { %4580 = vmatpush1.bf16.msra.mxu1 %v9001_v30 }
 0x341   :  { %3810 = vmatpush1.bf16.msra.mxu0 %v8872_v54  ;;  %4581 = vmatprep.subr.bf16.mxu1 %v9008_v26  ;;  %v7182_v54 = vld [vmem:[%s9446_s3 + $0x240] ss:$8 sps:$4 sm:$0xff]  }
 0x342   :  { %3995 = vmatprep.subr.bf16.mxu0 %v8881_v46  ;;  %v7190_v46 = vld [vmem:[%s9446_s3 + $0x264] ss:$8 sps:$4 sm:$0xff]  }
 0x343   :  { %3688 = vmatmul.mubr.bf16.gmra.mrb[72].mxu0 %v8509_v0  ;;  %4537 = vmatmul.mubr.bf16.gmra.mrb[72].mxu1 %v8892_v33 }
 0x344   :  { %4582 = vmatpush1.bf16.msra.mxu1 %v9016_v29  ;;  %3827 = vmatprep.mubr.bf16.mxu0 %v9539_v3 }
 0x345   :  { %4599 = vmatprep.mubr.bf16.mxu1 %v9539_v3  ;;  %4670 = vmatprep.subr.bf16.mxu1 %v9023_v43 }
 0x34b   :  { %3828 = vmatmul.mubr.bf16.vlgmr.msra.gmra.mrb[56].mxu0 %v8445_v44  ;;  %4600 = vmatmul.mubr.bf16.vlgmr.msra.gmra.mrb[56].mxu1 %v8465_v25  ;;  %v7173_v44 = vld [vmem:[%s9446_s3 + $0x210] ss:$8 sps:$4 sm:$0xff]  }
 0x34c   :  { %3996 = vmatpush1.bf16.msra.mxu0 %v8897_v35  ;;  %3837 = vmatprep.mubr.bf16.mxu0 %v9539_v3 }
 0x34d   :  { %3997 = vmatprep.subr.bf16.mxu0 %v8905_v38  ;;  %4609 = vmatprep.mubr.bf16.mxu1 %v9539_v3 }
 0x34e   :  { %4671 = vmatpush1.bf16.msra.mxu1 %v9035_v10 }
 0x34f   :  { %4672 = vmatprep.subr.bf16.mxu1 %v9042_v52 }
 0x350   :  { %3998 = vmatpush1.bf16.msra.mxu0 %v8918_v58 }
 0x351   :  { %3999 = vmatprep.subr.bf16.mxu0 %v8929_v37 }
 0x352   :  { %4673 = vmatpush1.bf16.msra.mxu1 %v7173_v44 }
 0x353   :  { %3838 = vmatmul.mubr.bf16.gmra.mrb[60].mxu0 %v8465_v25  ;;  %4610 = vmatmul.mubr.bf16.gmra.mrb[60].mxu1 %v8485_v32 }
 0x354   :  { %4000 = vmatpush1.bf16.msra.mxu0 %v8936_v41  ;;  %3847 = vmatprep.mubr.bf16.mxu0 %v9539_v3 }
 0x355   :  { %4001 = vmatprep.subr.bf16.mxu0 %v8943_v11  ;;  %4619 = vmatprep.mubr.bf16.mxu1 %v9539_v3 }
 0x356   :  { %4674 = vmatprep.subr.bf16.mxu1 %v7178_v42 }
 0x357   :  { %4675 = vmatpush1.bf16.msra.mxu1 %v7176_v50 }
 0x358   :  { %4002 = vmatpush1.bf16.msra.mxu0 %v8953_v49  ;;  %4676 = vmatprep.subr.bf16.mxu1 %v7181_v47 }
 0x359   :  { %4003 = vmatprep.subr.bf16.mxu0 %v8960_v62 }
 0x35b   :  { %3848 = vmatmul.mubr.bf16.gmra.mrb[64].mxu0 %v8485_v32  ;;  %4620 = vmatmul.mubr.bf16.gmra.mrb[64].mxu1 %v8509_v0 }
 0x35c   :  { %4004 = vmatpush1.bf16.msra.mxu0 %v8969_v63  ;;  %4677 = vmatpush1.bf16.msra.mxu1 %v7179_v51 }
 0x35d   :  { %3857 = vmatprep.mubr.bf16.mxu0 %v9539_v3  ;;  %4629 = vmatprep.mubr.bf16.mxu1 %v9539_v3 }
 0x35e   :  { %4678 = vmatprep.subr.bf16.mxu1 %v7184_v1  ;;  %4005 = vmatprep.subr.bf16.mxu0 %v8976_v4  ;;  %v9240_v4 = vld [vmem:[%s9449_s4] ss:$0 sm:$0xff] }
 0x360   :  { %4679 = vmatpush1.bf16.msra.mxu1 %v7182_v54  ;;  %4006 = vmatpush1.bf16.msra.mxu0 %v8985_v28 }
 0x361   :  { %4680 = vmatprep.subr.bf16.mxu1 %v7187_v56  ;;  %4007 = vmatprep.subr.bf16.mxu0 %v8992_v6 }
 0x363   :  { %3858 = vmatmul.mubr.bf16.gmra.mrb[68].mxu0 %v8509_v0  ;;  %4630 = vmatmul.mubr.bf16.gmra.mrb[68].mxu1 %v8522_v16 }
 0x364   :  { %4681 = vmatpush1.bf16.msra.mxu1 %v7185_v57  ;;  %3867 = vmatprep.mubr.bf16.mxu0 %v9539_v3 }
 0x365   :  { %4008 = vmatpush1.bf16.msra.mxu0 %v9001_v30  ;;  %4639 = vmatprep.mubr.bf16.mxu1 %v9539_v3 }
 0x366   :  { %4682 = vmatprep.subr.bf16.mxu1 %v7190_v46  ;;  %4009 = vmatprep.subr.bf16.mxu0 %v9008_v26 }
 0x368   :  { %4683 = vmatpush1.bf16.msra.mxu1 %v7188_v59 }
 0x369   :  { %4010 = vmatpush1.bf16.msra.mxu0 %v9016_v29  ;;  %4684 = vmatprep.subr.bf16.mxu1 %v7193_v48 }
 0x36a   :  { %4195 = vmatprep.subr.bf16.mxu0 %v9023_v43 }
 0x36b   :  { %3868 = vmatmul.mubr.bf16.gmra.mrb[72].mxu0 %v8522_v16  ;;  %4640 = vmatmul.mubr.bf16.gmra.mrb[72].mxu1 %v8540_v31 }
 0x36c   :  { %4685 = vmatpush1.bf16.msra.mxu1 %v7191_v45  ;;  %4027 = vmatprep.mubr.bf16.mxu0 %v9539_v3 }
 0x36d   :  { %4702 = vmatprep.mubr.bf16.mxu1 %v9539_v3 }
 0x373   :  { %4028 = vmatmul.mubr.bf16.vlgmr.msra.gmra.mrb[56].mxu0 %v8768_v23  ;;  %4703 = vmatmul.mubr.bf16.vlgmr.msra.gmra.mrb[56].mxu1 %v8804_v53  ;;  %v7279_v23 = vmov 0.0  }
 0x374   :  { %4196 = vmatpush1.bf16.msra.mxu0 %v9035_v10  ;;  %4037 = vmatprep.mubr.bf16.mxu0 %v9539_v3 }
 0x375   :  { %4197 = vmatprep.subr.bf16.mxu0 %v9042_v52  ;;  %4712 = vmatprep.mubr.bf16.mxu1 %v9539_v3 }
 0x376   :  { %6191 = vmatprep.subr.bf16.mxu1 %v7279_v23 }
 0x378   :  { %4198 = vmatpush1.bf16.msra.mxu0 %v7173_v44 }
 0x379   :  { %4199 = vmatprep.subr.bf16.mxu0 %v7178_v42 }
 0x37b   :  { %4038 = vmatmul.mubr.bf16.gmra.mrb[60].mxu0 %v8804_v53  ;;  %4713 = vmatmul.mubr.bf16.gmra.mrb[60].mxu1 %v8839_v21  ;;  %v7199_v53 = vld [vmem:[%s9448_s5 + $0x50] sm:$0xff]  }
 0x37c   :  { %4200 = vmatpush1.bf16.msra.mxu0 %v7176_v50  ;;  %4047 = vmatprep.mubr.bf16.mxu0 %v9539_v3 }
 0x37d   :  { %4201 = vmatprep.subr.bf16.mxu0 %v7181_v47  ;;  %4722 = vmatprep.mubr.bf16.mxu1 %v9539_v3 }
 0x380   :  { %4202 = vmatpush1.bf16.msra.mxu0 %v7179_v51 }
 0x381   :  { %4203 = vmatprep.subr.bf16.mxu0 %v7184_v1 }
 0x383   :  { %4048 = vmatmul.mubr.bf16.gmra.mrb[64].mxu0 %v8839_v21  ;;  %4723 = vmatmul.mubr.bf16.gmra.mrb[64].mxu1 %v8874_v5  ;;  %v7201_v21 = vld [vmem:[%s9448_s5 + $0x58] sm:$0xff]  }
 0x384   :  { %4204 = vmatpush1.bf16.msra.mxu0 %v7182_v54  ;;  %4057 = vmatprep.mubr.bf16.mxu0 %v9539_v3 }
 0x385   :  { %4732 = vmatprep.mubr.bf16.mxu1 %v9539_v3  ;;  %4205 = vmatprep.subr.bf16.mxu0 %v7187_v56 }
 0x388   :  { %4206 = vmatpush1.bf16.msra.mxu0 %v7185_v57  ;;  %v7209_v57 = vld [vmem:[%s9448_s5 + $0xc0] sm:$0xff]  }
 0x389   :  { %4207 = vmatprep.subr.bf16.mxu0 %v7190_v46 }
 0x38b   :  { %4058 = vmatmul.mubr.bf16.gmra.mrb[68].mxu0 %v8874_v5  ;;  %4733 = vmatmul.mubr.bf16.gmra.mrb[68].mxu1 %v8892_v33  ;;  %v7202_v5 = vld [vmem:[%s9448_s5 + $0x20] sm:$0xff]  }
 0x38c   :  { %4067 = vmatprep.mubr.bf16.mxu0 %v9539_v3  ;;  %4208 = vmatpush1.bf16.msra.mxu0 %v7188_v59 }
 0x38d   :  { %4742 = vmatprep.mubr.bf16.mxu1 %v9539_v3  ;;  %4209 = vmatprep.subr.bf16.mxu0 %v7193_v48 }
 0x390   :  { %4210 = vmatpush1.bf16.msra.mxu0 %v7191_v45 }
 0x391   :  { %6171 = vmatprep.subr.bf16.mxu0 %v7279_v23 }
 0x393   :  { %4068 = vmatmul.mubr.bf16.gmra.mrb[72].mxu0 %v8892_v33  ;;  %4743 = vmatmul.mubr.bf16.gmra.mrb[72].mxu1 %v8923_v39 }
 0x394   :  { %4227 = vmatprep.mubr.bf16.mxu0 %v9539_v3  ;;  %6207 = vmatprep.mubr.msk.bf16.mxu1 %vm7280_vm0, %v7279_v23 }
 0x39b   :  { %4228 = vmatmul.mubr.bf16.vlgmr.msra.gmra.mrb[56].mxu0 %v8465_v25  ;;  %v7194_v25 = vld [vmem:[%s9448_s5] sm:$0xff]  }
 0x39c   :  { %4237 = vmatprep.mubr.bf16.mxu0 %v9539_v3  ;;  %6192 = vmatpush3.bf16.msra.mxu1 %v7194_v25 }
 0x39d   :  { %6193 = vmatprep.subr.bf16.mxu1 %v7279_v23 }
 0x3a3   :  { %4238 = vmatmul.mubr.bf16.gmra.mrb[60].mxu0 %v8485_v32  ;;  %v7195_v32 = vld [vmem:[%s9448_s5 + $0x40] sm:$0xff]  }
 0x3a4   :  { %4247 = vmatprep.mubr.bf16.mxu0 %v9539_v3  ;;  %6172 = vmatpush3.bf16.msra.mxu0 %v7195_v32  ;;  %v7211_v32 = vld [vmem:[%s9448_s5 + $0xc8] sm:$0xff]  }
 0x3a5   :  { %6173 = vmatprep.subr.bf16.mxu0 %v7279_v23 }
 0x3ab   :  { %4248 = vmatmul.mubr.bf16.gmra.mrb[64].mxu0 %v8509_v0  ;;  %v7197_v0 = vld [vmem:[%s9448_s5 + $0x48] sm:$0xff]  }
 0x3ac   :  { %4257 = vmatprep.mubr.bf16.mxu0 %v9539_v3  ;;  %6174 = vmatpush3.bf16.msra.mxu0 %v7197_v0 }
 0x3ad   :  { %6175 = vmatprep.subr.bf16.mxu0 %v7279_v23 }
 0x3b0   :  { %6176 = vmatpush3.bf16.msra.mxu0 %v7199_v53 }
 0x3b1   :  { %6177 = vmatprep.subr.bf16.mxu0 %v7279_v23 }
 0x3b3   :  { %4258 = vmatmul.mubr.bf16.gmra.mrb[68].mxu0 %v8522_v16  ;;  %v7198_v16 = vld [vmem:[%s9448_s5 + $0x10] sm:$0xff]  }
 0x3b4   :  { %4267 = vmatprep.mubr.bf16.mxu0 %v9539_v3  ;;  %v7196_v3 = vld [vmem:[%s9448_s5 + $0x8] sm:$0xff]   ;;  %6178 = vmatpush3.bf16.msra.mxu0 %v7201_v21 }
 0x3b5   :  { %6194 = vmatpush3.bf16.msra.mxu1 %v7196_v3  ;;  %6179 = vmatprep.subr.bf16.mxu0 %v7279_v23 }
 0x3b6   :  { %6195 = vmatprep.subr.bf16.mxu1 %v7279_v23 }
 0x3b8   :  { %6180 = vmatpush3.bf16.msra.mxu0 %v7204_v34 }
 0x3b9   :  { %6196 = vmatpush3.bf16.msra.mxu1 %v7198_v16  ;;  %6181 = vmatprep.subr.bf16.mxu0 %v7279_v23 }
 0x3ba   :  { %6197 = vmatprep.subr.bf16.mxu1 %v7279_v23 }
 0x3bb   :  { %4268 = vmatmul.mubr.bf16.gmra.mrb[72].mxu0 %v8540_v31  ;;  %v7200_v31 = vld [vmem:[%s9448_s5 + $0x18] sm:$0xff]  }
 0x3bc   :  { %6182 = vmatpush3.bf16.msra.mxu0 %v7206_v9  ;;  %6187 = vmatprep.mubr.msk.bf16.mxu0 %vm7280_vm0, %v7279_v23  ;;  %v7212_v9 = vld [vmem:[%s9448_s5 + $0x80] sm:$0xff]  }
 0x3bd   :  { %6198 = vmatpush3.bf16.msra.mxu1 %v7200_v31  ;;  %6183 = vmatprep.subr.bf16.mxu0 %v7279_v23 }
 0x3be   :  { %6199 = vmatprep.subr.bf16.mxu1 %v7279_v23 }
 0x3c0   :  { %6184 = vmatpush3.bf16.msra.mxu0 %v7208_v13 }
 0x3c1   :  { %6200 = vmatpush3.bf16.msra.mxu1 %v7202_v5  ;;  %6185 = vmatprep.subr.bf16.mxu0 %v7279_v23 }
 0x3c2   :  { %6201 = vmatprep.subr.bf16.mxu1 %v7279_v23 }
 0x3c4   :  { %6186 = vmatpush3.bf16.msra.mxu0 %v7210_v14 }
 0x3c5   :  { %6202 = vmatpush3.bf16.msra.mxu1 %v7203_v7  ;;  %6211 = vmatprep.subr.bf16.mxu0 %v7279_v23 }
 0x3c6   :  { %6203 = vmatprep.subr.bf16.mxu1 %v7279_v23 }
 0x3c9   :  { %6204 = vmatpush3.bf16.msra.mxu1 %v7205_v24 }
 0x3ca   :  { %6205 = vmatprep.subr.bf16.mxu1 %v7279_v23 }
 0x3cd   :  { %6206 = vmatpush3.bf16.msra.mxu1 %v7207_v60  ;;  %v7213_v60 = vld [vmem:[%s9448_s5 + $0xd0] sm:$0xff]  }
 0x3ce   :  { %6231 = vmatprep.subr.bf16.mxu1 %v7279_v23 }
 0x446   :  { %v4704_v15 = vpop.f32.mrb[56].mxu1 }
 0x447   :  { %v4706_v17 = vpop.f32.mrb[57].mxu1 }
 0x448   :  { %v4708_v61 = vpop.f32.mrb[58].mxu1 }
 0x449   :  { %v4710_v20 = vpop.f32.mrb[59].mxu1 }
 0x44e   :  { %v4714_v22 = vpop.f32.mrb[60].mxu1 }
 0x44f   :  { %v4716_v18 = vpop.f32.mrb[61].mxu1 }
 0x450   :  { %v4718_v27 = vpop.f32.mrb[62].mxu1 }
 0x451   :  { %v4720_v19 = vpop.f32.mrb[63].mxu1 }
 0x456   :  { %v4724_v33 = vpop.f32.mrb[64].mxu1 }
 0x457   :  { %v4726_v35 = vpop.f32.mrb[65].mxu1 }
 0x458   :  { %v9219_v8 = vpop.f32.mrb[66].mxu1 }
 0x459   :  { %v4730_v36 = vpop.f32.mrb[67].mxu1 }
 0x45e   :  { %v9221_v38 = vpop.f32.mrb[68].mxu1 }
 0x45f   :  { %v9223_v2 = vpop.f32.mrb[69].mxu1 }
 0x460   :  { %v9225_v40 = vpop.f32.mrb[70].mxu1 }
 0x461   :  { %v9227_v58 = vpop.f32.mrb[71].mxu1 }
 0x466   :  { %v9229_v12 = vpop.f32.mrb[72].mxu1 }
 0x467   :  { %v9231_v55 = vpop.f32.mrb[73].mxu1 }
 0x468   :  { %v9233_v39 = vpop.f32.mrb[74].mxu1 }
 0x469   :  { %v9235_v37 = vpop.f32.mrb[75].mxu1 }
 0x46e   :  { %v4229_v41 = vpop.f32.mrb[56].mxu0 }
 0x46f   :  { %v4773_v11 = vmax.f32 %v4229_v41, %v4704_v15  ;;  %v4231_v49 = vpop.f32.mrb[57].mxu0 }
 0x470   :  { %v4774_v62 = vmax.f32 %v4231_v49, %v4706_v17  ;;  %v4233_v63 = vpop.f32.mrb[58].mxu0 }
 0x471   :  { %v4775_v28 = vmax.f32 %v4233_v63, %v4708_v61  ;;  %v4235_v6 = vpop.f32.mrb[59].mxu0 }
 0x472   :  { %v4793_v30 = vmax.f32 %v4773_v11, %v4774_v62  ;;  %v4776_v26 = vmax.f32 %v4235_v6, %v4710_v20  ;;  %v7214_v20 = vld [vmem:[%s9448_s5 + $0x88] sm:$0xff]   ;;  %v7216_v62 = vld [vmem:[%s9448_s5 + $0x90] sm:$0xff]  }
 0x474   :  { %v4810_v29 = vadd.f32 %v9240_v4, %v4793_v30  ;;  %v4794_v43 = vmax.f32 %v4775_v28, %v4776_v26  ;;  %v7218_v30 = vld [vmem:[%s9448_s5 + $0x98] sm:$0xff]   ;;  %v7219_v26 = vld [vmem:[%s9448_s5 + $0xe8] sm:$0xff]  }
 0x476   :  { %v4811_v10 = vadd.f32 %v9240_v4, %v4794_v43  ;;  %v4239_v52 = vpop.f32.mrb[60].mxu0  ;;  %v4820_v50 = vmax.f32 %v4810_v29, 0.0 }
 0x477   :  { %v4777_v44 = vmax.f32 %v4239_v52, %v4714_v22  ;;  %v4241_v42 = vpop.f32.mrb[61].mxu0  ;;  %v7215_v22 = vld [vmem:[%s9448_s5 + $0xd8] sm:$0xff]  }
 0x478   :  { %v4821_v47 = vmax.f32 %v4811_v10, 0.0  ;;  %v4778_v51 = vmax.f32 %v4241_v42, %v4716_v18  ;;  %v4243_v1 = vpop.f32.mrb[62].mxu0 }
 0x479   :  { %v4779_v54 = vmax.f32 %v4243_v1, %v4718_v27  ;;  %v4245_v56 = vpop.f32.mrb[63].mxu0  ;;  %v7220_v1 = vld [vmem:[%s9448_s5 + $0xa0] sm:$0xff]  }
 0x47a   :  { %v4830_v46 = vpack.c.bf16 %v4821_v47, %v4820_v50  ;;  %v4795_v59 = vmax.f32 %v4777_v44, %v4778_v51  ;;  %v4780_v48 = vmax.f32 %v4245_v56, %v4720_v19 }
 0x47c   :  { %v4812_v45 = vadd.f32 %v9240_v4, %v4795_v59  ;;  %v4796_v25 = vmax.f32 %v4779_v54, %v4780_v48  ;;  %6208 = vmatmul.mubr.bf16.vlgmr.msra.gmra.mrb[76].mxu1 %v4830_v46  ;;  %v7221_v54 = vld [vmem:[%s9448_s5 + $0xf0] sm:$0xff]   ;;  %v7222_v46 = vld [vmem:[%s9448_s5 + $0xa8] sm:$0xff]   ;;  %v7223_v59 = vld [vmem:[%s9448_s5 + $0xf8] sm:$0xff]  }
 0x47d   :  { %6232 = vmatpush3.bf16.msra.mxu1 %v7209_v57  ;;  %6247 = vmatprep.mubr.msk.bf16.mxu1 %vm7280_vm0, %v7279_v23 }
 0x47e   :  { %v4813_v3 = vadd.f32 %v9240_v4, %v4796_v25  ;;  %v4249_v0 = vpop.f32.mrb[64].mxu0  ;;  %6233 = vmatprep.subr.bf16.mxu1 %v7279_v23  ;;  %v4822_v53 = vmax.f32 %v4812_v45, 0.0  ;;  %v7224_v25 = vld [vmem:[%s9448_s5 + $0xb0] sm:$0xff]  }
 0x47f   :  { %v4781_v16 = vmax.f32 %v4249_v0, %v4724_v33  ;;  %v4251_v31 = vpop.f32.mrb[65].mxu0  ;;  %v7227_v0 = vld [vmem:[%s9448_s5 + $0x108] sm:$0xff]  }
 0x480   :  { %v4823_v21 = vmax.f32 %v4813_v3, 0.0  ;;  %v4782_v5 = vmax.f32 %v4251_v31, %v4726_v35  ;;  %v4253_v7 = vpop.f32.mrb[66].mxu0  ;;  %v7226_v3 = vld [vmem:[%s9448_s5 + $0x100] sm:$0xff]   ;;  %v7229_v31 = vld [vmem:[%s9448_s5 + $0x118] sm:$0xff]  }
 0x481   :  { %v4783_v34 = vmax.f32 %v4253_v7, %v9219_v8  ;;  %6234 = vmatpush3.bf16.msra.mxu1 %v7211_v32  ;;  %v4255_v24 = vpop.f32.mrb[67].mxu0  ;;  %v7233_v7 = vld [vmem:[%s9448_s5 + $0x138] sm:$0xff]  }
 0x482   :  { %v4831_v13 = vpack.c.bf16 %v4823_v21, %v4822_v53  ;;  %v4797_v14 = vmax.f32 %v4781_v16, %v4782_v5  ;;  %v4784_v15 = vmax.f32 %v4255_v24, %v4730_v36  ;;  %6235 = vmatprep.subr.bf16.mxu1 %v7279_v23  ;;  %v7228_v16 = vld [vmem:[%s9448_s5 + $0x110] sm:$0xff]   ;;  %v7230_v53 = vld [vmem:[%s9448_s5 + $0x120] sm:$0xff]   ;;  %v7231_v21 = vld [vmem:[%s9448_s5 + $0x128] sm:$0xff]  }
 0x483   :  { %v7232_v5 = vld [vmem:[%s9448_s5 + $0x130] sm:$0xff]   ;;  %v7235_v24 = vld [vmem:[%s9450_s7 + $0x8] sm:$0xff]  }
 0x484   :  { %v4814_v17 = vadd.f32 %v9240_v4, %v4797_v14  ;;  %v4798_v61 = vmax.f32 %v4783_v34, %v4784_v15  ;;  %6188 = vmatmul.mubr.bf16.vlgmr.msra.gmra.mrb[76].mxu0 %v4831_v13  ;;  %v7234_v34 = vld [vmem:[%s9450_s7] sm:$0xff]   ;;  %v7239_v14 = vld [vmem:[%s9450_s7 + $0x28] sm:$0xff]   ;;  %v7240_v15 = vld [vmem:[%s9450_s7 + $0x30] sm:$0xff]  }
 0x485   :  { %6212 = vmatpush3.bf16.msra.mxu0 %v7212_v9  ;;  %6236 = vmatpush3.bf16.msra.mxu1 %v7213_v60  ;;  %v7236_v9 = vld [vmem:[%s9450_s7 + $0x10] sm:$0xff]   ;;  %v7237_v60 = vld [vmem:[%s9450_s7 + $0x18] sm:$0xff]   ;;  %v7238_v13 = vld [vmem:[%s9450_s7 + $0x20] sm:$0xff]  }
 0x486   :  { %v4815_v18 = vadd.f32 %v9240_v4, %v4798_v61  ;;  %v4259_v27 = vpop.f32.mrb[68].mxu0  ;;  %6213 = vmatprep.subr.bf16.mxu0 %v7279_v23  ;;  %6237 = vmatprep.subr.bf16.mxu1 %v7279_v23  ;;  %v4824_v35 = vmax.f32 %v4814_v17, 0.0  ;;  %v7241_v17 = vld [vmem:[%s9450_s7 + $0x38] sm:$0xff]   ;;  %v7242_v61 = vld [vmem:[%s9451_s9] sm:$0xff]  }
 0x487   :  { %v4785_v19 = vmax.f32 %v4259_v27, %v9221_v38  ;;  %v4261_v33 = vpop.f32.mrb[69].mxu0  ;;  %6227 = vmatprep.mubr.msk.bf16.mxu0 %vm7280_vm0, %v7279_v23  ;;  %v7217_v38 = vld [vmem:[%s9448_s5 + $0xe0] sm:$0xff]  }
 0x488   :  { %v4825_v8 = vmax.f32 %v4815_v18, 0.0  ;;  %v4786_v36 = vmax.f32 %v4261_v33, %v9223_v2  ;;  %v4263_v41 = vpop.f32.mrb[70].mxu0  ;;  %v7245_v18 = vld [vmem:[%s9451_s9 + $0x18] sm:$0xff]   ;;  %v7246_v27 = vld [vmem:[%s9451_s9 + $0x20] sm:$0xff]  }
 0x489   :  { %v4787_v11 = vmax.f32 %v4263_v41, %v9225_v40  ;;  %6214 = vmatpush3.bf16.msra.mxu0 %v7214_v20  ;;  %6238 = vmatpush3.bf16.msra.mxu1 %v7215_v22  ;;  %v4265_v49 = vpop.f32.mrb[71].mxu0  ;;  %v7243_v20 = vld [vmem:[%s9451_s9 + $0x8] sm:$0xff]   ;;  %v7244_v22 = vld [vmem:[%s9451_s9 + $0x10] sm:$0xff]  }
 0x48a   :  { %v4832_v63 = vpack.c.bf16 %v4825_v8, %v4824_v35  ;;  %v4799_v28 = vmax.f32 %v4785_v19, %v4786_v36  ;;  %v4788_v6 = vmax.f32 %v4265_v49, %v9227_v58  ;;  %6215 = vmatprep.subr.bf16.mxu0 %v7279_v23  ;;  %6239 = vmatprep.subr.bf16.mxu1 %v7279_v23  ;;  %v7247_v19 = vld [vmem:[%s9451_s9 + $0x28] sm:$0xff]  }
 0x48c   :  { %v4816_v2 = vadd.f32 %v9240_v4, %v4799_v28  ;;  %v4800_v40 = vmax.f32 %v4787_v11, %v4788_v6 }
 0x48d   :  { %6216 = vmatpush3.bf16.msra.mxu0 %v7216_v62  ;;  %6240 = vmatpush3.bf16.msra.mxu1 %v7217_v38 }
 0x48e   :  { %v4817_v29 = vadd.f32 %v9240_v4, %v4800_v40  ;;  %v4269_v58 = vpop.f32.mrb[72].mxu0  ;;  %6217 = vmatprep.subr.bf16.mxu0 %v7279_v23  ;;  %6241 = vmatprep.subr.bf16.mxu1 %v7279_v23  ;;  %v4826_v52 = vmax.f32 %v4816_v2, 0.0 }
 0x48f   :  { %v4789_v43 = vmax.f32 %v4269_v58, %v9229_v12  ;;  %v4271_v10 = vpop.f32.mrb[73].mxu0 }
 0x490   :  { %v4827_v44 = vmax.f32 %v4817_v29, 0.0  ;;  %v4790_v42 = vmax.f32 %v4271_v10, %v9231_v55  ;;  %v4273_v50 = vpop.f32.mrb[74].mxu0 }
 0x491   :  { %v4791_v47 = vmax.f32 %v4273_v50, %v9233_v39  ;;  %6218 = vmatpush3.bf16.msra.mxu0 %v7218_v30  ;;  %6242 = vmatpush3.bf16.msra.mxu1 %v7219_v26  ;;  %v4275_v51 = vpop.f32.mrb[75].mxu0  ;;  %v6089_v50 = vld [vmem:[%s9452_s6] ss:$0 sm:$0xff] }
 0x492   :  { %v4833_v12 = vpack.c.bf16 %v4827_v44, %v4826_v52  ;;  %v4801_v56 = vmax.f32 %v4789_v43, %v4790_v42  ;;  %v4792_v57 = vmax.f32 %v4275_v51, %v9235_v37  ;;  %6219 = vmatprep.subr.bf16.mxu0 %v7279_v23  ;;  %6243 = vmatprep.subr.bf16.mxu1 %v7279_v23 }
 0x494   :  { %v4818_v55 = vadd.f32 %v9240_v4, %v4801_v56  ;;  %v4802_v39 = vmax.f32 %v4791_v47, %v4792_v57 }
 0x495   :  { %6220 = vmatpush3.bf16.msra.mxu0 %v7220_v1  ;;  %6244 = vmatpush3.bf16.msra.mxu1 %v7221_v54 }
 0x496   :  { %v4819_v48 = vadd.f32 %v9240_v4, %v4802_v39  ;;  %6221 = vmatprep.subr.bf16.mxu0 %v7279_v23  ;;  %6245 = vmatprep.subr.bf16.mxu1 %v7279_v23  ;;  %v4828_v37 = vmax.f32 %v4818_v55, 0.0  ;;  %v7225_v4 = vld [vmem:[%s9448_s5 + $0xb8] sm:$0xff]  }
 0x498   :  { %v4829_v45 = vmax.f32 %v4819_v48, 0.0  ;;  %v7249_v48 = vld [vmem:[%s9451_s9 + $0x38] sm:$0xff]  }
 0x499   :  { %6222 = vmatpush3.bf16.msra.mxu0 %v7222_v46  ;;  %6246 = vmatpush3.bf16.msra.mxu1 %v7223_v59  ;;  %v7248_v59 = vld [vmem:[%s9451_s9 + $0x30] sm:$0xff]  }
 0x49a   :  { %v4834_v32 = vpack.c.bf16 %v4829_v45, %v4828_v37  ;;  %6223 = vmatprep.subr.bf16.mxu0 %v7279_v23  ;;  %6271 = vmatprep.subr.bf16.mxu1 %v7279_v23  ;;  %v6090_v37 = vld [vmem:[%s9453_s8] ss:$0 sm:$0xff] }
 0x49c   :  { %6248 = vmatmul.mubr.bf16.vlgmr.msra.gmra.mrb[80].mxu1 %v4833_v12 }
 0x49d   :  { %6224 = vmatpush3.bf16.msra.mxu0 %v7224_v25  ;;  %6287 = vmatprep.mubr.msk.bf16.mxu1 %vm7280_vm0, %v7279_v23 }
 0x49e   :  { %6225 = vmatprep.subr.bf16.mxu0 %v7279_v23  ;;  %6272 = vmatpush3.bf16.msra.mxu1 %v7234_v34 }
 0x49f   :  { %6273 = vmatprep.subr.bf16.mxu1 %v7279_v23 }
 0x4a1   :  { %6226 = vmatpush3.bf16.msra.mxu0 %v7225_v4 }
 0x4a2   :  { %6251 = vmatprep.subr.bf16.mxu0 %v7279_v23  ;;  %6274 = vmatpush3.bf16.msra.mxu1 %v7235_v24 }
 0x4a3   :  { %6275 = vmatprep.subr.bf16.mxu1 %v7279_v23 }
 0x4a4   :  { %6228 = vmatmul.mubr.bf16.vlgmr.msra.gmra.mrb[80].mxu0 %v4832_v63 }
 0x4a5   :  { %6252 = vmatpush3.bf16.msra.mxu0 %v7226_v3  ;;  %6267 = vmatprep.mubr.msk.bf16.mxu0 %vm7280_vm0, %v7279_v23 }
 0x4a6   :  { %6253 = vmatprep.subr.bf16.mxu0 %v7279_v23  ;;  %6276 = vmatpush3.bf16.msra.mxu1 %v7236_v9 }
 0x4a7   :  { %6277 = vmatprep.subr.bf16.mxu1 %v7279_v23 }
 0x4a9   :  { %6254 = vmatpush3.bf16.msra.mxu0 %v7227_v0 }
 0x4aa   :  { %6255 = vmatprep.subr.bf16.mxu0 %v7279_v23  ;;  %6278 = vmatpush3.bf16.msra.mxu1 %v7237_v60 }
 0x4ab   :  { %6279 = vmatprep.subr.bf16.mxu1 %v7279_v23 }
 0x4ad   :  { %6256 = vmatpush3.bf16.msra.mxu0 %v7228_v16 }
 0x4ae   :  { %6257 = vmatprep.subr.bf16.mxu0 %v7279_v23  ;;  %6280 = vmatpush3.bf16.msra.mxu1 %v7238_v13 }
 0x4af   :  { %6281 = vmatprep.subr.bf16.mxu1 %v7279_v23 }
 0x4b1   :  { %6258 = vmatpush3.bf16.msra.mxu0 %v7229_v31 }
 0x4b2   :  { %6259 = vmatprep.subr.bf16.mxu0 %v7279_v23  ;;  %6282 = vmatpush3.bf16.msra.mxu1 %v7239_v14 }
 0x4b3   :  { %6283 = vmatprep.subr.bf16.mxu1 %v7279_v23 }
 0x4b5   :  { %6260 = vmatpush3.bf16.msra.mxu0 %v7230_v53 }
 0x4b6   :  { %6261 = vmatprep.subr.bf16.mxu0 %v7279_v23  ;;  %6284 = vmatpush3.bf16.msra.mxu1 %v7240_v15 }
 0x4b7   :  { %6285 = vmatprep.subr.bf16.mxu1 %v7279_v23 }
 0x4b9   :  { %6262 = vmatpush3.bf16.msra.mxu0 %v7231_v21 }
 0x4ba   :  { %6263 = vmatprep.subr.bf16.mxu0 %v7279_v23  ;;  %6286 = vmatpush3.bf16.msra.mxu1 %v7241_v17 }
 0x4bd   :  { %6264 = vmatpush3.bf16.msra.mxu0 %v7232_v5 }
 0x4be   :  { %6265 = vmatprep.subr.bf16.mxu0 %v7279_v23 }
 0x4c1   :  { %6266 = vmatpush3.bf16.msra.mxu0 %v7233_v7 }
 0x4c2   :  { %6291 = vmatprep.subr.bf16.mxu0 %v7279_v23 }
 0x4c4   :  { %6268 = vmatmul.mubr.bf16.vlgmr.msra.gmra.mrb[84].mxu0 %v4834_v32 }
 0x4c5   :  { %6307 = vmatprep.mubr.msk.bf16.mxu0 %vm7280_vm0, %v7279_v23  ;;  %6292 = vmatpush3.bf16.msra.mxu0 %v7242_v61 }
 0x4c6   :  { %6293 = vmatprep.subr.bf16.mxu0 %v7279_v23 }
 0x4c9   :  { %6294 = vmatpush3.bf16.msra.mxu0 %v7243_v20 }
 0x4ca   :  { %6295 = vmatprep.subr.bf16.mxu0 %v7279_v23 }
 0x4cd   :  { %6296 = vmatpush3.bf16.msra.mxu0 %v7244_v22 }
 0x4ce   :  { %6297 = vmatprep.subr.bf16.mxu0 %v7279_v23 }
 0x4d1   :  { %6298 = vmatpush3.bf16.msra.mxu0 %v7245_v18 }
 0x4d2   :  { %6299 = vmatprep.subr.bf16.mxu0 %v7279_v23 }
 0x4d5   :  { %6300 = vmatpush3.bf16.msra.mxu0 %v7246_v27 }
 0x4d6   :  { %6301 = vmatprep.subr.bf16.mxu0 %v7279_v23 }
 0x4d9   :  { %6302 = vmatpush3.bf16.msra.mxu0 %v7247_v19 }
 0x4da   :  { %6303 = vmatprep.subr.bf16.mxu0 %v7279_v23 }
 0x4dd   :  { %6304 = vmatpush3.bf16.msra.mxu0 %v7248_v59 }
 0x4de   :  { %6305 = vmatprep.subr.bf16.mxu0 %v7279_v23  ;;  %v6099_v23 = vld [vmem:[%s9454_s10] ss:$0 sm:$0xff] }
 0x4e1   :  { %6306 = vmatpush3.bf16.msra.mxu0 %v7249_v48 }
 0x54f   :  { %v5039_v33 = vpop.f32.mrb[76].mxu1 }
 0x550   :  { %v6209_v35 = vpop.f32.mrb[77].mxu1 }
 0x551   :  { %v5042_v8 = vpop.f32.mrb[78].mxu1 }
 0x552   :  { %v6210_v36 = vpop.f32.mrb[79].mxu1 }
 0x557   :  { %v4950_v41 = vpop.f32.mrb[76].mxu0 }
 0x558   :  { %v5040_v11 = vadd.f32 %v5039_v33, %v4950_v41  ;;  %v6189_v49 = vpop.f32.mrb[77].mxu0 }
 0x559   :  { %v4953_v62 = vpop.f32.mrb[78].mxu0 }
 0x55a   :  { %v5043_v38 = vadd.f32 %v5042_v8, %v4953_v62  ;;  %v6190_v63 = vpop.f32.mrb[79].mxu0 }
 0x56f   :  { %v5253_v28 = vpop.f32.mrb[80].mxu1 }
 0x570   :  { %v6249_v6 = vpop.f32.mrb[81].mxu1 }
 0x571   :  { %v5256_v2 = vpop.f32.mrb[82].mxu1 }
 0x572   :  { %v6250_v40 = vpop.f32.mrb[83].mxu1 }
 0x577   :  { %v5145_v30 = vpop.f32.mrb[80].mxu0 }
 0x578   :  { %v5152_v26 = vadd.f32 %v5145_v30, %v5040_v11  ;;  %v6229_v29 = vpop.f32.mrb[81].mxu0 }
 0x579   :  { %v5148_v58 = vpop.f32.mrb[82].mxu0 }
 0x57a   :  { %v5153_v43 = vadd.f32 %v5148_v58, %v5043_v38  ;;  %v6230_v10 = vpop.f32.mrb[83].mxu0  ;;  %v5260_v52 = vadd.f32 %v5253_v28, %v5152_v26 }
 0x57c   :  { %v5261_v44 = vadd.f32 %v5256_v2, %v5153_v43 }
 0x597   :  { %v5361_v42 = vpop.f32.mrb[84].mxu0 }
 0x598   :  { %v5368_v47 = vadd.f32 %v5361_v42, %v5260_v52  ;;  %v6269_v51 = vpop.f32.mrb[85].mxu0 }
 0x599   :  { %v5364_v1 = vpop.f32.mrb[86].mxu0 }
 0x59a   :  { %v5377_v54 = vadd.f32 %v6089_v50, %v5368_v47  ;;  %v5369_v12 = vadd.f32 %v5364_v1, %v5261_v44  ;;  %v6270_v56 = vpop.f32.mrb[87].mxu0 }
 0x59c   :  { %v5378_v57 = vadd.f32 %v6089_v50, %v5369_v12  ;;  %v5379_v55 = vmax.f32 %v5377_v54, 0.0 }
 0x59e   :  { %v5380_v39 = vmax.f32 %v5378_v57, 0.0 }
 0x5a0   :  { %v5381_v46 = vpack.c.bf16 %v5380_v39, %v5379_v55 }
 0x5a2   :  { %6288 = vmatmul.mubr.bf16.vlgmr.msra.gmra.mrb[84].mxu1 %v5381_v46 }
 0x675   :  { %v5487_v45 = vpop.f32.mrb[84].mxu1 }
 0x676   :  { %v5488_v25 = vadd.f32 %v6090_v37, %v5487_v45  ;;  %v6289_v32 = vpop.f32.mrb[85].mxu1 }
 0x677   :  { %v5490_v4 = vpop.f32.mrb[86].mxu1 }
 0x678   :  { %v5491_v3 = vadd.f32 %v6090_v37, %v5490_v4  ;;  %v6290_v0 = vpop.f32.mrb[87].mxu1  ;;  %v5494_v16 = vmax.f32 %v5488_v25, 0.0 }
 0x67a   :  { %v5495_v31 = vmax.f32 %v5491_v3, 0.0 }
 0x67c   :  { %v5496_v53 = vpack.c.bf16 %v5495_v31, %v5494_v16 }
 0x67e   :  { %6308 = vmatmul.mubr.bf16.vlgmr.msra.gmra.mrb[88].mxu0 %v5496_v53 }
 0x751   :  { %v5602_v21 = vpop.f32.mrb[88].mxu0 }
 0x752   :  { %v5603_v5 = vadd.f32 %v6099_v23, %v5602_v21  ;;  %v6309_v7 = vpop.f32.mrb[89].mxu0 }
 0x753   :  { %v5605_v34 = vpop.f32.mrb[90].mxu0 }
 0x754   :  { %5609 = vst [vmem:[%s9455_s11] sm:$0xff] %v5603_v5  ;;  %v5606_v24 = vadd.f32 %v6099_v23, %v5605_v34  ;;  %v6310_v9 = vpop.f32.mrb[91].mxu0 }
 0x756   :  { %5610 = vst [vmem:[%s9455_s11 + $0x8] sm:$0xff] %v5606_v24 }

</bundles_post_ra>
